<compile_context>
chip_gen: v7x
topology: tpu7x:2x2x1
jax: 0.10.0
libtpu: 0.0.40
codegen_flags: <defaults>
</compile_context>

<pallas_src>
import functools
import math

import jax
import jax.numpy as jnp
import numpy as np
from jax.experimental import pallas as pl
from jax.experimental.pallas import tpu as pltpu

LEAKY_SLOPE = 0.2  # nn.LeakyReLU(0.2)


def _leaky(v):
    return jnp.where(v > 0, v, LEAKY_SLOPE * v)


# ---------------------------------------------------------------------------
# Fused kernel (one grid step = Bt images).
#   x_ref    : (Bt*R1, 15*Cin) bf16   15-tap packed, flattened input rows
#   w1_ref   : (15*Cin, 3*C1)  bf16   dx-expanded conv1 weight
#   b1_ref   : (1, 3*C1)       f32    conv1 bias tiled 3x (per dx block)
#   w2_ref   : (3, 3*C1, C2)   bf16   conv2 weight, (dy, dx*C1+cin, cout)
#   b2_ref   : (1, C2)         f32
#   w3_ref   : (C2, C3)        bf16   linear weight (in, out)
#   b3_ref   : (1, C3)         f32
#   mask_ref : (Bt, Bt*R1)     f32    block-diag valid-position mask / n_valid
#   o_ref    : (1, Bt, C3)     f32
#   h1cat_ref: VMEM (Bt*R1 + 2W, 3*C1) bf16 scratch (dx-packed conv1 act)
# Flat layout: one flat row = one spatial pixel (row width W); invalid flat
# positions produce finite garbage that the mask matmul zeroes out.
# ---------------------------------------------------------------------------
def _encoder_kernel(x_ref, w1_ref, b1_ref, w2_ref, b2_ref, w3_ref, b3_ref,
                    mask_ref, o_ref, h1cat_ref, *, W):
    rows = x_ref.shape[0]          # Bt * R1
    C1x3 = w1_ref.shape[-1]        # 3 * C1
    C2 = w2_ref.shape[-1]

    # ---- conv1: ONE bf16 matmul -> bias -> LeakyReLU -> bf16 store ---------
    a1 = jnp.dot(x_ref[...], w1_ref[...], preferred_element_type=jnp.float32)
    a1 = _leaky(a1 + b1_ref[...])
    h1cat_ref[0:rows, :] = a1.astype(jnp.bfloat16)
    # zero the 2W-row tail pad (only read by masked-out garbage output rows)
    h1cat_ref[rows:rows + 2 * W, :] = jnp.zeros((2 * W, C1x3), jnp.bfloat16)

    # ---- conv2: 3 aligned bf16 matmuls, K = 3*C1 ----------------------------
    acc2 = jnp.zeros((rows, C2), jnp.float32)
    for dy in range(3):
        s = dy * W                 # multiples of W -> sublane-aligned slices
        acc2 = acc2 + jnp.dot(h1cat_ref[s:s + rows, :], w2_ref[dy],
                              preferred_element_type=jnp.float32)
    acc2 = _leaky(acc2 + b2_ref[...])

    # ---- masked per-image spatial mean as a single small matmul ------------
    feat = jnp.dot(mask_ref[...], acc2,
                   preferred_element_type=jnp.float32)          # (Bt, C2)

    # ---- linear head + LeakyReLU -------------------------------------------
    out = jnp.dot(feat.astype(jnp.bfloat16), w3_ref[...],
                  preferred_element_type=jnp.float32) + b3_ref[...]
    o_ref[0] = _leaky(out)


def _pick_block_batch(B, max_bt=8):
    """Largest Bt <= max_bt dividing B while keeping >=2 grid steps (v7x: 2 TCs)."""
    if B <= 1:
        return 1
    target = min(max_bt, max(1, B // 2))
    for bt in range(target, 0, -1):
        if B % bt == 0:
            return bt
    return 1


def encoder_forward(x_nchw, prep, *, block_batch=None):
    """x_nchw: (B, Cin, H, W) f32 ; prep: pre-converted params (prepare_params)."""
    B, Cin, H, W = x_nchw.shape
    assert H >= 5 and W >= 5, "need at least one valid conv2 output position"
    C1x3 = prep["w1"].shape[-1]
    C2 = prep["w2"].shape[-1]
    C3 = prep["w3"].shape[-1]

    R1 = (H - 2) * W               # dx-packed conv1 rows per image
    n_valid = (H - 4) * (W - 4)
    Bt = _pick_block_batch(B) if block_batch is None else block_batch
    assert B % Bt == 0
    n_steps = B // Bt

    # NCHW -> NHWC, one zero-pad row at the bottom, flatten rows, and pack the
    # 15 (ky in 0..2, j=kx+dx in 0..4) taps channel-wise so conv1 is one matmul
    # whose output is already dx-packed.
    x = jnp.transpose(x_nchw, (0, 2, 3, 1))                    # (B, H, W, Cin)
    xf = jnp.pad(x, ((0, 0), (0, 1), (0, 0), (0, 0)))          # (B, H+1, W, Cin)
    xf = xf.reshape(B, (H + 1) * W, Cin)
    slabs = [xf[:, ky * W + j: ky * W + j + R1, :]
             for ky in range(3) for j in range(5)]
    x_cat = jnp.concatenate(slabs, axis=-1)                    # (B, R1, 15*Cin)
    x_cat = x_cat.reshape(B * R1, 15 * Cin).astype(jnp.bfloat16)

    # Block-diagonal (per image) valid-position mask folded with 1/n_valid.
    m2 = np.arange(R1)
    valid = ((m2 // W) < (H - 4)) & ((m2 % W) < (W - 4))
    base = valid.astype(np.float32) / float(n_valid)
    mask_mat = jnp.asarray(np.kron(np.eye(Bt, dtype=np.float32), base[None, :]))

    kernel = functools.partial(_encoder_kernel, W=W)
    out = pl.pallas_call(
        kernel,
        out_shape=jax.ShapeDtypeStruct((n_steps, Bt, C3), jnp.float32),
        grid=(n_steps,),
        in_specs=[
            pl.BlockSpec((Bt * R1, 15 * Cin), lambda b: (b, 0)),
            pl.BlockSpec((15 * Cin, C1x3), lambda b: (0, 0)),
            pl.BlockSpec((1, C1x3), lambda b: (0, 0)),
            pl.BlockSpec((3, C1x3, C2), lambda b: (0, 0, 0)),
            pl.BlockSpec((1, C2), lambda b: (0, 0)),
            pl.BlockSpec((C2, C3), lambda b: (0, 0)),
            pl.BlockSpec((1, C3), lambda b: (0, 0)),
            pl.BlockSpec((Bt, Bt * R1), lambda b: (0, 0)),
        ],
        out_specs=pl.BlockSpec((1, Bt, C3), lambda b: (b, 0, 0)),
        scratch_shapes=[pltpu.VMEM((Bt * R1 + 2 * W, C1x3), jnp.bfloat16)],
        compiler_params=pltpu.CompilerParams(
            dimension_semantics=("parallel",)),
    )(x_cat, prep["w1"], prep["b1"], prep["w2"], prep["b2"],
      prep["w3"], prep["b3"], mask_mat)
    return out.reshape(B, C3)


# ---------------------------------------------------------------------------
# Parameters (PyTorch layouts) + one-time conversion to kernel layouts.
# TODO(synk): trained module weights are not loadable in-script; deterministic
#             He-style random inits with identical shapes are used instead.
# ---------------------------------------------------------------------------
def init_params(key, in_c=3, latent_dim=256):
    c1, c2 = latent_dim, latent_dim // 2
    k1, k2, k3, k4, k5, k6 = jax.random.split(key, 6)
    w1 = jax.random.normal(k1, (c1, in_c, 3, 3), jnp.float32) * math.sqrt(2.0 / (in_c * 9))
    b1 = jax.random.normal(k2, (c1,), jnp.float32) * 0.01
    w2 = jax.random.normal(k3, (c2, c1, 3, 3), jnp.float32) * math.sqrt(2.0 / (c1 * 9))
    b2 = jax.random.normal(k4, (c2,), jnp.float32) * 0.01
    w3 = jax.random.normal(k5, (latent_dim, c2), jnp.float32) * math.sqrt(2.0 / c2)
    b3 = jax.random.normal(k6, (latent_dim,), jnp.float32) * 0.01
    return {"convs": [(w1, b1), (w2, b2)], "linear": (w3, b3)}


def prepare_params(params):
    """One-time layout conversion + bf16 casts (no per-forward transposes)."""
    (w1, b1), (w2, b2) = params["convs"]
    w3, b3 = params["linear"]
    c1, cin = w1.shape[0], w1.shape[1]
    c2 = w2.shape[0]
    # conv1: (cout,cin,ky,kx) -> dx-expanded (15*cin, 3*c1) so one matmul emits
    # the dx-packed conv1 activation: W1big[(ky*5+j)*cin+c, dx*c1+o] = w1[o,c,ky,j-dx]
    w1t = jnp.transpose(w1, (2, 3, 1, 0))                      # (ky, kx, cin, c1)
    w1big = jnp.zeros((3, 5, cin, 3, c1), jnp.float32)         # (ky, j, cin, dx, c1)
    for dx in range(3):
        w1big = w1big.at[:, dx:dx + 3, :, dx, :].set(w1t)      # j = kx + dx
    w1big = w1big.reshape(15 * cin, 3 * c1).astype(jnp.bfloat16)
    b1big = jnp.tile(b1, 3).reshape(1, 3 * c1)                 # f32, per-dx tiled
    # conv2: (cout,cin,ky,kx) -> (dy, dx*cin, cout) bf16 (K = 3*c1 per dy-matmul)
    w2t = jnp.transpose(w2, (2, 3, 1, 0)).reshape(3, 3 * c1, c2).astype(jnp.bfloat16)
    return {
        "w1": w1big, "b1": b1big,
        "w2": w2t, "b2": b2.reshape(1, -1),
        "w3": jnp.transpose(w3).astype(jnp.bfloat16), "b3": b3.reshape(1, -1),
    }


# ---------------------------------------------------------------------------
# Pure-JAX f32 reference (same math, no Pallas) for correctness checking.
# ---------------------------------------------------------------------------
def reference_forward(x_nchw, params):
    x = jnp.transpose(x_nchw, (0, 2, 3, 1))

    def conv(x, w, b):
        wk = jnp.transpose(w, (2, 3, 1, 0))                    # HWIO
        y = jax.lax.conv_general_dilated(
            x, wk, window_strides=(1, 1), padding="VALID",
            dimension_numbers=("NHWC", "HWIO", "NHWC"),
            precision=jax.lax.Precision.HIGHEST)
        return y + b.reshape(1, 1, 1, -1)

    (w1, b1), (w2, b2) = params["convs"]
    x = _leaky(conv(x, w1, b1))
    x = _leaky(conv(x, w2, b2))
    h = x.mean(axis=(1, 2))
    w3, b3 = params["linear"]
    h = jnp.dot(h, w3.T, precision=jax.lax.Precision.HIGHEST) + b3
    return _leaky(h)


if __name__ == "__main__":
    key = jax.random.PRNGKey(0)
    pkey, xkey = jax.random.split(key)
    params = init_params(pkey)
    prep = prepare_params(params)

    # NCHW input matching the PyTorch module (in_c=3), small spatial size.
    x = jax.random.normal(xkey, (2, 3, 16, 16), jnp.float32)

    out = jax.block_until_ready(jax.jit(encoder_forward)(x, prep))
    ref = jax.block_until_ready(reference_forward(x, params))

    assert out.shape == (2, 256), out.shape
    # bf16 matmul operands with f32 accumulation vs an all-f32 reference.
    np.testing.assert_allclose(np.asarray(out), np.asarray(ref),
                               rtol=5e-2, atol=3e-2)
    print("KERNEL_OK")
</pallas_src>

<mosaic_0001>
module attributes {stable_mosaic.version = 11 : i64} {
  func.func @_encoder_kernel(%arg0: i32, %arg1: memref<224x45xbf16, #tpu.memory_space<vmem>>, %arg2: memref<45x768xbf16, #tpu.memory_space<vmem>>, %arg3: memref<1x768xf32, #tpu.memory_space<vmem>>, %arg4: memref<3x768x128xbf16, #tpu.memory_space<vmem>>, %arg5: memref<1x128xf32, #tpu.memory_space<vmem>>, %arg6: memref<128x256xbf16, #tpu.memory_space<vmem>>, %arg7: memref<1x256xf32, #tpu.memory_space<vmem>>, %arg8: memref<1x224xf32, #tpu.memory_space<vmem>>, %arg9: memref<1x1x256xf32, #tpu.memory_space<vmem>>, %arg10: memref<256x768xbf16, #tpu.memory_space<vmem>>) attributes {dimension_semantics = [#tpu.dimension_semantics<parallel>], iteration_bounds = array<i64: 2>, scalar_prefetch = 0 : i64, scratch_operands = 1 : i64, tpu.core_type = #tpu.core_type<tc>, window_params = [{transform_indices = @transform_0, window_bounds = array<i64: 224, 45>}, {pipeline_mode = #tpu.pipeline_mode<synchronous>, transform_indices = @transform_1, window_bounds = array<i64: 45, 768>}, {pipeline_mode = #tpu.pipeline_mode<synchronous>, transform_indices = @transform_2, window_bounds = array<i64: 1, 768>}, {pipeline_mode = #tpu.pipeline_mode<synchronous>, transform_indices = @transform_3, window_bounds = array<i64: 3, 768, 128>}, {pipeline_mode = #tpu.pipeline_mode<synchronous>, transform_indices = @transform_4, window_bounds = array<i64: 1, 128>}, {pipeline_mode = #tpu.pipeline_mode<synchronous>, transform_indices = @transform_5, window_bounds = array<i64: 128, 256>}, {pipeline_mode = #tpu.pipeline_mode<synchronous>, transform_indices = @transform_6, window_bounds = array<i64: 1, 256>}, {pipeline_mode = #tpu.pipeline_mode<synchronous>, transform_indices = @transform_7, window_bounds = array<i64: 1, 224>}, {transform_indices = @transform_8, window_bounds = array<i64: 1, 1, 256>}]} {
    %c0 = arith.constant 0 : index
    %c0_0 = arith.constant 0 : index
    %0 = vector.load %arg1[%c0, %c0_0] : memref<224x45xbf16, #tpu.memory_space<vmem>>, vector<224x45xbf16>
    %c0_1 = arith.constant 0 : index
    %c0_2 = arith.constant 0 : index
    %1 = vector.load %arg2[%c0_1, %c0_2] : memref<45x768xbf16, #tpu.memory_space<vmem>>, vector<45x768xbf16>
    %cst = arith.constant dense<0.000000e+00> : vector<224x768xf32>
    %2 = tpu.matmul %0, %1, %cst {dimension_numbers = #tpu.dot_dimension_numbers<[1], [0], [0], [1], [0, 0, 1, 1], [], []>} : vector<224x45xbf16>, vector<45x768xbf16>, vector<224x768xf32> -> vector<224x768xf32>
    %c0_3 = arith.constant 0 : index
    %c0_4 = arith.constant 0 : index
    %3 = vector.load %arg3[%c0_3, %c0_4] : memref<1x768xf32, #tpu.memory_space<vmem>>, vector<1x768xf32>
    %4 = vector.broadcast %3 : vector<1x768xf32> to vector<224x768xf32>
    %5 = arith.addf %2, %4 : vector<224x768xf32>
    %cst_5 = arith.constant 0.000000e+00 : f32
    %6 = vector.broadcast %cst_5 : f32 to vector<224x768xf32>
    %7 = arith.cmpf ogt, %5, %6 : vector<224x768xf32>
    %cst_6 = arith.constant 2.000000e-01 : f32
    %8 = vector.broadcast %cst_6 : f32 to vector<224x768xf32>
    %9 = arith.mulf %8, %5 : vector<224x768xf32>
    %10 = arith.select %7, %5, %9 : vector<224x768xi1>, vector<224x768xf32>
    %11 = arith.truncf %10 : vector<224x768xf32> to vector<224x768xbf16>
    %c0_7 = arith.constant 0 : index
    %c0_8 = arith.constant 0 : index
    %12 = vector.load %arg10[%c0_7, %c0_8] : memref<256x768xbf16, #tpu.memory_space<vmem>>, vector<224x768xbf16>
    tpu.vector_store %arg10[%c0_7, %c0_8], %11 {strides = array<i32>} : memref<256x768xbf16, #tpu.memory_space<vmem>>, vector<224x768xbf16>,
    %cst_9 = arith.constant 0.000000e+00 : bf16
    %13 = vector.broadcast %cst_9 : bf16 to vector<32x768xbf16>
    %c224 = arith.constant 224 : index
    %c0_10 = arith.constant 0 : index
    %14 = vector.load %arg10[%c224, %c0_10] : memref<256x768xbf16, #tpu.memory_space<vmem>>, vector<32x768xbf16>
    tpu.vector_store %arg10[%c224, %c0_10], %13 {strides = array<i32>} : memref<256x768xbf16, #tpu.memory_space<vmem>>, vector<32x768xbf16>,
    %cst_11 = arith.constant 0.000000e+00 : f32
    %15 = vector.broadcast %cst_11 : f32 to vector<224x128xf32>
    %c0_12 = arith.constant 0 : index
    %c0_13 = arith.constant 0 : index
    %16 = vector.load %arg10[%c0_12, %c0_13] : memref<256x768xbf16, #tpu.memory_space<vmem>>, vector<224x768xbf16>
    %c0_14 = arith.constant 0 : index
    %c0_15 = arith.constant 0 : index
    %c0_16 = arith.constant 0 : index
    %17 = vector.load %arg4[%c0_14, %c0_15, %c0_16] : memref<3x768x128xbf16, #tpu.memory_space<vmem>>, vector<1x768x128xbf16>
    %18 = vector.shape_cast %17 : vector<1x768x128xbf16> to vector<768x128xbf16>
    %cst_17 = arith.constant dense<0.000000e+00> : vector<224x128xf32>
    %19 = tpu.matmul %16, %18, %cst_17 {dimension_numbers = #tpu.dot_dimension_numbers<[1], [0], [0], [1], [0, 0, 1, 1], [], []>} : vector<224x768xbf16>, vector<768x128xbf16>, vector<224x128xf32> -> vector<224x128xf32>
    %20 = arith.addf %15, %19 : vector<224x128xf32>
    %c16 = arith.constant 16 : index
    %c0_18 = arith.constant 0 : index
    %21 = vector.load %arg10[%c16, %c0_18] : memref<256x768xbf16, #tpu.memory_space<vmem>>, vector<224x768xbf16>
    %c1 = arith.constant 1 : index
    %c0_19 = arith.constant 0 : index
    %c0_20 = arith.constant 0 : index
    %22 = vector.load %arg4[%c1, %c0_19, %c0_20] : memref<3x768x128xbf16, #tpu.memory_space<vmem>>, vector<1x768x128xbf16>
    %23 = vector.shape_cast %22 : vector<1x768x128xbf16> to vector<768x128xbf16>
    %cst_21 = arith.constant dense<0.000000e+00> : vector<224x128xf32>
    %24 = tpu.matmul %21, %23, %cst_21 {dimension_numbers = #tpu.dot_dimension_numbers<[1], [0], [0], [1], [0, 0, 1, 1], [], []>} : vector<224x768xbf16>, vector<768x128xbf16>, vector<224x128xf32> -> vector<224x128xf32>
    %25 = arith.addf %20, %24 : vector<224x128xf32>
    %c32 = arith.constant 32 : index
    %c0_22 = arith.constant 0 : index
    %26 = vector.load %arg10[%c32, %c0_22] : memref<256x768xbf16, #tpu.memory_space<vmem>>, vector<224x768xbf16>
    %c2 = arith.constant 2 : index
    %c0_23 = arith.constant 0 : index
    %c0_24 = arith.constant 0 : index
    %27 = vector.load %arg4[%c2, %c0_23, %c0_24] : memref<3x768x128xbf16, #tpu.memory_space<vmem>>, vector<1x768x128xbf16>
    %28 = vector.shape_cast %27 : vector<1x768x128xbf16> to vector<768x128xbf16>
    %cst_25 = arith.constant dense<0.000000e+00> : vector<224x128xf32>
    %29 = tpu.matmul %26, %28, %cst_25 {dimension_numbers = #tpu.dot_dimension_numbers<[1], [0], [0], [1], [0, 0, 1, 1], [], []>} : vector<224x768xbf16>, vector<768x128xbf16>, vector<224x128xf32> -> vector<224x128xf32>
    %30 = arith.addf %25, %29 : vector<224x128xf32>
    %c0_26 = arith.constant 0 : index
    %c0_27 = arith.constant 0 : index
    %31 = vector.load %arg5[%c0_26, %c0_27] : memref<1x128xf32, #tpu.memory_space<vmem>>, vector<1x128xf32>
    %32 = vector.broadcast %31 : vector<1x128xf32> to vector<224x128xf32>
    %33 = arith.addf %30, %32 : vector<224x128xf32>
    %cst_28 = arith.constant 0.000000e+00 : f32
    %34 = vector.broadcast %cst_28 : f32 to vector<224x128xf32>
    %35 = arith.cmpf ogt, %33, %34 : vector<224x128xf32>
    %cst_29 = arith.constant 2.000000e-01 : f32
    %36 = vector.broadcast %cst_29 : f32 to vector<224x128xf32>
    %37 = arith.mulf %36, %33 : vector<224x128xf32>
    %38 = arith.select %35, %33, %37 : vector<224x128xi1>, vector<224x128xf32>
    %c0_30 = arith.constant 0 : index
    %c0_31 = arith.constant 0 : index
    %39 = vector.load %arg8[%c0_30, %c0_31] : memref<1x224xf32, #tpu.memory_space<vmem>>, vector<1x224xf32>
    %cst_32 = arith.constant dense<0.000000e+00> : vector<1x128xf32>
    %40 = tpu.matmul %39, %38, %cst_32 {dimension_numbers = #tpu.dot_dimension_numbers<[1], [0], [0], [1], [0, 0, 1, 1], [], []>} : vector<1x224xf32>, vector<224x128xf32>, vector<1x128xf32> -> vector<1x128xf32>
    %41 = arith.truncf %40 : vector<1x128xf32> to vector<1x128xbf16>
    %c0_33 = arith.constant 0 : index
    %c0_34 = arith.constant 0 : index
    %42 = vector.load %arg6[%c0_33, %c0_34] : memref<128x256xbf16, #tpu.memory_space<vmem>>, vector<128x256xbf16>
    %cst_35 = arith.constant dense<0.000000e+00> : vector<1x256xf32>
    %43 = tpu.matmul %41, %42, %cst_35 {dimension_numbers = #tpu.dot_dimension_numbers<[1], [0], [0], [1], [0, 0, 1, 1], [], []>} : vector<1x128xbf16>, vector<128x256xbf16>, vector<1x256xf32> -> vector<1x256xf32>
    %c0_36 = arith.constant 0 : index
    %c0_37 = arith.constant 0 : index
    %44 = vector.load %arg7[%c0_36, %c0_37] : memref<1x256xf32, #tpu.memory_space<vmem>>, vector<1x256xf32>
    %45 = arith.addf %43, %44 : vector<1x256xf32>
    %cst_38 = arith.constant 0.000000e+00 : f32
    %46 = vector.broadcast %cst_38 : f32 to vector<1x256xf32>
    %47 = arith.cmpf ogt, %45, %46 : vector<1x256xf32>
    %cst_39 = arith.constant 2.000000e-01 : f32
    %48 = vector.broadcast %cst_39 : f32 to vector<1x256xf32>
    %49 = arith.mulf %48, %45 : vector<1x256xf32>
    %50 = arith.select %47, %45, %49 : vector<1x256xi1>, vector<1x256xf32>
    %c0_40 = arith.constant 0 : index
    %c0_41 = arith.constant 0 : index
    %c0_42 = arith.constant 0 : index
    %51 = vector.load %arg9[%c0_40, %c0_41, %c0_42] : memref<1x1x256xf32, #tpu.memory_space<vmem>>, vector<1x1x256xf32>
    %52 = vector.shape_cast %51 : vector<1x1x256xf32> to vector<1x256xf32>
    %53 = vector.shape_cast %50 : vector<1x256xf32> to vector<1x1x256xf32>
    tpu.vector_store %arg9[%c0_40, %c0_41, %c0_42], %53 {strides = array<i32>} : memref<1x1x256xf32, #tpu.memory_space<vmem>>, vector<1x1x256xf32>,
    return
  }
  func.func @transform_0(%arg0: i32) -> (i32, i32) {
    %c0_i32 = arith.constant 0 : i32
    %c0_i32_0 = arith.constant 0 : i32
    return %arg0, %c0_i32 : i32, i32
  }
  func.func @transform_1(%arg0: i32) -> (i32, i32) {
    %c0_i32 = arith.constant 0 : i32
    %c0_i32_0 = arith.constant 0 : i32
    %c0_i32_1 = arith.constant 0 : i32
    return %c0_i32, %c0_i32_0 : i32, i32
  }
  func.func @transform_2(%arg0: i32) -> (i32, i32) {
    %c0_i32 = arith.constant 0 : i32
    %c0_i32_0 = arith.constant 0 : i32
    %c0_i32_1 = arith.constant 0 : i32
    return %c0_i32, %c0_i32_0 : i32, i32
  }
  func.func @transform_3(%arg0: i32) -> (i32, i32, i32) {
    %c0_i32 = arith.constant 0 : i32
    %c0_i32_0 = arith.constant 0 : i32
    %c0_i32_1 = arith.constant 0 : i32
    %c0_i32_2 = arith.constant 0 : i32
    return %c0_i32, %c0_i32_0, %c0_i32_1 : i32, i32, i32
  }
  func.func @transform_4(%arg0: i32) -> (i32, i32) {
    %c0_i32 = arith.constant 0 : i32
    %c0_i32_0 = arith.constant 0 : i32
    %c0_i32_1 = arith.constant 0 : i32
    return %c0_i32, %c0_i32_0 : i32, i32
  }
  func.func @transform_5(%arg0: i32) -> (i32, i32) {
    %c0_i32 = arith.constant 0 : i32
    %c0_i32_0 = arith.constant 0 : i32
    %c0_i32_1 = arith.constant 0 : i32
    return %c0_i32, %c0_i32_0 : i32, i32
  }
  func.func @transform_6(%arg0: i32) -> (i32, i32) {
    %c0_i32 = arith.constant 0 : i32
    %c0_i32_0 = arith.constant 0 : i32
    %c0_i32_1 = arith.constant 0 : i32
    return %c0_i32, %c0_i32_0 : i32, i32
  }
  func.func @transform_7(%arg0: i32) -> (i32, i32) {
    %c0_i32 = arith.constant 0 : i32
    %c0_i32_0 = arith.constant 0 : i32
    %c0_i32_1 = arith.constant 0 : i32
    return %c0_i32, %c0_i32_0 : i32, i32
  }
  func.func @transform_8(%arg0: i32) -> (i32, i32, i32) {
    %c0_i32 = arith.constant 0 : i32
    %c0_i32_0 = arith.constant 0 : i32
    %c0_i32_1 = arith.constant 0 : i32
    return %arg0, %c0_i32, %c0_i32_0 : i32, i32, i32
  }
}

</mosaic_0001>

<bundles_post_ra>
// kernel: encoder_forward.1
= control target key start
LH: loop header
LB: loop body
LE: loop exit
PB: predicated region body
PF: predicated region fallthrough
CT: control target
= control target key end

     0   :  { %13 = vsyncpa [#allocation4], 0  ;;  %s6445_s27 = smov 0   ;;  %s8472_s0 = inlined_call_operand.vmem [shape: bf16[448,45], index: 0, kind: input, shape index: {}]   ;;  %s8473_s1 = inlined_call_operand.vmem [shape: bf16[45,768], index: 1, kind: input, shape index: {}]   ;;  %s8474_s2 = inlined_call_operand.vmem [shape: f32[1,768], index: 2, kind: input, shape index: {}]   ;;  %s8475_s3 = inlined_call_operand.hbm [shape: bf16[3,768,128], index: 3, kind: input, shape index: {}]   ;;  %s8476_s4 = inlined_call_operand.vmem [shape: f32[1,128], index: 4, kind: input, shape index: {}]   ;;  %s8477_s5 = inlined_call_operand.vmem [shape: bf16[128,256], index: 5, kind: input, shape index: {}]   ;;  %s8478_s6 = inlined_call_operand.vmem [shape: f32[1,256], index: 6, kind: input, shape index: {}]   ;;  %s8479_s7 = inlined_call_operand.vmem [shape: f32[1,224], index: 7, kind: input, shape index: {}]   ;;  %s8480_s8 = inlined_call_operand.vmem [shape: f32[2,1,256], index: 8, kind: output, shape index: {}]  }
   0x1 LB: > { %s6451_s28 = sadd.s32 4294967295, %s6391_s27   ;;  %p4932_p0 = scmp.ge.s32.totalorder %s6391_s27, 1  ;;  %s6391_s27 = sphi %s6445_s27, %s19_s27  }
   0x2   : > { %p223_p1 = scmp.lt.s32.totalorder %s6391_s27, 3  ;;  %s6393_s29 = smov [#allocation3]  }
   0x3   : > { %s241_s30 = sshll.u32 %s6393_s29, 4  ;;  %p8481_p3 = scmp.eq.s32.totalorder %s6451_s28, 0  ;;  %s242_s30 = int_to_ptr.vmem [resolvable:$true] %s241_s30 }
   0x4   : > { %p6455_p2 = pnand %p4932_p0, %p223_p1  ;;  %s6353_s13 = scalar_lea.hbm %s8475_s3, 18432 }
   0x5   : > { %p6354_p6 = scmp.ne.s32.totalorder %s8475_s3, %s6353_s13  ;;  %p6360_p10 = scmp.lt.u32.totalorder %s6353_s13, %s8475_s3 }
   0x6   : > { %s8600_s9 = scalar_select %p6455_p2, 1, 0 }
   0x7   : > { %p6123_p4 = pneg %p6455_p2 }
   0x9   : > { %p6464_p5 = pnand %p8481_p3, %p6123_p4 }
   0xb   : > { %p6355_p7 = pneg %p6464_p5 }
   0xd   : > { %p6356_p8 = pnand %p6355_p7, %p6354_p6 }
   0xf   : > { %p6357_p9 = pneg %p6356_p8 }
  0x11   : > { %p6362_p11 = pnand %p6360_p10, %p6357_p9 }
  0x13   : > { %6365 = shalt.err (!%p6362_p11)
}
  0x14   : > { %s6366_s18 = scalar_lea.vmem %s242_s30, 18432  ;;  %p6374_p1 = scmp.lt.s32.totalorder %s242_s30, %s242_s30 }
  0x15   : > { %p6367_p12 = scmp.ne.s32.totalorder %s242_s30, %s6366_s18  ;;  %p6375_p4 = scmp.lt.s32.totalorder %s6366_s18, %s6366_s18 }
  0x17   : > { %p6369_p13 = pnand %p6367_p12, %p6355_p7  ;;  %p6376_p3 = por %p6375_p4, %p6374_p1 }
  0x19   : > { %p6370_p0 = pneg %p6369_p13 }
  0x1b   : > { %p6377_p2 = pnand %p6376_p3, %p6370_p0 }
  0x1d   : > { %6380 = shalt.err (!%p6377_p2)
}
  0x1e   : > { %s6394_s19 = smov 64   ;;  %s6395_s20 = smov 4  }
  0x1f   : > { %6126 = dma.hbm_to_vmem [thread:$0]  (!%p6464_p5), %s8475_s3, 18432, %s242_s30, [#allocation4], %s6394_s19, %s6394_s19, %s6395_s20  }
  0x20   : > { %p8602_p6 = scmp.ne.s32.totalorder %s8600_s9, 0 }
  0x22   : > { %278 = sbr.rel (%p8602_p6) target bundleno = 1527 (0x5f7), region = 52 }
  0x29   : > { %p8603_p8 = scmp.eq.s32.totalorder %s6451_s28, 0 }
  0x2b   : > { %6386 = dma.done.wait (%p8603_p8), [#allocation4], 18432   ;;  %p8604_p7 = pmov %p8603_p8 }
  0x2c   : > { %v8484_v0 = vmov 0   ;;  %s311_s23 = smul.u32 28, %s6451_s28  ;;  %vm597_vm0 = vcmask 1045504   ;;  %v6144_v1 = vld [vmem:[%s8473_s1 + $0x4] ss:$24 sps:$4 sm:$0xff]   ;;  %vm598_vm1 = vcmask 1046528  }
  0x2d   : > { %6388 = vsyncadd (%p8604_p7), [#allocation4], 4294948864  ;;  %651 = vmatprep.mubr.bf16.mxu0 %v8484_v0  ;;  %824 = vmatprep.mubr.bf16.mxu1 %v8484_v0  ;;  %v6146_v2 = vld [vmem:[%s8473_s1 + $0xc] ss:$24 sps:$4 sm:$0xff]   ;;  %v6148_v3 = vld [vmem:[%s8473_s1] ss:$24 sps:$4 sm:$0xff]  }
  0x2e   : > { %p312_p2 = scmp.lt.s32.totalorder %s311_s23, 55  ;;  %619 = vmatprep.subr.bf16.mxu0 %v6144_v1  ;;  %v6149_v4 = vld [vmem:[%s8473_s1 + $0x8] ss:$24 sps:$4 sm:$0xff]   ;;  %v6397_v5 = vmov 65535   ;;  %792 = vmatprep.subr.bf16.mxu1 %v6146_v2  ;;  %v6150_v7 = vld [vmem:[%s8473_s1 + $0x34] ss:$24 sps:$4 sm:$0xff]  }
  0x2f   : > { %v599_v6 = vsel %vm597_vm0, 4294967295, %v6397_v5  ;;  %620 = vmatpush1.bf16.msra.mxu0 %v6148_v3  ;;  %793 = vmatpush1.bf16.msra.mxu1 %v6149_v4  ;;  %v6152_v8 = vld [vmem:[%s8473_s1 + $0x3c] ss:$24 sps:$4 sm:$0xff]   ;;  %v6154_v9 = vld [vmem:[%s8473_s1 + $0x30] ss:$24 sps:$4 sm:$0xff]   ;;  %vm554_vm2 = vcmask 367616  }
  0x30   : > { %s8810_s23 = smov (!%p312_p2, %s311_s23), 55  ;;  %621 = vmatprep.subr.bf16.mxu0 %v6150_v7  ;;  %v6155_v10 = vld [vmem:[%s8473_s1 + $0x38] ss:$24 sps:$4 sm:$0xff]   ;;  %v600_v11 = vsel %vm598_vm1, %v599_v6, 0  ;;  %794 = vmatprep.subr.bf16.mxu1 %v6152_v8  ;;  %v6165_v20 = vld [vmem:[%s8473_s1 + $0x14] ss:$24 sps:$4 sm:$0xff]  }
  0x31   : > { %s4937_s18 = sshll.u32 %s8810_s23, 2  ;;  %v6156_v12 = vld [vmem:[%s8473_s1 + $0x64] ss:$24 sps:$4 sm:$0x7f]   ;;  %v6163_v22 = vld [vmem:[%s8473_s1 + $0x10] ss:$24 sps:$4 sm:$0xff]  }
  0x32   : > { %v6158_v13 = vld [vmem:[%s8473_s1 + $0x6c] ss:$24 sps:$4 sm:$0x7f]   ;;  %v6160_v14 = vld [vmem:[%s8473_s1 + $0x60] ss:$24 sps:$4 sm:$0x7f]   ;;  %s6529_s9 = scalar_lea.vmem %s8472_s0, %s4937_s18  ;;  %v605_v15 = vand.u32 %v6156_v12, %v600_v11  ;;  %v8483_v12 = vlaneseq }
  0x33   : > { %622 = vmatpush1.bf16.msra.mxu0 %v6154_v9  ;;  %795 = vmatpush1.bf16.msra.mxu1 %v6155_v10  ;;  %v6161_v16 = vld [vmem:[%s8473_s1 + $0x68] ss:$24 sps:$4 sm:$0x7f]   ;;  %v611_v17 = vand.u32 %v6158_v13, %v600_v11  ;;  %v602_v18 = vand.u32 %v6160_v14, %v600_v11  ;;  %v6173_v24 = vld [vmem:[%s8473_s1 + $0x44] ss:$24 sps:$4 sm:$0xff]   ;;  %v6571_v30 = vld [vmem:[%s6529_s9 + $0x10] sm:$0xff]  }
  0x34   : > { %623 = vmatprep.subr.bf16.mxu0 %v605_v15  ;;  %v608_v19 = vand.u32 %v6161_v16, %v600_v11  ;;  %v6538_v21 = vld [vmem:[%s6529_s9] sm:$0xff]   ;;  %v6556_v25 = vld [vmem:[%s6529_s9 + $0x8] sm:$0xff]   ;;  %v6189_v35 = vld [vmem:[#allocation3 + $0x1d0] sm:$0xff]   ;;  %v6713_v14 = vshrl.u32 %v8483_v12, 7  ;;  %p317_p3 = scmp.lt.s32.totalorder %s6451_s28, 1 }
  0x35   : > { %796 = vmatprep.subr.bf16.mxu1 %v611_v17  ;;  %v6171_v23 = vld [vmem:[%s8473_s1 + $0x40] ss:$24 sps:$4 sm:$0xff]   ;;  %v6178_v26 = vld [vmem:[%s8473_s1 + $0x70] ss:$24 sps:$4 sm:$0x7f]  }
  0x36   : > { %v6180_v27 = vld [vmem:[%s8473_s1 + $0x74] ss:$24 sps:$4 sm:$0x7f]   ;;  %v614_v28 = vand.u32 %v6178_v26, %v600_v11  ;;  %v6185_v31 = vld [vmem:[#allocation3 + $0x1c0] sm:$0xff]   ;;  %v6580_v36 = vld [vmem:[%s6529_s9 + $0x18] sm:$0xff]   ;;  %8605 = vst [vmem:[#allocation6_spill] sm:$0xff] %v6713_v14 }
  0x37   : > { %624 = vmatpush1.bf16.msra.mxu0 %v602_v18  ;;  %797 = vmatpush1.bf16.msra.mxu1 %v608_v19  ;;  %v617_v29 = vand.u32 %v6180_v27, %v600_v11  ;;  %v6186_v32 = vld [vmem:[#allocation3 + $0x180] sm:$0xff]   ;;  %v6187_v33 = vld [vmem:[#allocation3 + $0x1c8] sm:$0xff]   ;;  %v6190_v37 = vld [vmem:[#allocation3 + $0x190] sm:$0xff]   ;;  %v6717_v15 = vsub.s32 0, %v6713_v14  ;;  %v6723_v17 = vsub.s32 1, %v6713_v14  ;;  %v380_v18 = vsub.s32 2, %v6713_v14 }
  0x38   : > { %965 = vmatprep.subr.bf16.mxu0 %v6165_v20  ;;  %5177 = vmatprep.subr.bf16.mxu1 %v6185_v31  ;;  %v6188_v34 = vld [vmem:[#allocation3 + $0x188] sm:$0xff]   ;;  %v6589_v38 = vld [vmem:[%s6529_s9 + $0x20] sm:$0xff]   ;;  %v6191_v39 = vld [vmem:[#allocation3 + $0x1d8] sm:$0xff]   ;;  %s8812_s28 = smov (!%p317_p3, %s6451_s28), 1 }
  0x39   : > { %v6192_v40 = vld [vmem:[#allocation3 + $0x198] sm:$0xff]   ;;  %v6598_v41 = vld [vmem:[%s6529_s9 + $0x28] sm:$0xff]   ;;  %v6607_v42 = vld [vmem:[%s6529_s9 + $0x30] sm:$0xff]   ;;  %8606 = vst [vmem:[#allocation7_spill] sm:$0xff] %v6717_v15  ;;  %s4938_s25 = sshll.u32 %s8812_s28, 1 }
  0x3a   : > { %4971 = vmatmul.mubr.msk.bf16.vlgmr.msra.gmra.mrb[0].mxu0 %vm554_vm2, %v6538_v21  ;;  %4985 = vmatmul.mubr.msk.bf16.vlgmr.msra.gmra.mrb[0].mxu1 %vm554_vm2, %v6538_v21  ;;  %v6193_v43 = vld [vmem:[#allocation3 + $0x1e0] sm:$0xff]   ;;  %v6616_v45 = vld [vmem:[%s6529_s9 + $0x38] sm:$0xff]   ;;  %v6195_v47 = vld [vmem:[#allocation3 + $0x1e8] sm:$0xff]   ;;  %8607 = vst [vmem:[#allocation8_spill] sm:$0xff] %v6723_v17  ;;  %s320_s23 = scalar_lea.vmem %s8480_s8, %s4938_s25 }
  0x3b   : > { %966 = vmatpush1.bf16.msra.mxu0 %v6163_v22  ;;  %661 = vmatprep.mubr.bf16.mxu0 %v8484_v0  ;;  %v6194_v44 = vld [vmem:[#allocation3 + $0x1a0] sm:$0xff]   ;;  %v6196_v48 = vld [vmem:[#allocation3 + $0x1a8] sm:$0xff]   ;;  %v6201_v51 = vld [vmem:[#allocation3 + $0x1f0] sm:$0xff]   ;;  %v388_v22 = vsub.s32 4, %v6713_v14 }
  0x3c   : > { %834 = vmatprep.mubr.bf16.mxu1 %v8484_v0  ;;  %967 = vmatprep.subr.bf16.mxu0 %v6173_v24  ;;  %v6625_v46 = vld [vmem:[%s6529_s9 + $0x40] sm:$0xff]   ;;  %v6634_v50 = vld [vmem:[%s6529_s9 + $0x48] sm:$0xff]   ;;  %v6643_v52 = vld [vmem:[%s6529_s9 + $0x50] sm:$0xff]  }
  0x3d   : > { %5178 = vmatpush3.bf16.msra.mxu1 %v6186_v32  ;;  %v6197_v49 = vld [vmem:[#allocation3 + $0x240] sm:$0xff]   ;;  %v6203_v53 = vld [vmem:[#allocation3 + $0x1b0] sm:$0xff]   ;;  %v6652_v54 = vld [vmem:[%s6529_s9 + $0x58] sm:$0xff]  }
  0x3e   : > { %5179 = vmatprep.subr.bf16.mxu1 %v6187_v33  ;;  %v6661_v55 = vld [vmem:[%s6529_s9 + $0x60] sm:$0xff]   ;;  %v6211_v56 = vld [vmem:[#allocation3 + $0x1f8] sm:$0xff]   ;;  %v6670_v57 = vld [vmem:[%s6529_s9 + $0x68] sm:$0xff]  }
  0x3f   : > { %968 = vmatpush1.bf16.msra.mxu0 %v6171_v23  ;;  %v6212_v58 = vld [vmem:[#allocation3 + $0x1b8] sm:$0xff]   ;;  %v6198_v59 = vld [vmem:[#allocation3 + $0x200] sm:$0xff]   ;;  %v6199_v60 = vld [vmem:[#allocation3 + $0x248] sm:$0xff]   ;;  %v392_v23 = vsub.s32 5, %v6713_v14 }
  0x40   : > { %969 = vmatprep.subr.bf16.mxu0 %v617_v29  ;;  %v6217_v61 = vld [vmem:[#allocation3 + $0x2c0] sm:$0xff]   ;;  %v6200_v62 = vld [vmem:[#allocation3 + $0x208] sm:$0xff]   ;;  %v6202_v63 = vld [vmem:[#allocation3 + $0x250] sm:$0xff]  }
  0x41   : > { %5180 = vmatpush3.bf16.msra.mxu1 %v6188_v34  ;;  %v6204_v1 = vld [vmem:[#allocation3 + $0x210] sm:$0xff]   ;;  %v6205_v2 = vld [vmem:[#allocation3 + $0x258] sm:$0xff]   ;;  %v6207_v4 = vld [vmem:[#allocation3 + $0x260] sm:$0xff]  }
  0x42   : > { %4972 = vmatmul.mubr.msk.bf16.gmra.mrb[4].mxu0 %vm554_vm2, %v6556_v25  ;;  %4986 = vmatmul.mubr.msk.bf16.gmra.mrb[4].mxu1 %vm554_vm2, %v6556_v25  ;;  %v6206_v3 = vld [vmem:[#allocation3 + $0x218] sm:$0xff]   ;;  %v6208_v5 = vld [vmem:[#allocation3 + $0x220] sm:$0xff]   ;;  %v6209_v6 = vld [vmem:[#allocation3 + $0x268] sm:$0xff]  }
  0x43   : > { %671 = vmatprep.mubr.bf16.mxu0 %v8484_v0  ;;  %844 = vmatprep.mubr.bf16.mxu1 %v8484_v0  ;;  %v6210_v7 = vld [vmem:[#allocation3 + $0x228] sm:$0xff]   ;;  %v6213_v8 = vld [vmem:[#allocation3 + $0x270] sm:$0xff]   ;;  %v6215_v10 = vld [vmem:[#allocation3 + $0x278] sm:$0xff]  }
  0x44   : > { %970 = vmatpush1.bf16.msra.mxu0 %v614_v28  ;;  %5181 = vmatprep.subr.bf16.mxu1 %v6189_v35  ;;  %v6214_v9 = vld [vmem:[#allocation3 + $0x230] sm:$0xff]   ;;  %v6216_v11 = vld [vmem:[#allocation3 + $0x238] sm:$0xff]   ;;  %v6229_v13 = vld [vmem:[#allocation3 + $0x40] sm:$0xff]  }
  0x45   : > { %5182 = vmatpush3.bf16.msra.mxu1 %v6190_v37  ;;  %5277 = vmatprep.subr.bf16.mxu0 %v6197_v49  ;;  %v368_v16 = vld [vmem:[%s8474_s2] sm:$0x3f] }
  0x46   : > { %5183 = vmatprep.subr.bf16.mxu1 %v6191_v39  ;;  %v6729_v19 = vrot.slane %v368_v16, %v6717_v15  ;;  %v6732_v20 = vrot.slane %v368_v16, %v6723_v17  ;;  %v6738_v24 = vrot.slane %v368_v16, %v380_v18  ;;  %v6745_v35 = vrot.slane %v368_v16, %v388_v22 }
  0x49   : > { %5184 = vmatpush3.bf16.msra.mxu1 %v6192_v40 }
  0x4a   : > { %4973 = vmatmul.mubr.msk.bf16.gmra.mrb[8].mxu0 %vm554_vm2, %v6571_v30  ;;  %4987 = vmatmul.mubr.msk.bf16.gmra.mrb[8].mxu1 %vm554_vm2, %v6571_v30 }
  0x4b   : > { %681 = vmatprep.mubr.bf16.mxu0 %v8484_v0  ;;  %854 = vmatprep.mubr.bf16.mxu1 %v8484_v0 }
  0x4c   : > { %5185 = vmatprep.subr.bf16.mxu1 %v6193_v43 }
  0x4d   : > { %5186 = vmatpush3.bf16.msra.mxu1 %v6194_v44 }
  0x4e   : > { %5187 = vmatprep.subr.bf16.mxu1 %v6195_v47 }
  0x51   : > { %5188 = vmatpush3.bf16.msra.mxu1 %v6196_v48 }
  0x52   : > { %4974 = vmatmul.mubr.msk.bf16.gmra.mrb[12].mxu0 %vm554_vm2, %v6580_v36  ;;  %4988 = vmatmul.mubr.msk.bf16.gmra.mrb[12].mxu1 %vm554_vm2, %v6580_v36 }
  0x53   : > { %691 = vmatprep.mubr.bf16.mxu0 %v8484_v0  ;;  %864 = vmatprep.mubr.bf16.mxu1 %v8484_v0 }
  0x54   : > { %5189 = vmatprep.subr.bf16.mxu1 %v6201_v51 }
  0x55   : > { %5190 = vmatpush3.bf16.msra.mxu1 %v6203_v53 }
  0x56   : > { %5191 = vmatprep.subr.bf16.mxu1 %v6211_v56 }
  0x59   : > { %5192 = vmatpush3.bf16.msra.mxu1 %v6212_v58 }
  0x5a   : > { %4975 = vmatmul.mubr.msk.bf16.gmra.mrb[16].mxu0 %vm554_vm2, %v6589_v38  ;;  %4989 = vmatmul.mubr.msk.bf16.gmra.mrb[16].mxu1 %vm554_vm2, %v6589_v38 }
  0x5b   : > { %701 = vmatprep.mubr.bf16.mxu0 %v8484_v0  ;;  %874 = vmatprep.mubr.bf16.mxu1 %v8484_v0 }
  0x5c   : > { %5377 = vmatprep.subr.bf16.mxu1 %v6217_v61 }
  0x62   : > { %4976 = vmatmul.mubr.msk.bf16.gmra.mrb[20].mxu0 %vm554_vm2, %v6598_v41  ;;  %4990 = vmatmul.mubr.msk.bf16.gmra.mrb[20].mxu1 %vm554_vm2, %v6598_v41 }
  0x63   : > { %711 = vmatprep.mubr.bf16.mxu0 %v8484_v0  ;;  %884 = vmatprep.mubr.bf16.mxu1 %v8484_v0 }
  0x6a   : > { %4977 = vmatmul.mubr.msk.bf16.gmra.mrb[24].mxu0 %vm554_vm2, %v6607_v42  ;;  %4991 = vmatmul.mubr.msk.bf16.gmra.mrb[24].mxu1 %vm554_vm2, %v6607_v42 }
  0x6b   : > { %721 = vmatprep.mubr.bf16.mxu0 %v8484_v0  ;;  %894 = vmatprep.mubr.bf16.mxu1 %v8484_v0 }
  0x72   : > { %4978 = vmatmul.mubr.msk.bf16.gmra.mrb[28].mxu0 %vm554_vm2, %v6616_v45  ;;  %4992 = vmatmul.mubr.msk.bf16.gmra.mrb[28].mxu1 %vm554_vm2, %v6616_v45 }
  0x73   : > { %731 = vmatprep.mubr.bf16.mxu0 %v8484_v0  ;;  %904 = vmatprep.mubr.bf16.mxu1 %v8484_v0 }
  0x7a   : > { %4979 = vmatmul.mubr.msk.bf16.gmra.mrb[32].mxu0 %vm554_vm2, %v6625_v46  ;;  %4993 = vmatmul.mubr.msk.bf16.gmra.mrb[32].mxu1 %vm554_vm2, %v6625_v46 }
  0x7b   : > { %741 = vmatprep.mubr.bf16.mxu0 %v8484_v0  ;;  %914 = vmatprep.mubr.bf16.mxu1 %v8484_v0 }
  0x82   : > { %4980 = vmatmul.mubr.msk.bf16.gmra.mrb[36].mxu0 %vm554_vm2, %v6634_v50  ;;  %4994 = vmatmul.mubr.msk.bf16.gmra.mrb[36].mxu1 %vm554_vm2, %v6634_v50 }
  0x83   : > { %751 = vmatprep.mubr.bf16.mxu0 %v8484_v0  ;;  %924 = vmatprep.mubr.bf16.mxu1 %v8484_v0 }
  0x8a   : > { %4981 = vmatmul.mubr.msk.bf16.gmra.mrb[40].mxu0 %vm554_vm2, %v6643_v52  ;;  %4995 = vmatmul.mubr.msk.bf16.gmra.mrb[40].mxu1 %vm554_vm2, %v6643_v52 }
  0x8b   : > { %761 = vmatprep.mubr.bf16.mxu0 %v8484_v0  ;;  %934 = vmatprep.mubr.bf16.mxu1 %v8484_v0 }
  0x92   : > { %4982 = vmatmul.mubr.msk.bf16.gmra.mrb[44].mxu0 %vm554_vm2, %v6652_v54  ;;  %4996 = vmatmul.mubr.msk.bf16.gmra.mrb[44].mxu1 %vm554_vm2, %v6652_v54 }
  0x93   : > { %771 = vmatprep.mubr.bf16.mxu0 %v8484_v0  ;;  %944 = vmatprep.mubr.bf16.mxu1 %v8484_v0 }
  0x9a   : > { %4983 = vmatmul.mubr.msk.bf16.gmra.mrb[48].mxu0 %vm554_vm2, %v6661_v55  ;;  %4997 = vmatmul.mubr.msk.bf16.gmra.mrb[48].mxu1 %vm554_vm2, %v6661_v55 }
  0x9b   : > { %781 = vmatprep.mubr.bf16.mxu0 %v8484_v0  ;;  %954 = vmatprep.mubr.bf16.mxu1 %v8484_v0 }
  0xa2   : > { %4984 = vmatmul.mubr.msk.bf16.gmra.mrb[52].mxu0 %vm554_vm2, %v6670_v57  ;;  %4998 = vmatmul.mubr.msk.bf16.gmra.mrb[52].mxu1 %vm554_vm2, %v6670_v57 }
  0xa3   : > { %997 = vmatprep.mubr.bf16.mxu0 %v8484_v0 }
  0xaa   : > { %4999 = vmatmul.mubr.msk.bf16.vlgmr.msra.gmra.mrb[56].mxu0 %vm554_vm2, %v6538_v21  ;;  %v384_v21 = vsub.s32 3, %v6713_v14 }
  0xab   : > { %1007 = vmatprep.mubr.bf16.mxu0 %v8484_v0  ;;  %5278 = vmatpush3.bf16.msra.mxu0 %v6198_v59 }
  0xac   : > { %5279 = vmatprep.subr.bf16.mxu0 %v6199_v60  ;;  %v6743_v33 = vrot.slane %v368_v16, %v384_v21 }
  0xaf   : > { %5280 = vmatpush3.bf16.msra.mxu0 %v6200_v62 }
  0xb0   : > { %5281 = vmatprep.subr.bf16.mxu0 %v6202_v63 }
  0xb2   : > { %5000 = vmatmul.mubr.msk.bf16.gmra.mrb[60].mxu0 %vm554_vm2, %v6556_v25 }
  0xb3   : > { %1017 = vmatprep.mubr.bf16.mxu0 %v8484_v0  ;;  %5282 = vmatpush3.bf16.msra.mxu0 %v6204_v1 }
  0xb4   : > { %5283 = vmatprep.subr.bf16.mxu0 %v6205_v2 }
  0xb7   : > { %5284 = vmatpush3.bf16.msra.mxu0 %v6206_v3 }
  0xb8   : > { %5285 = vmatprep.subr.bf16.mxu0 %v6207_v4 }
  0xba   : > { %5001 = vmatmul.mubr.msk.bf16.gmra.mrb[64].mxu0 %vm554_vm2, %v6571_v30 }
  0xbb   : > { %1027 = vmatprep.mubr.bf16.mxu0 %v8484_v0  ;;  %5286 = vmatpush3.bf16.msra.mxu0 %v6208_v5 }
  0xbc   : > { %5287 = vmatprep.subr.bf16.mxu0 %v6209_v6 }
  0xbf   : > { %5288 = vmatpush3.bf16.msra.mxu0 %v6210_v7 }
  0xc0   : > { %5289 = vmatprep.subr.bf16.mxu0 %v6213_v8 }
  0xc2   : > { %5002 = vmatmul.mubr.msk.bf16.gmra.mrb[68].mxu0 %vm554_vm2, %v6580_v36  ;;  %v6747_v36 = vrot.slane %v368_v16, %v392_v23 }
  0xc3   : > { %1037 = vmatprep.mubr.bf16.mxu0 %v8484_v0  ;;  %5290 = vmatpush3.bf16.msra.mxu0 %v6214_v9 }
  0xc4   : > { %5291 = vmatprep.subr.bf16.mxu0 %v6215_v10 }
  0xc7   : > { %5292 = vmatpush3.bf16.msra.mxu0 %v6216_v11 }
  0xc8   : > { %5477 = vmatprep.subr.bf16.mxu0 %v6229_v13 }
  0xca   : > { %5003 = vmatmul.mubr.msk.bf16.gmra.mrb[72].mxu0 %vm554_vm2, %v6589_v38 }
  0xcb   : > { %1047 = vmatprep.mubr.bf16.mxu0 %v8484_v0 }
  0xd2   : > { %5004 = vmatmul.mubr.msk.bf16.gmra.mrb[76].mxu0 %vm554_vm2, %v6598_v41 }
  0xd3   : > { %1057 = vmatprep.mubr.bf16.mxu0 %v8484_v0 }
  0xda   : > { %5005 = vmatmul.mubr.msk.bf16.gmra.mrb[80].mxu0 %vm554_vm2, %v6607_v42 }
  0xdb   : > { %1067 = vmatprep.mubr.bf16.mxu0 %v8484_v0 }
  0xe2   : > { %5006 = vmatmul.mubr.msk.bf16.gmra.mrb[84].mxu0 %vm554_vm2, %v6616_v45 }
  0xe3   : > { %1077 = vmatprep.mubr.bf16.mxu0 %v8484_v0 }
  0xea   : > { %5007 = vmatmul.mubr.msk.bf16.gmra.mrb[88].mxu0 %vm554_vm2, %v6625_v46 }
  0xeb   : > { %1087 = vmatprep.mubr.bf16.mxu0 %v8484_v0 }
  0xf2   : > { %5008 = vmatmul.mubr.msk.bf16.gmra.mrb[92].mxu0 %vm554_vm2, %v6634_v50 }
  0xf3   : > { %1097 = vmatprep.mubr.bf16.mxu0 %v8484_v0 }
  0xfa   : > { %5009 = vmatmul.mubr.msk.bf16.gmra.mrb[96].mxu0 %vm554_vm2, %v6643_v52 }
  0xfb   : > { %1107 = vmatprep.mubr.bf16.mxu0 %v8484_v0 }
 0x102   : > { %5010 = vmatmul.mubr.msk.bf16.gmra.mrb[100].mxu0 %vm554_vm2, %v6652_v54 }
 0x103   : > { %1117 = vmatprep.mubr.bf16.mxu0 %v8484_v0 }
 0x10a   : > { %5011 = vmatmul.mubr.msk.bf16.gmra.mrb[104].mxu0 %vm554_vm2, %v6661_v55 }
 0x10b   : > { %1127 = vmatprep.mubr.bf16.mxu0 %v8484_v0 }
 0x10d   : > { %v653_v25 = vpop.f32.mrb[0].mxu0  ;;  %v826_v26 = vpop.f32.mrb[0].mxu1 }
 0x10e   : > { %v654_v27 = vadd.f32 %v653_v25, %v6729_v19  ;;  %v655_v28 = vpop.f32.mrb[1].mxu0  ;;  %v827_v29 = vadd.f32 %v826_v26, %v6738_v24  ;;  %v828_v30 = vpop.f32.mrb[1].mxu1 }
 0x10f   : > { %v656_v31 = vadd.f32 %v655_v28, %v6732_v20  ;;  %v657_v32 = vpop.f32.mrb[2].mxu0  ;;  %v830_v34 = vpop.f32.mrb[2].mxu1  ;;  %v6752_v44 = vadd.f32 %v828_v30, %v6743_v33 }
 0x110   : > { %vm1138_vm3 = vcmp.gt.f32.partialorder %v654_v27, 0.0  ;;  %v1306_v37 = vmul.f32 0.2, %v654_v27  ;;  %v658_v38 = vadd.f32 %v657_v32, %v6729_v19  ;;  %v659_v39 = vpop.f32.mrb[3].mxu0  ;;  %vm1140_vm4 = vcmp.gt.f32.partialorder %v827_v29, 0.0  ;;  %v832_v40 = vpop.f32.mrb[3].mxu1 }
 0x111   : > { %v1307_v41 = vmul.f32 0.2, %v656_v31  ;;  %v660_v42 = vadd.f32 %v659_v39, %v6732_v20  ;;  %v1308_v43 = vmul.f32 0.2, %v827_v29  ;;  %v831_v47 = vadd.f32 %v830_v34, %v6738_v24 }
 0x112   : > { %v6754_v45 = vsel %vm1138_vm3, %v654_v27, %v1306_v37  ;;  %vm1144_vm5 = vcmp.gt.f32.partialorder %v658_v38, 0.0  ;;  %v1312_v46 = vmul.f32 0.2, %v658_v38  ;;  %5012 = vmatmul.mubr.msk.bf16.gmra.mrb[108].mxu0 %vm554_vm2, %v6670_v57  ;;  %v6762_v50 = vadd.f32 %v832_v40, %v6743_v33 }
 0x113   : > { %v1313_v48 = vmul.f32 0.2, %v660_v42  ;;  %v6759_v49 = vsel %vm1140_vm4, %v827_v29, %v1308_v43  ;;  %vm1139_vm6 = vcmp.gt.f32.partialorder %v656_v31, 0.0  ;;  %vm1146_vm7 = vcmp.gt.f32.partialorder %v831_v47, 0.0 }
 0x114   : > { %8608 = vst [vmem:[#allocation9_spill] sm:$0xff] %v6759_v49  ;;  %v6764_v51 = vsel %vm1144_vm5, %v658_v38, %v1312_v46  ;;  %v1314_v52 = vmul.f32 0.2, %v831_v47  ;;  %vm1145_vm8 = vcmp.gt.f32.partialorder %v660_v42, 0.0  ;;  %v6769_v54 = vmul.f32 0.2, %v6752_v44 }
 0x115   : > { %v663_v55 = vpop.f32.mrb[4].mxu0  ;;  %v836_v56 = vpop.f32.mrb[4].mxu1  ;;  %v6771_v57 = vsel %vm1139_vm6, %v656_v31, %v1307_v41  ;;  %v6773_v58 = vsel %vm1145_vm8, %v660_v42, %v1313_v48  ;;  %v6784_v3 = vmul.f32 0.2, %v6762_v50 }
 0x116   : > { %v6775_v59 = vsel %vm1146_vm7, %v831_v47, %v1314_v52  ;;  %v664_v60 = vadd.f32 %v663_v55, %v6729_v19  ;;  %v837_v61 = vadd.f32 %v836_v56, %v6738_v24  ;;  %v665_v62 = vpop.f32.mrb[5].mxu0  ;;  %v838_v63 = vpop.f32.mrb[5].mxu1 }
 0x117   : > { %8609 = vst [vmem:[#allocation10_spill] sm:$0xff] %v6775_v59  ;;  %v666_v4 = vadd.f32 %v665_v62, %v6732_v20  ;;  %v839_v5 = vadd.f32 %v838_v63, %v6743_v33  ;;  %v667_v6 = vpop.f32.mrb[6].mxu0  ;;  %v840_v7 = vpop.f32.mrb[6].mxu1 }
 0x118   : > { %vm1150_vm9 = vcmp.gt.f32.partialorder %v664_v60, 0.0  ;;  %v1318_v8 = vmul.f32 0.2, %v664_v60  ;;  %vm1152_vm10 = vcmp.gt.f32.partialorder %v837_v61, 0.0  ;;  %v1320_v9 = vmul.f32 0.2, %v837_v61 }
 0x119   : > { %v1319_v10 = vmul.f32 0.2, %v666_v4  ;;  %v1321_v11 = vmul.f32 0.2, %v839_v5  ;;  %v668_v13 = vadd.f32 %v667_v6, %v6729_v19  ;;  %v841_v16 = vadd.f32 %v840_v7, %v6738_v24  ;;  %v669_v18 = vpop.f32.mrb[7].mxu0  ;;  %v842_v21 = vpop.f32.mrb[7].mxu1 }
 0x11a   : > { %v1486_v22 = vsel %vm1150_vm9, %v664_v60, %v1318_v8  ;;  %v1488_v23 = vsel %vm1152_vm10, %v837_v61, %v1320_v9  ;;  %v670_v25 = vadd.f32 %v669_v18, %v6732_v20  ;;  %v843_v26 = vadd.f32 %v842_v21, %v6743_v33 }
 0x11b   : > { %vm1156_vm11 = vcmp.gt.f32.partialorder %v668_v13, 0.0  ;;  %v1324_v27 = vmul.f32 0.2, %v668_v13  ;;  %vm1158_vm12 = vcmp.gt.f32.partialorder %v841_v16, 0.0  ;;  %v1326_v28 = vmul.f32 0.2, %v841_v16 }
 0x11c   : > { %v1325_v29 = vmul.f32 0.2, %v670_v25  ;;  %v1327_v30 = vmul.f32 0.2, %v843_v26  ;;  %vm1151_vm13 = vcmp.gt.f32.partialorder %v666_v4, 0.0  ;;  %vm1157_vm14 = vcmp.gt.f32.partialorder %v670_v25, 0.0 }
 0x11d   : > { %v1492_v31 = vsel %vm1156_vm11, %v668_v13, %v1324_v27  ;;  %v1494_v32 = vsel %vm1158_vm12, %v841_v16, %v1326_v28  ;;  %v673_v34 = vpop.f32.mrb[8].mxu0  ;;  %v846_v37 = vpop.f32.mrb[8].mxu1  ;;  %v1487_v38 = vsel %vm1151_vm13, %v666_v4, %v1319_v10  ;;  %vm1153_vm15 = vcmp.gt.f32.partialorder %v839_v5, 0.0 }
 0x11e   : > { %v6792_v39 = vpack.c.bf16 %v1492_v31, %v1486_v22  ;;  %v6794_v40 = vpack.c.bf16 %v1494_v32, %v1488_v23  ;;  %v674_v41 = vadd.f32 %v673_v34, %v6729_v19  ;;  %v6798_v42 = vadd.f32 %v846_v37, %v6738_v24  ;;  %v675_v43 = vpop.f32.mrb[9].mxu0  ;;  %v848_v46 = vpop.f32.mrb[9].mxu1  ;;  %v6218_v22 = vld [vmem:[#allocation3 + $0x280] sm:$0xff]   ;;  %v6219_v31 = vld [vmem:[#allocation3 + $0x2c8] sm:$0xff]  }
 0x11f   : > { %v676_v47 = vadd.f32 %v675_v43, %v6732_v20  ;;  %v849_v48 = vadd.f32 %v848_v46, %v6743_v33  ;;  %v677_v52 = vpop.f32.mrb[10].mxu0  ;;  %v850_v55 = vpop.f32.mrb[10].mxu1  ;;  %v1493_v56 = vsel %vm1157_vm14, %v670_v25, %v1325_v29  ;;  %vm1159_vm0 = vcmp.gt.f32.partialorder %v843_v26, 0.0 }
 0x120   : > { %8610 = vst [vmem:[#allocation11_spill] sm:$0xff] %v6794_v40  ;;  %v1330_v60 = vmul.f32 0.2, %v674_v41  ;;  %v6804_v61 = vmul.f32 0.2, %v6798_v42  ;;  %v6807_v62 = vadd.f32 %v677_v52, %v6729_v19  ;;  %v6810_v63 = vadd.f32 %v850_v55, %v6738_v24  ;;  %v679_v4 = vpop.f32.mrb[11].mxu0 }
 0x121   : > { %v852_v6 = vpop.f32.mrb[11].mxu1  ;;  %v1331_v7 = vmul.f32 0.2, %v676_v47  ;;  %v1333_v8 = vmul.f32 0.2, %v849_v48  ;;  %v680_v9 = vadd.f32 %v679_v4, %v6732_v20  ;;  %v6818_v18 = vpack.c.bf16 %v1493_v56, %v1487_v38  ;;  %v6231_v52 = vld [vmem:[#allocation3 + $0x48] sm:$0xff]  }
 0x122   : > { %v853_v10 = vadd.f32 %v852_v6, %v6743_v33  ;;  %v1336_v13 = vmul.f32 0.2, %v6807_v62  ;;  %v6816_v16 = vmul.f32 0.2, %v6810_v63  ;;  %v1489_v21 = vsel %vm1153_vm15, %v839_v5, %v1321_v11  ;;  %v6230_v11 = vld [vmem:[#allocation3] sm:$0xff]  }
 0x123   : > { %v1337_v23 = vmul.f32 0.2, %v680_v9  ;;  %v1495_v27 = vsel %vm1159_vm0, %v843_v26, %v1327_v30  ;;  %vm1163_vm1 = vcmp.gt.f32.partialorder %v676_v47, 0.0  ;;  %2425 = vmatprep.mubr.bf16.mxu1 %v6818_v18  ;;  %vm1169_vm2 = vcmp.gt.f32.partialorder %v680_v9, 0.0 }
 0x124   : > { %v1339_v25 = vmul.f32 0.2, %v853_v10  ;;  %v6823_v28 = vpack.c.bf16 %v1495_v27, %v1489_v21  ;;  %v1499_v29 = vsel %vm1163_vm1, %v676_v47, %v1331_v7  ;;  %vm1165_vm3 = vcmp.gt.f32.partialorder %v849_v48, 0.0  ;;  %2426 = vmatmul.mubr.bf16.vlgmr.msra.gmra.mrb[56].mxu1 %v6792_v39  ;;  %v6220_v47 = vld [vmem:[#allocation3 + $0x288] sm:$0xff]  }
 0x125   : > { %v683_v32 = vpop.f32.mrb[12].mxu0  ;;  %v856_v34 = vpop.f32.mrb[12].mxu1  ;;  %v1505_v37 = vsel %vm1169_vm2, %v680_v9, %v1337_v23  ;;  %vm1171_vm4 = vcmp.gt.f32.partialorder %v853_v10, 0.0  ;;  %v1501_v5 = vsel %vm1165_vm3, %v849_v48, %v1333_v8  ;;  %vm1162_vm5 = vcmp.gt.f32.partialorder %v674_v41, 0.0  ;;  %5378 = vmatpush3.bf16.msra.mxu1 %v6218_v22  ;;  %v6221_v8 = vld [vmem:[#allocation3 + $0x2d0] sm:$0xff]  }
 0x126   : > { %8611 = vst [vmem:[#allocation12_spill] sm:$0xff] %v6823_v28  ;;  %2570 = vmatprep.mubr.bf16.mxu0 %v6823_v28  ;;  %v6828_v26 = vadd.f32 %v683_v32, %v6729_v19  ;;  %v6831_v30 = vadd.f32 %v856_v34, %v6738_v24  ;;  %v685_v38 = vpop.f32.mrb[13].mxu0  ;;  %v858_v43 = vpop.f32.mrb[13].mxu1  ;;  %v6833_v46 = vpack.c.bf16 %v1505_v37, %v1499_v29  ;;  %vm1168_vm6 = vcmp.gt.f32.partialorder %v6807_v62, 0.0  ;;  %v6232_v32 = vld [vmem:[#allocation3 + $0x8] sm:$0xff]  }
 0x127   : > { %2571 = vmatmul.mubr.bf16.vlgmr.msra.gmra.mrb[112].mxu0 %v6794_v40  ;;  %v686_v48 = vadd.f32 %v685_v38, %v6732_v20  ;;  %v6839_v55 = vadd.f32 %v858_v43, %v6743_v33  ;;  %v687_v56 = vpop.f32.mrb[14].mxu0  ;;  %v860_v4 = vpop.f32.mrb[14].mxu1  ;;  %v1507_v6 = vsel %vm1171_vm4, %v853_v10, %v1339_v25  ;;  %v1498_v7 = vsel %vm1162_vm5, %v674_v41, %v1330_v60  ;;  %v6222_v43 = vld [vmem:[#allocation3 + $0x290] sm:$0xff]  }
 0x128   : > { %8612 = vst [vmem:[#allocation13_spill] sm:$0xff] %v6833_v46  ;;  %v6844_v9 = vmul.f32 0.2, %v6828_v26  ;;  %v6847_v21 = vmul.f32 0.2, %v6831_v30  ;;  %v6850_v22 = vadd.f32 %v687_v56, %v6729_v19  ;;  %v6853_v23 = vadd.f32 %v860_v4, %v6738_v24  ;;  %v689_v27 = vpop.f32.mrb[15].mxu0  ;;  %2433 = vmatprep.mubr.bf16.mxu1 %v6833_v46  ;;  %5379 = vmatprep.subr.bf16.mxu1 %v6219_v31 }
 0x129   : > { %v862_v29 = vpop.f32.mrb[15].mxu1  ;;  %v1343_v10 = vmul.f32 0.2, %v686_v48  ;;  %v1345_v41 = vmul.f32 0.2, %v6839_v55  ;;  %v690_v60 = vadd.f32 %v689_v27, %v6732_v20  ;;  %5478 = vmatpush3.bf16.msra.mxu0 %v6230_v11  ;;  %v6867_v38 = vpack.c.bf16 %v1507_v6, %v1501_v5  ;;  %5380 = vmatpush3.bf16.msra.mxu1 %v6220_v47  ;;  %v6223_v56 = vld [vmem:[#allocation3 + $0x2d8] sm:$0xff]  }
 0x12a   : > { %v6859_v25 = vadd.f32 %v862_v29, %v6743_v33  ;;  %v6862_v34 = vmul.f32 0.2, %v6850_v22  ;;  %v6865_v37 = vmul.f32 0.2, %v6853_v23  ;;  %v1504_v31 = vsel %vm1168_vm6, %v6807_v62, %v1336_v13  ;;  %5479 = vmatprep.subr.bf16.mxu0 %v6231_v52  ;;  %5381 = vmatprep.subr.bf16.mxu1 %v6221_v8  ;;  %v6234_v29 = vld [vmem:[#allocation3 + $0x50] sm:$0xff]  }
 0x12b   : > { %8613 = vst [vmem:[#allocation14_spill] sm:$0xff] %v6867_v38  ;;  %v1349_v4 = vmul.f32 0.2, %v690_v60  ;;  %v6873_v27 = vpack.c.bf16 %v1504_v31, %v1498_v7  ;;  %vm1164_vm7 = vcmp.gt.f32.partialorder %v6798_v42, 0.0  ;;  %2578 = vmatprep.mubr.bf16.mxu0 %v6867_v38  ;;  %vm1170_vm8 = vcmp.gt.f32.partialorder %v6810_v63, 0.0  ;;  %v6236_v7 = vld [vmem:[#allocation3 + $0x10] sm:$0xff]  }
 0x12c   : > { %v1351_v11 = vmul.f32 0.2, %v6859_v25  ;;  %v1500_v62 = vsel %vm1164_vm7, %v6798_v42, %v6804_v61  ;;  %vm1175_vm9 = vcmp.gt.f32.partialorder %v686_v48, 0.0  ;;  %vm1181_vm10 = vcmp.gt.f32.partialorder %v690_v60, 0.0  ;;  %v6248_v38 = vld [vmem:[#allocation3 + $0x38] sm:$0xff]  }
 0x12d   : > { %8614 = vst [vmem:[#allocation15_spill] sm:$0xff] %v6873_v27  ;;  %2434 = vmatmul.mubr.bf16.gmra.mrb[60].mxu1 %v6873_v27  ;;  %v1506_v13 = vsel %vm1170_vm8, %v6810_v63, %v6816_v16  ;;  %v693_v5 = vpop.f32.mrb[16].mxu0  ;;  %v866_v47 = vpop.f32.mrb[16].mxu1  ;;  %v1511_v52 = vsel %vm1175_vm9, %v686_v48, %v1343_v10  ;;  %v1517_v6 = vsel %vm1181_vm10, %v690_v60, %v1349_v4  ;;  %vm1177_vm11 = vcmp.gt.f32.partialorder %v6839_v55, 0.0  ;;  %v6224_v63 = vld [vmem:[#allocation3 + $0x298] sm:$0xff]  }
 0x12e   : > { %5480 = vmatpush3.bf16.msra.mxu0 %v6232_v32  ;;  %v6884_v8 = vpack.c.bf16 %v1506_v13, %v1500_v62  ;;  %v6887_v31 = vadd.f32 %v693_v5, %v6729_v19  ;;  %v6890_v42 = vadd.f32 %v866_v47, %v6738_v24  ;;  %v695_v61 = vpop.f32.mrb[17].mxu0  ;;  %v868_v12 = vpop.f32.mrb[17].mxu1  ;;  %v6892_v2 = vpack.c.bf16 %v1517_v6, %v1511_v52  ;;  %v6237_v16 = vld [vmem:[#allocation3 + $0x58] sm:$0xff]   ;;  %v6225_v62 = vld [vmem:[#allocation3 + $0x2e0] sm:$0xff]  }
 0x12f   : > { %5382 = vmatpush3.bf16.msra.mxu1 %v6222_v43  ;;  %v6895_v48 = vadd.f32 %v695_v61, %v6732_v20  ;;  %v6898_v10 = vadd.f32 %v868_v12, %v6743_v33  ;;  %v697_v60 = vpop.f32.mrb[18].mxu0  ;;  %v870_v32 = vpop.f32.mrb[18].mxu1  ;;  %vm1183_vm12 = vcmp.gt.f32.partialorder %v6859_v25, 0.0  ;;  %v1513_v4 = vsel %vm1177_vm11, %v6839_v55, %v1345_v41  ;;  %5481 = vmatprep.subr.bf16.mxu0 %v6234_v29  ;;  %v6226_v6 = vld [vmem:[#allocation3 + $0x2a0] sm:$0xff]   ;;  %v6238_v61 = vld [vmem:[#allocation3 + $0x18] sm:$0xff]  }
 0x130   : > { %8615 = vst [vmem:[#allocation16_spill] sm:$0xff] %v6884_v8  ;;  %8616 = vst [vmem:[#allocation17_spill] sm:$0xff] %v6892_v2  ;;  %5383 = vmatprep.subr.bf16.mxu1 %v6223_v56  ;;  %2579 = vmatmul.mubr.bf16.gmra.mrb[116].mxu0 %v6884_v8  ;;  %v6906_v43 = vmul.f32 0.2, %v6887_v31  ;;  %v6909_v13 = vmul.f32 0.2, %v6890_v42  ;;  %v6912_v12 = vadd.f32 %v697_v60, %v6729_v19 }
 0x131   : > { %v6915_v5 = vadd.f32 %v870_v32, %v6738_v24  ;;  %v699_v47 = vpop.f32.mrb[19].mxu0  ;;  %v872_v52 = vpop.f32.mrb[19].mxu1  ;;  %2441 = vmatprep.mubr.bf16.mxu1 %v6892_v2  ;;  %v1355_v55 = vmul.f32 0.2, %v6895_v48  ;;  %v6920_v41 = vmul.f32 0.2, %v6898_v10  ;;  %v1519_v53 = vsel %vm1183_vm12, %v6859_v25, %v1351_v11 }
 0x132   : > { %v700_v56 = vadd.f32 %v699_v47, %v6732_v20  ;;  %v6924_v29 = vadd.f32 %v872_v52, %v6743_v33  ;;  %5482 = vmatpush3.bf16.msra.mxu0 %v6236_v7  ;;  %v6927_v60 = vmul.f32 0.2, %v6912_v12  ;;  %vm1174_vm13 = vcmp.gt.f32.partialorder %v6828_v26, 0.0  ;;  %v6239_v47 = vld [vmem:[#allocation3 + $0x60] sm:$0xff]   ;;  %v6227_v11 = vld [vmem:[#allocation3 + $0x2e8] sm:$0xff]  }
 0x133   : > { %v6930_v32 = vmul.f32 0.2, %v6915_v5  ;;  %5384 = vmatpush3.bf16.msra.mxu1 %v6224_v63  ;;  %5483 = vmatprep.subr.bf16.mxu0 %v6237_v16  ;;  %v6939_v7 = vpack.c.bf16 %v1519_v53, %v1513_v4  ;;  %vm1180_vm14 = vcmp.gt.f32.partialorder %v6850_v22, 0.0  ;;  %v1510_v0 = vsel %vm1174_vm13, %v6828_v26, %v6844_v9  ;;  %v6240_v9 = vld [vmem:[#allocation3 + $0x20] sm:$0xff]  }
 0x134   : > { %v1361_v52 = vmul.f32 0.2, %v700_v56  ;;  %v6937_v1 = vmul.f32 0.2, %v6924_v29  ;;  %5385 = vmatprep.subr.bf16.mxu1 %v6225_v62  ;;  %v1516_v25 = vsel %vm1180_vm14, %v6850_v22, %v6862_v34  ;;  %vm1176_vm15 = vcmp.gt.f32.partialorder %v6831_v30, 0.0 }
 0x135   : > { %8617 = vst [vmem:[#allocation18_spill] sm:$0xff] %v6939_v7  ;;  %vm1182_vm0 = vcmp.gt.f32.partialorder %v6853_v23, 0.0  ;;  %2586 = vmatprep.mubr.bf16.mxu0 %v6939_v7  ;;  %v6949_v63 = vpack.c.bf16 %v1516_v25, %v1510_v0  ;;  %v1512_v53 = vsel %vm1176_vm15, %v6831_v30, %v6847_v21  ;;  %v703_v4 = vpop.f32.mrb[20].mxu0  ;;  %v876_v26 = vpop.f32.mrb[20].mxu1  ;;  %vm1187_vm1 = vcmp.gt.f32.partialorder %v6895_v48, 0.0  ;;  %v6228_v30 = vld [vmem:[#allocation3 + $0x2a8] sm:$0xff]  }
 0x136   : > { %v1518_v16 = vsel %vm1182_vm0, %v6853_v23, %v6865_v37  ;;  %5484 = vmatpush3.bf16.msra.mxu0 %v6238_v61  ;;  %v6959_v34 = vadd.f32 %v703_v4, %v6729_v19  ;;  %v6962_v0 = vadd.f32 %v876_v26, %v6738_v24  ;;  %v705_v62 = vpop.f32.mrb[21].mxu0  ;;  %v878_v25 = vpop.f32.mrb[21].mxu1  ;;  %vm1193_vm2 = vcmp.gt.f32.partialorder %v700_v56, 0.0  ;;  %v6241_v21 = vld [vmem:[#allocation3 + $0x68] sm:$0xff]   ;;  %v6233_v26 = vld [vmem:[#allocation3 + $0x2f0] sm:$0xff]  }
 0x137   : > { %8618 = vst [vmem:[#allocation19_spill] sm:$0xff] %v6949_v63  ;;  %v6956_v22 = vpack.c.bf16 %v1518_v16, %v1512_v53  ;;  %5386 = vmatpush3.bf16.msra.mxu1 %v6226_v6  ;;  %5485 = vmatprep.subr.bf16.mxu0 %v6239_v47  ;;  %v6966_v23 = vadd.f32 %v705_v62, %v6732_v20  ;;  %v707_v61 = vpop.f32.mrb[22].mxu0  ;;  %v880_v53 = vpop.f32.mrb[22].mxu1  ;;  %vm1189_vm3 = vcmp.gt.f32.partialorder %v6898_v10, 0.0  ;;  %vm1195_vm4 = vcmp.gt.f32.partialorder %v6924_v29, 0.0 }
 0x138   : > { %2442 = vmatmul.mubr.bf16.gmra.mrb[64].mxu1 %v6949_v63  ;;  %v6969_v37 = vadd.f32 %v878_v25, %v6743_v33  ;;  %v1523_v16 = vsel %vm1187_vm1, %v6895_v48, %v1355_v55  ;;  %v1529_v4 = vsel %vm1193_vm2, %v700_v56, %v1361_v52  ;;  %v6976_v6 = vmul.f32 0.2, %v6959_v34  ;;  %v709_v14 = vpop.f32.mrb[23].mxu0  ;;  %v882_v15 = vpop.f32.mrb[23].mxu1  ;;  %5387 = vmatprep.subr.bf16.mxu1 %v6227_v11 }
 0x139   : > { %8619 = vst [vmem:[#allocation20_spill] sm:$0xff] %v6956_v22  ;;  %2587 = vmatmul.mubr.bf16.gmra.mrb[120].mxu0 %v6956_v22  ;;  %v6979_v47 = vmul.f32 0.2, %v6962_v0  ;;  %v6982_v62 = vadd.f32 %v707_v61, %v6729_v19  ;;  %v6985_v25 = vadd.f32 %v880_v53, %v6738_v24  ;;  %v6988_v48 = vmul.f32 0.2, %v6966_v23  ;;  %v6242_v61 = vld [vmem:[#allocation3 + $0x28] sm:$0xff]  }
 0x13a   : > { %v6991_v55 = vmul.f32 0.2, %v6969_v37  ;;  %v6994_v56 = vadd.f32 %v709_v14, %v6732_v20  ;;  %v6997_v52 = vadd.f32 %v882_v15, %v6743_v33  ;;  %5486 = vmatpush3.bf16.msra.mxu0 %v6240_v9  ;;  %v7005_v11 = vpack.c.bf16 %v1529_v4, %v1523_v16  ;;  %v6235_v22 = vld [vmem:[#allocation3 + $0x2b0] sm:$0xff]  }
 0x13b   : > { %v7000_v53 = vmul.f32 0.2, %v6982_v62  ;;  %v7003_v17 = vmul.f32 0.2, %v6985_v25  ;;  %5388 = vmatpush3.bf16.msra.mxu1 %v6228_v30  ;;  %5487 = vmatprep.subr.bf16.mxu0 %v6241_v21  ;;  %v1525_v9 = vsel %vm1189_vm3, %v6898_v10, %v6920_v41  ;;  %v1531_v16 = vsel %vm1195_vm4, %v6924_v29, %v6937_v1  ;;  %v6243_v30 = vld [vmem:[#allocation3 + $0x2f8] sm:$0xff]   ;;  %v6245_v1 = vld [vmem:[#allocation3 + $0x70] sm:$0xff]  }
 0x13c   : > { %8620 = vst [vmem:[#allocation21_spill] sm:$0xff] %v7005_v11  ;;  %v1373_v14 = vmul.f32 0.2, %v6994_v56  ;;  %v7010_v15 = vmul.f32 0.2, %v6997_v52  ;;  %5389 = vmatprep.subr.bf16.mxu1 %v6233_v26  ;;  %2449 = vmatprep.mubr.bf16.mxu1 %v7005_v11  ;;  %vm1186_vm5 = vcmp.gt.f32.partialorder %v6887_v31, 0.0  ;;  %v7021_v21 = vpack.c.bf16 %v1531_v16, %v1525_v9 }
 0x13d   : > { %vm1192_vm6 = vcmp.gt.f32.partialorder %v6912_v12, 0.0  ;;  %vm1188_vm7 = vcmp.gt.f32.partialorder %v6890_v42, 0.0  ;;  %v1522_v4 = vsel %vm1186_vm5, %v6887_v31, %v6906_v43  ;;  %vm1194_vm8 = vcmp.gt.f32.partialorder %v6915_v5, 0.0  ;;  %v713_v41 = vpop.f32.mrb[24].mxu0  ;;  %v886_v26 = vpop.f32.mrb[24].mxu1 }
 0x13e   : > { %8621 = vst [vmem:[#allocation22_spill] sm:$0xff] %v7021_v21  ;;  %v1528_v10 = vsel %vm1192_vm6, %v6912_v12, %v6927_v60  ;;  %5488 = vmatpush3.bf16.msra.mxu0 %v6242_v61  ;;  %v1524_v7 = vsel %vm1188_vm7, %v6890_v42, %v6909_v13  ;;  %v1530_v9 = vsel %vm1194_vm8, %v6915_v5, %v6930_v32  ;;  %v715_v31 = vpop.f32.mrb[25].mxu0  ;;  %v888_v43 = vpop.f32.mrb[25].mxu1  ;;  %v6244_v12 = vld [vmem:[#allocation3 + $0x2b8] sm:$0xff]   ;;  %v6246_v60 = vld [vmem:[#allocation3 + $0x30] sm:$0xff]   ;;  %vm1199_vm9 = vcmp.gt.f32.partialorder %v6966_v23, 0.0 }
 0x13f   : > { %v7028_v29 = vpack.c.bf16 %v1528_v10, %v1522_v4  ;;  %v7035_v16 = vadd.f32 %v713_v41, %v6729_v19  ;;  %5390 = vmatpush3.bf16.msra.mxu1 %v6235_v22  ;;  %2594 = vmatprep.mubr.bf16.mxu0 %v7021_v21  ;;  %v7038_v61 = vpack.c.bf16 %v1530_v9, %v1524_v7  ;;  %v717_v5 = vpop.f32.mrb[26].mxu0  ;;  %v890_v32 = vpop.f32.mrb[26].mxu1  ;;  %v6247_v10 = vld [vmem:[#allocation3 + $0x78] sm:$0xff]   ;;  %v6249_v41 = vld [vmem:[#allocation3 + $0xc0] sm:$0xff]   ;;  %vm1141_vm10 = vcmp.gt.f32.partialorder %v6752_v44, 0.0 }
 0x140   : > { %v7041_v4 = vadd.f32 %v886_v26, %v6738_v24  ;;  %v7044_v42 = vadd.f32 %v715_v31, %v6732_v20  ;;  %v7047_v13 = vadd.f32 %v888_v43, %v6743_v33  ;;  %v7054_v7 = vadd.f32 %v717_v5, %v6729_v19  ;;  %v719_v9 = vpop.f32.mrb[27].mxu0  ;;  %v892_v31 = vpop.f32.mrb[27].mxu1  ;;  %5391 = vmatprep.subr.bf16.mxu1 %v6243_v30 }
 0x141   : > { %8622 = vst [vmem:[#allocation23_spill] sm:$0xff] %v7028_v29  ;;  %8623 = vst [vmem:[#allocation24_spill] sm:$0xff] %v7038_v61  ;;  %2450 = vmatmul.mubr.bf16.gmra.mrb[68].mxu1 %v7028_v29  ;;  %v7051_v22 = vmul.f32 0.2, %v7035_v16  ;;  %v7057_v26 = vadd.f32 %v890_v32, %v6738_v24  ;;  %2595 = vmatmul.mubr.bf16.gmra.mrb[124].mxu0 %v7038_v61  ;;  %v7072_v32 = vadd.f32 %v719_v9, %v6732_v20 }
 0x142   : > { %v7063_v43 = vmul.f32 0.2, %v7041_v4  ;;  %v7066_v21 = vmul.f32 0.2, %v7044_v42  ;;  %v7069_v5 = vmul.f32 0.2, %v7047_v13  ;;  %5489 = vmatprep.subr.bf16.mxu0 %v6245_v1  ;;  %v7081_v61 = vadd.f32 %v892_v31, %v6743_v33 }
 0x143   : > { %v7075_v8 = vmul.f32 0.2, %v7054_v7  ;;  %v7078_v30 = vmul.f32 0.2, %v7057_v26  ;;  %vm1205_vm11 = vcmp.gt.f32.partialorder %v6994_v56, 0.0  ;;  %5392 = vmatpush3.bf16.msra.mxu1 %v6244_v12  ;;  %5490 = vmatpush3.bf16.msra.mxu0 %v6246_v60  ;;  %v1535_v1 = vsel %vm1199_vm9, %v6966_v23, %v6988_v48 }
 0x144   : > { %v1385_v40 = vmul.f32 0.2, %v7072_v32  ;;  %v1541_v9 = vsel %vm1205_vm11, %v6994_v56, %v1373_v14  ;;  %vm1201_vm12 = vcmp.gt.f32.partialorder %v6969_v37, 0.0  ;;  %5491 = vmatprep.subr.bf16.mxu0 %v6247_v10  ;;  %5577 = vmatprep.subr.bf16.mxu1 %v6249_v41  ;;  %v1387_v31 = vmul.f32 0.2, %v7081_v61 }
 0x145   : > { %v7092_v28 = vpack.c.bf16 %v1541_v9, %v1535_v1  ;;  %vm1207_vm13 = vcmp.gt.f32.partialorder %v6997_v52, 0.0  ;;  %v1537_v12 = vsel %vm1201_vm12, %v6969_v37, %v6991_v55  ;;  %vm1198_vm14 = vcmp.gt.f32.partialorder %v6959_v34, 0.0  ;;  %v723_v23 = vpop.f32.mrb[28].mxu0  ;;  %v896_v48 = vpop.f32.mrb[28].mxu1 }
 0x146   : > { %v1543_v60 = vsel %vm1207_vm13, %v6997_v52, %v7010_v15  ;;  %vm1204_vm15 = vcmp.gt.f32.partialorder %v6982_v62, 0.0  ;;  %vm1200_vm0 = vcmp.gt.f32.partialorder %v6962_v0, 0.0  ;;  %v1534_v14 = vsel %vm1198_vm14, %v6959_v34, %v6976_v6  ;;  %v725_v55 = vpop.f32.mrb[29].mxu0  ;;  %v898_v52 = vpop.f32.mrb[29].mxu1 }
 0x147   : > { %8624 = vst [vmem:[#allocation25_spill] sm:$0xff] %v7092_v28  ;;  %2457 = vmatprep.mubr.bf16.mxu1 %v7092_v28  ;;  %v7103_v56 = vpack.c.bf16 %v1543_v60, %v1537_v12  ;;  %v1540_v37 = vsel %vm1204_vm15, %v6982_v62, %v7000_v53  ;;  %vm1206_vm1 = vcmp.gt.f32.partialorder %v6985_v25, 0.0  ;;  %5492 = vmatpush3.bf16.msra.mxu0 %v6248_v38  ;;  %v727_v34 = vpop.f32.mrb[30].mxu0  ;;  %v900_v6 = vpop.f32.mrb[30].mxu1  ;;  %vm1211_vm2 = vcmp.gt.f32.partialorder %v7044_v42, 0.0 }
 0x148   : > { %v7110_v15 = vpack.c.bf16 %v1540_v37, %v1534_v14  ;;  %v1536_v10 = vsel %vm1200_vm0, %v6962_v0, %v6979_v47  ;;  %v1542_v41 = vsel %vm1206_vm1, %v6985_v25, %v7003_v17  ;;  %v7117_v1 = vadd.f32 %v723_v23, %v6729_v19  ;;  %v729_v47 = vpop.f32.mrb[31].mxu0  ;;  %v902_v17 = vpop.f32.mrb[31].mxu1 }
 0x149   : > { %8625 = vst [vmem:[#allocation26_spill] sm:$0xff] %v7103_v56  ;;  %2602 = vmatprep.mubr.bf16.mxu0 %v7103_v56  ;;  %v7120_v62 = vpack.c.bf16 %v1542_v41, %v1536_v10  ;;  %v7123_v53 = vadd.f32 %v896_v48, %v6738_v24  ;;  %v7126_v38 = vadd.f32 %v725_v55, %v6732_v20  ;;  %vm1217_vm3 = vcmp.gt.f32.partialorder %v7072_v32, 0.0 }
 0x14a   : > { %8626 = vst [vmem:[#allocation27_spill] sm:$0xff] %v7110_v15  ;;  %v7129_v0 = vadd.f32 %v898_v52, %v6743_v33  ;;  %2458 = vmatmul.mubr.bf16.gmra.mrb[72].mxu1 %v7110_v15  ;;  %v7133_v25 = vmul.f32 0.2, %v7117_v1  ;;  %v7136_v9 = vadd.f32 %v727_v34, %v6729_v19  ;;  %v7139_v12 = vadd.f32 %v900_v6, %v6738_v24 }
 0x14b   : > { %8627 = vst [vmem:[#allocation28_spill] sm:$0xff] %v7120_v62  ;;  %v7142_v60 = vadd.f32 %v729_v47, %v6732_v20  ;;  %2603 = vmatmul.mubr.bf16.gmra.mrb[128].mxu0 %v7120_v62  ;;  %v7146_v23 = vmul.f32 0.2, %v7123_v53  ;;  %v1391_v48 = vmul.f32 0.2, %v7126_v38  ;;  %v7153_v37 = vadd.f32 %v902_v17, %v6743_v33 }
 0x14c   : > { %v7150_v14 = vmul.f32 0.2, %v7129_v0  ;;  %v7156_v55 = vmul.f32 0.2, %v7136_v9  ;;  %v7159_v52 = vmul.f32 0.2, %v7139_v12  ;;  %v7166_v41 = vsel %vm1141_vm10, %v6752_v44, %v6769_v54 }
 0x14d   : > { %v1397_v10 = vmul.f32 0.2, %v7142_v60  ;;  %v1399_v34 = vmul.f32 0.2, %v7153_v37  ;;  %vm1213_vm4 = vcmp.gt.f32.partialorder %v7047_v13, 0.0  ;;  %v1547_v6 = vsel %vm1211_vm2, %v7044_v42, %v7066_v21  ;;  %v733_v44 = vpop.f32.mrb[32].mxu0 }
 0x14e   : > { %v1553_v47 = vsel %vm1217_vm3, %v7072_v32, %v1385_v40  ;;  %vm1219_vm5 = vcmp.gt.f32.partialorder %v7081_v61, 0.0  ;;  %v1549_v17 = vsel %vm1213_vm4, %v7047_v13, %v7069_v5  ;;  %v906_v54 = vpop.f32.mrb[32].mxu1  ;;  %vm1210_vm6 = vcmp.gt.f32.partialorder %v7035_v16, 0.0  ;;  %v735_v49 = vpop.f32.mrb[33].mxu0 }
 0x14f   : > { %v7178_v62 = vpack.c.bf16 %v1553_v47, %v1547_v6  ;;  %v1555_v56 = vsel %vm1219_vm5, %v7081_v61, %v1387_v31  ;;  %vm1216_vm7 = vcmp.gt.f32.partialorder %v7054_v7, 0.0  ;;  %v908_v59 = vpop.f32.mrb[33].mxu1  ;;  %v1546_v40 = vsel %vm1210_vm6, %v7035_v16, %v7051_v22  ;;  %v737_v13 = vpop.f32.mrb[34].mxu0 }
 0x150   : > { %v7183_v21 = vpack.c.bf16 %v1555_v56, %v1549_v17  ;;  %v1552_v42 = vsel %vm1216_vm7, %v7054_v7, %v7075_v8  ;;  %vm1212_vm8 = vcmp.gt.f32.partialorder %v7041_v4, 0.0  ;;  %v910_v5 = vpop.f32.mrb[34].mxu1  ;;  %vm1218_vm9 = vcmp.gt.f32.partialorder %v7057_v26, 0.0  ;;  %v739_v16 = vpop.f32.mrb[35].mxu0 }
 0x151   : > { %8628 = vst [vmem:[#allocation29_spill] sm:$0xff] %v7178_v62  ;;  %2465 = vmatprep.mubr.bf16.mxu1 %v7178_v62  ;;  %v7191_v61 = vpack.c.bf16 %v1552_v42, %v1546_v40  ;;  %v1548_v32 = vsel %vm1212_vm8, %v7041_v4, %v7063_v43  ;;  %v7197_v31 = vadd.f32 %v733_v44, %v6729_v19  ;;  %v912_v22 = vpop.f32.mrb[35].mxu1  ;;  %vm1223_vm10 = vcmp.gt.f32.partialorder %v7126_v38, 0.0 }
 0x152   : > { %8629 = vst [vmem:[#allocation30_spill] sm:$0xff] %v7183_v21  ;;  %2610 = vmatprep.mubr.bf16.mxu0 %v7183_v21  ;;  %v1554_v8 = vsel %vm1218_vm9, %v7057_v26, %v7078_v30  ;;  %v7203_v7 = vadd.f32 %v906_v54, %v6738_v24  ;;  %v7206_v56 = vadd.f32 %v735_v49, %v6732_v20  ;;  %vm1229_vm11 = vcmp.gt.f32.partialorder %v7142_v60, 0.0 }
 0x153   : > { %8630 = vst [vmem:[#allocation31_spill] sm:$0xff] %v7191_v61  ;;  %v7209_v6 = vadd.f32 %v908_v59, %v6743_v33  ;;  %2466 = vmatmul.mubr.bf16.gmra.mrb[76].mxu1 %v7191_v61  ;;  %v7212_v4 = vpack.c.bf16 %v1554_v8, %v1548_v32  ;;  %v7215_v43 = vmul.f32 0.2, %v7197_v31  ;;  %v7218_v47 = vadd.f32 %v737_v13, %v6729_v19 }
 0x154   : > { %v7221_v26 = vadd.f32 %v910_v5, %v6738_v24  ;;  %v7224_v30 = vmul.f32 0.2, %v7203_v7  ;;  %v1403_v49 = vmul.f32 0.2, %v7206_v56  ;;  %v7231_v17 = vadd.f32 %v739_v16, %v6732_v20 }
 0x155   : > { %8631 = vst [vmem:[#allocation32_spill] sm:$0xff] %v7212_v4  ;;  %v7228_v59 = vmul.f32 0.2, %v7209_v6  ;;  %2611 = vmatmul.mubr.bf16.gmra.mrb[132].mxu0 %v7212_v4  ;;  %v7235_v44 = vmul.f32 0.2, %v7218_v47  ;;  %v7241_v40 = vadd.f32 %v912_v22, %v6743_v33  ;;  %v1559_v13 = vsel %vm1223_vm10, %v7126_v38, %v1391_v48  ;;  %v743_v5 = vpop.f32.mrb[36].mxu0 }
 0x156   : > { %v7238_v54 = vmul.f32 0.2, %v7221_v26  ;;  %v1409_v42 = vmul.f32 0.2, %v7231_v17  ;;  %vm1225_vm12 = vcmp.gt.f32.partialorder %v7129_v0, 0.0  ;;  %v916_v32 = vpop.f32.mrb[36].mxu1  ;;  %v1565_v8 = vsel %vm1229_vm11, %v7142_v60, %v1397_v10 }
 0x157   : > { %v1411_v16 = vmul.f32 0.2, %v7241_v40  ;;  %vm1231_vm13 = vcmp.gt.f32.partialorder %v7153_v37, 0.0  ;;  %v1561_v22 = vsel %vm1225_vm12, %v7129_v0, %v7150_v14  ;;  %v745_v4 = vpop.f32.mrb[37].mxu0  ;;  %v918_v21 = vpop.f32.mrb[37].mxu1  ;;  %v7253_v61 = vpack.c.bf16 %v1565_v8, %v1559_v13 }
 0x158   : > { %v1567_v62 = vsel %vm1231_vm13, %v7153_v37, %v1399_v34  ;;  %vm1222_vm14 = vcmp.gt.f32.partialorder %v7117_v1, 0.0  ;;  %vm1228_vm15 = vcmp.gt.f32.partialorder %v7136_v9, 0.0  ;;  %v747_v38 = vpop.f32.mrb[38].mxu0  ;;  %v920_v48 = vpop.f32.mrb[38].mxu1  ;;  %vm1224_vm0 = vcmp.gt.f32.partialorder %v7123_v53, 0.0 }
 0x159   : > { %8632 = vst [vmem:[#allocation33_spill] sm:$0xff] %v7253_v61  ;;  %v7258_v15 = vpack.c.bf16 %v1567_v62, %v1561_v22  ;;  %v1558_v60 = vsel %vm1222_vm14, %v7117_v1, %v7133_v25  ;;  %v1564_v0 = vsel %vm1228_vm15, %v7136_v9, %v7156_v55  ;;  %v749_v14 = vpop.f32.mrb[39].mxu0  ;;  %v922_v10 = vpop.f32.mrb[39].mxu1  ;;  %2473 = vmatprep.mubr.bf16.mxu1 %v7253_v61  ;;  %vm1230_vm1 = vcmp.gt.f32.partialorder %v7139_v12, 0.0 }
 0x15a   : > { %v7266_v37 = vpack.c.bf16 %v1564_v0, %v1558_v60  ;;  %v1560_v62 = vsel %vm1224_vm0, %v7123_v53, %v7146_v23  ;;  %v7272_v34 = vadd.f32 %v743_v5, %v6729_v19  ;;  %v1566_v1 = vsel %vm1230_vm1, %v7139_v12, %v7159_v52 }
 0x15b   : > { %8633 = vst [vmem:[#allocation34_spill] sm:$0xff] %v7258_v15  ;;  %2618 = vmatprep.mubr.bf16.mxu0 %v7258_v15  ;;  %v7278_v25 = vadd.f32 %v916_v32, %v6738_v24  ;;  %v7281_v9 = vadd.f32 %v745_v4, %v6732_v20  ;;  %v7284_v55 = vadd.f32 %v918_v21, %v6743_v33  ;;  %vm1235_vm2 = vcmp.gt.f32.partialorder %v7206_v56, 0.0 }
 0x15c   : > { %8634 = vst [vmem:[#allocation35_spill] sm:$0xff] %v7266_v37  ;;  %2474 = vmatmul.mubr.bf16.gmra.mrb[80].mxu1 %v7266_v37  ;;  %v7287_v53 = vpack.c.bf16 %v1566_v1, %v1560_v62  ;;  %v7290_v23 = vmul.f32 0.2, %v7272_v34  ;;  %v7293_v13 = vadd.f32 %v747_v38, %v6729_v19  ;;  %v7296_v12 = vadd.f32 %v920_v48, %v6738_v24 }
 0x15d   : > { %v7299_v52 = vmul.f32 0.2, %v7278_v25  ;;  %v1415_v4 = vmul.f32 0.2, %v7281_v9  ;;  %v7303_v21 = vmul.f32 0.2, %v7284_v55  ;;  %v7306_v5 = vadd.f32 %v749_v14, %v6732_v20 }
 0x15e   : > { %8635 = vst [vmem:[#allocation36_spill] sm:$0xff] %v7287_v53  ;;  %2619 = vmatmul.mubr.bf16.gmra.mrb[136].mxu0 %v7287_v53  ;;  %v7310_v32 = vmul.f32 0.2, %v7293_v13  ;;  %v7313_v8 = vmul.f32 0.2, %v7296_v12  ;;  %v7316_v22 = vadd.f32 %v922_v10, %v6743_v33  ;;  %v753_v38 = vpop.f32.mrb[40].mxu0  ;;  %v1571_v60 = vsel %vm1235_vm2, %v7206_v56, %v1403_v49 }
 0x15f   : > { %v1421_v48 = vmul.f32 0.2, %v7306_v5  ;;  %vm1241_vm3 = vcmp.gt.f32.partialorder %v7231_v17, 0.0  ;;  %vm1237_vm4 = vcmp.gt.f32.partialorder %v7209_v6, 0.0  ;;  %v926_v0 = vpop.f32.mrb[40].mxu1  ;;  %v755_v14 = vpop.f32.mrb[41].mxu0 }
 0x160   : > { %v1423_v62 = vmul.f32 0.2, %v7316_v22  ;;  %v1577_v1 = vsel %vm1241_vm3, %v7231_v17, %v1409_v42  ;;  %vm1243_vm5 = vcmp.gt.f32.partialorder %v7241_v40, 0.0  ;;  %v1573_v10 = vsel %vm1237_vm4, %v7209_v6, %v7228_v59  ;;  %v928_v53 = vpop.f32.mrb[41].mxu1  ;;  %v757_v15 = vpop.f32.mrb[42].mxu0 }
 0x161   : > { %v7328_v37 = vpack.c.bf16 %v1577_v1, %v1571_v60  ;;  %v1579_v61 = vsel %vm1243_vm5, %v7241_v40, %v1411_v16  ;;  %vm1234_vm6 = vcmp.gt.f32.partialorder %v7197_v31, 0.0  ;;  %vm1240_vm7 = vcmp.gt.f32.partialorder %v7218_v47, 0.0  ;;  %v930_v56 = vpop.f32.mrb[42].mxu1  ;;  %v759_v49 = vpop.f32.mrb[43].mxu0 }
 0x162   : > { %v7333_v28 = vpack.c.bf16 %v1579_v61, %v1573_v10  ;;  %v1570_v17 = vsel %vm1234_vm6, %v7197_v31, %v7215_v43  ;;  %v1576_v6 = vsel %vm1240_vm7, %v7218_v47, %v7235_v44  ;;  %vm1236_vm8 = vcmp.gt.f32.partialorder %v7203_v7, 0.0  ;;  %v932_v59 = vpop.f32.mrb[43].mxu1 }
 0x163   : > { %8636 = vst [vmem:[#allocation37_spill] sm:$0xff] %v7328_v37  ;;  %2481 = vmatprep.mubr.bf16.mxu1 %v7328_v37  ;;  %v7341_v40 = vpack.c.bf16 %v1576_v6, %v1570_v17  ;;  %vm1242_vm9 = vcmp.gt.f32.partialorder %v7221_v26, 0.0  ;;  %v1572_v42 = vsel %vm1236_vm8, %v7203_v7, %v7224_v30  ;;  %v7347_v61 = vadd.f32 %v753_v38, %v6729_v19 }
 0x164   : > { %8637 = vst [vmem:[#allocation38_spill] sm:$0xff] %v7333_v28  ;;  %2626 = vmatprep.mubr.bf16.mxu0 %v7333_v28  ;;  %v1578_v31 = vsel %vm1242_vm9, %v7221_v26, %v7238_v54  ;;  %v7353_v43 = vadd.f32 %v926_v0, %v6738_v24  ;;  %v7356_v47 = vadd.f32 %v755_v14, %v6732_v20  ;;  %vm1247_vm10 = vcmp.gt.f32.partialorder %v7281_v9, 0.0 }
 0x165   : > { %8638 = vst [vmem:[#allocation39_spill] sm:$0xff] %v7341_v40  ;;  %v7359_v44 = vadd.f32 %v928_v53, %v6743_v33  ;;  %2482 = vmatmul.mubr.bf16.gmra.mrb[84].mxu1 %v7341_v40  ;;  %v7362_v7 = vpack.c.bf16 %v1578_v31, %v1572_v42  ;;  %v7365_v30 = vmul.f32 0.2, %v7347_v61  ;;  %v7368_v16 = vadd.f32 %v757_v15, %v6729_v19  ;;  %v763_v1 = vpop.f32.mrb[44].mxu0 }
 0x166   : > { %v7371_v26 = vadd.f32 %v930_v56, %v6738_v24  ;;  %v7374_v54 = vmul.f32 0.2, %v7353_v43  ;;  %v1427_v38 = vmul.f32 0.2, %v7356_v47  ;;  %v7381_v60 = vadd.f32 %v759_v49, %v6732_v20  ;;  %v936_v49 = vpop.f32.mrb[44].mxu1  ;;  %v765_v17 = vpop.f32.mrb[45].mxu0 }
 0x167   : > { %8639 = vst [vmem:[#allocation40_spill] sm:$0xff] %v7362_v7  ;;  %v7378_v53 = vmul.f32 0.2, %v7359_v44  ;;  %2627 = vmatmul.mubr.bf16.gmra.mrb[140].mxu0 %v7362_v7  ;;  %v7385_v0 = vmul.f32 0.2, %v7368_v16  ;;  %v7391_v14 = vadd.f32 %v932_v59, %v6743_v33  ;;  %vm1253_vm11 = vcmp.gt.f32.partialorder %v7306_v5, 0.0 }
 0x168   : > { %v7388_v15 = vmul.f32 0.2, %v7371_v26  ;;  %v1433_v10 = vmul.f32 0.2, %v7381_v60  ;;  %v1583_v56 = vsel %vm1247_vm10, %v7281_v9, %v1415_v4  ;;  %vm1249_vm12 = vcmp.gt.f32.partialorder %v7284_v55, 0.0  ;;  %v938_v31 = vpop.f32.mrb[45].mxu1 }
 0x169   : > { %v1435_v6 = vmul.f32 0.2, %v7391_v14  ;;  %v1589_v42 = vsel %vm1253_vm11, %v7306_v5, %v1421_v48  ;;  %vm1255_vm13 = vcmp.gt.f32.partialorder %v7316_v22, 0.0  ;;  %v1585_v59 = vsel %vm1249_vm12, %v7284_v55, %v7303_v21  ;;  %v767_v7 = vpop.f32.mrb[46].mxu0  ;;  %v940_v9 = vpop.f32.mrb[46].mxu1 }
 0x16a   : > { %v7403_v28 = vpack.c.bf16 %v1589_v42, %v1583_v56  ;;  %v1591_v40 = vsel %vm1255_vm13, %v7316_v22, %v1423_v62  ;;  %vm1246_vm14 = vcmp.gt.f32.partialorder %v7272_v34, 0.0  ;;  %vm1252_vm15 = vcmp.gt.f32.partialorder %v7293_v13, 0.0  ;;  %v769_v4 = vpop.f32.mrb[47].mxu0  ;;  %v942_v21 = vpop.f32.mrb[47].mxu1 }
 0x16b   : > { %v7408_v37 = vpack.c.bf16 %v1591_v40, %v1585_v59  ;;  %v1582_v5 = vsel %vm1246_vm14, %v7272_v34, %v7290_v23  ;;  %v1588_v55 = vsel %vm1252_vm15, %v7293_v13, %v7310_v32  ;;  %vm1248_vm0 = vcmp.gt.f32.partialorder %v7278_v25, 0.0 }
 0x16c   : > { %8640 = vst [vmem:[#allocation41_spill] sm:$0xff] %v7403_v28  ;;  %2489 = vmatprep.mubr.bf16.mxu1 %v7403_v28  ;;  %v7416_v22 = vpack.c.bf16 %v1588_v55, %v1582_v5  ;;  %vm1254_vm1 = vcmp.gt.f32.partialorder %v7296_v12, 0.0  ;;  %v1584_v48 = vsel %vm1248_vm0, %v7278_v25, %v7299_v52  ;;  %v7422_v62 = vadd.f32 %v763_v1, %v6729_v19 }
 0x16d   : > { %8641 = vst [vmem:[#allocation42_spill] sm:$0xff] %v7408_v37  ;;  %2634 = vmatprep.mubr.bf16.mxu0 %v7408_v37  ;;  %v1590_v34 = vsel %vm1254_vm1, %v7296_v12, %v7313_v8  ;;  %v7428_v23 = vadd.f32 %v936_v49, %v6738_v24  ;;  %v7431_v13 = vadd.f32 %v765_v17, %v6732_v20  ;;  %v773_v8 = vpop.f32.mrb[48].mxu0  ;;  %v946_v1 = vpop.f32.mrb[48].mxu1  ;;  %vm1259_vm2 = vcmp.gt.f32.partialorder %v7356_v47, 0.0 }
 0x16e   : > { %8642 = vst [vmem:[#allocation43_spill] sm:$0xff] %v7416_v22  ;;  %v7434_v32 = vadd.f32 %v938_v31, %v6743_v33  ;;  %2490 = vmatmul.mubr.bf16.gmra.mrb[88].mxu1 %v7416_v22  ;;  %v7437_v25 = vpack.c.bf16 %v1590_v34, %v1584_v48  ;;  %v7440_v52 = vmul.f32 0.2, %v7422_v62  ;;  %v7443_v40 = vadd.f32 %v767_v7, %v6729_v19  ;;  %v948_v55 = vpop.f32.mrb[49].mxu1 }
 0x16f   : > { %v7446_v12 = vadd.f32 %v940_v9, %v6738_v24  ;;  %v7449_v56 = vmul.f32 0.2, %v7428_v23  ;;  %v7452_v49 = vmul.f32 0.2, %v7431_v13  ;;  %v7458_v42 = vadd.f32 %v769_v4, %v6732_v20  ;;  %v775_v9 = vpop.f32.mrb[49].mxu0  ;;  %v950_v37 = vpop.f32.mrb[50].mxu1 }
 0x170   : > { %8643 = vst [vmem:[#allocation44_spill] sm:$0xff] %v7437_v25  ;;  %v7455_v17 = vmul.f32 0.2, %v7434_v32  ;;  %2635 = vmatmul.mubr.bf16.gmra.mrb[144].mxu0 %v7437_v25  ;;  %v7462_v7 = vmul.f32 0.2, %v7443_v40  ;;  %v7468_v31 = vadd.f32 %v942_v21, %v6743_v33  ;;  %vm1265_vm3 = vcmp.gt.f32.partialorder %v7381_v60, 0.0 }
 0x171   : > { %v7465_v59 = vmul.f32 0.2, %v7446_v12  ;;  %v1445_v5 = vmul.f32 0.2, %v7458_v42  ;;  %v1595_v4 = vsel %vm1259_vm2, %v7356_v47, %v1427_v38  ;;  %vm1261_vm4 = vcmp.gt.f32.partialorder %v7359_v44, 0.0  ;;  %v777_v48 = vpop.f32.mrb[50].mxu0 }
 0x172   : > { %v1447_v34 = vmul.f32 0.2, %v7468_v31  ;;  %v1601_v25 = vsel %vm1265_vm3, %v7381_v60, %v1433_v10  ;;  %vm1267_vm5 = vcmp.gt.f32.partialorder %v7391_v14, 0.0  ;;  %v1597_v21 = vsel %vm1261_vm4, %v7359_v44, %v7378_v53  ;;  %v779_v22 = vpop.f32.mrb[51].mxu0  ;;  %v952_v47 = vpop.f32.mrb[51].mxu1  ;;  %v6261_v38 = vld [vmem:[#allocation3 + $0x140] sm:$0xff]  }
 0x173   : > { %v7480_v28 = vpack.c.bf16 %v1601_v25, %v1595_v4  ;;  %v1603_v29 = vsel %vm1267_vm5, %v7391_v14, %v1435_v6  ;;  %vm1258_vm6 = vcmp.gt.f32.partialorder %v7347_v61, 0.0  ;;  %vm1264_vm7 = vcmp.gt.f32.partialorder %v7368_v16, 0.0  ;;  %5677 = vmatprep.subr.bf16.mxu0 %v6261_v38 }
 0x174   : > { %v7485_v11 = vpack.c.bf16 %v1603_v29, %v1597_v21  ;;  %v1594_v60 = vsel %vm1258_vm6, %v7347_v61, %v7365_v30  ;;  %v1600_v44 = vsel %vm1264_vm7, %v7368_v16, %v7385_v0  ;;  %vm1260_vm8 = vcmp.gt.f32.partialorder %v7353_v43, 0.0 }
 0x175   : > { %8644 = vst [vmem:[#allocation45_spill] sm:$0xff] %v7480_v28  ;;  %2497 = vmatprep.mubr.bf16.mxu1 %v7480_v28  ;;  %v7493_v53 = vpack.c.bf16 %v1600_v44, %v1594_v60  ;;  %vm1266_vm9 = vcmp.gt.f32.partialorder %v7371_v26, 0.0  ;;  %v1596_v14 = vsel %vm1260_vm8, %v7353_v43, %v7374_v54  ;;  %v7499_v29 = vadd.f32 %v773_v8, %v6729_v19  ;;  %v783_v10 = vpop.f32.mrb[52].mxu0  ;;  %v956_v43 = vpop.f32.mrb[52].mxu1 }
 0x176   : > { %8645 = vst [vmem:[#allocation46_spill] sm:$0xff] %v7485_v11  ;;  %2642 = vmatprep.mubr.bf16.mxu0 %v7485_v11  ;;  %v1602_v61 = vsel %vm1266_vm9, %v7371_v26, %v7388_v15  ;;  %v7505_v30 = vadd.f32 %v946_v1, %v6738_v24  ;;  %v7508_v16 = vadd.f32 %v775_v9, %v6732_v20  ;;  %v785_v25 = vpop.f32.mrb[53].mxu0  ;;  %v958_v8 = vpop.f32.mrb[53].mxu1  ;;  %vm1271_vm10 = vcmp.gt.f32.partialorder %v7431_v13, 0.0 }
 0x177   : > { %8646 = vst [vmem:[#allocation47_spill] sm:$0xff] %v7493_v53  ;;  %v7511_v0 = vadd.f32 %v948_v55, %v6743_v33  ;;  %2498 = vmatmul.mubr.bf16.gmra.mrb[92].mxu1 %v7493_v53  ;;  %v7514_v54 = vpack.c.bf16 %v1602_v61, %v1596_v14  ;;  %v7517_v6 = vmul.f32 0.2, %v7499_v29  ;;  %v7520_v26 = vadd.f32 %v777_v48, %v6729_v19  ;;  %v787_v38 = vpop.f32.mrb[54].mxu0 }
 0x178   : > { %v7523_v15 = vadd.f32 %v950_v37, %v6738_v24  ;;  %v7526_v1 = vmul.f32 0.2, %v7505_v30  ;;  %v1451_v9 = vmul.f32 0.2, %v7508_v16  ;;  %v780_v55 = vadd.f32 %v779_v22, %v6732_v20  ;;  %v960_v22 = vpop.f32.mrb[54].mxu1  ;;  %v789_v14 = vpop.f32.mrb[55].mxu0 }
 0x179   : > { %8647 = vst [vmem:[#allocation48_spill] sm:$0xff] %v7514_v54  ;;  %v7530_v4 = vmul.f32 0.2, %v7511_v0  ;;  %2643 = vmatmul.mubr.bf16.gmra.mrb[148].mxu0 %v7514_v54  ;;  %v7535_v48 = vmul.f32 0.2, %v7520_v26  ;;  %v953_v21 = vadd.f32 %v952_v47, %v6743_v33  ;;  %vm1277_vm11 = vcmp.gt.f32.partialorder %v7458_v42, 0.0 }
 0x17a   : > { %v7538_v37 = vmul.f32 0.2, %v7523_v15  ;;  %v1457_v60 = vmul.f32 0.2, %v780_v55  ;;  %v1607_v44 = vsel %vm1271_vm10, %v7431_v13, %v7452_v49  ;;  %vm1273_vm12 = vcmp.gt.f32.partialorder %v7434_v32, 0.0  ;;  %v962_v11 = vpop.f32.mrb[55].mxu1 }
 0x17b   : > { %v1459_v61 = vmul.f32 0.2, %v953_v21  ;;  %v1613_v54 = vsel %vm1277_vm11, %v7458_v42, %v1445_v5  ;;  %vm1279_vm13 = vcmp.gt.f32.partialorder %v7468_v31, 0.0  ;;  %v1609_v47 = vsel %vm1273_vm12, %v7434_v32, %v7455_v17 }
 0x17c   : > { %v7550_v53 = vpack.c.bf16 %v1613_v54, %v1607_v44  ;;  %v1615_v28 = vsel %vm1279_vm13, %v7468_v31, %v1447_v34  ;;  %vm1270_vm14 = vcmp.gt.f32.partialorder %v7422_v62, 0.0  ;;  %vm1276_vm15 = vcmp.gt.f32.partialorder %v7443_v40, 0.0 }
 0x17d   : > { %v7555_v13 = vpack.c.bf16 %v1615_v28, %v1609_v47  ;;  %v1606_v49 = vsel %vm1270_vm14, %v7422_v62, %v7440_v52  ;;  %v1612_v42 = vsel %vm1276_vm15, %v7443_v40, %v7462_v7  ;;  %vm1272_vm0 = vcmp.gt.f32.partialorder %v7428_v23, 0.0  ;;  %v999_v31 = vpop.f32.mrb[56].mxu0 }
 0x17e   : > { %8648 = vst [vmem:[#allocation49_spill] sm:$0xff] %v7550_v53  ;;  %2505 = vmatprep.mubr.bf16.mxu1 %v7550_v53  ;;  %v7563_v32 = vpack.c.bf16 %v1612_v42, %v1606_v49  ;;  %vm1278_vm1 = vcmp.gt.f32.partialorder %v7446_v12, 0.0  ;;  %v1608_v17 = vsel %vm1272_vm0, %v7428_v23, %v7449_v56  ;;  %v7569_v28 = vadd.f32 %v783_v10, %v6729_v19  ;;  %v1001_v5 = vpop.f32.mrb[57].mxu0 }
 0x17f   : > { %2650 = vmatprep.mubr.bf16.mxu0 %v7555_v13  ;;  %v1614_v62 = vsel %vm1278_vm1, %v7446_v12, %v7465_v59  ;;  %v7575_v52 = vadd.f32 %v956_v43, %v6738_v24  ;;  %v786_v40 = vadd.f32 %v785_v25, %v6732_v20  ;;  %v7579_v7 = vadd.f32 %v958_v8, %v6743_v33  ;;  %v1003_v59 = vpop.f32.mrb[58].mxu0 }
 0x180   : > { %8649 = vst [vmem:[#allocation50_spill] sm:$0xff] %v7563_v32  ;;  %2506 = vmatmul.mubr.bf16.gmra.mrb[96].mxu1 %v7563_v32  ;;  %v7582_v23 = vpack.c.bf16 %v1614_v62, %v1608_v17  ;;  %v7585_v56 = vmul.f32 0.2, %v7569_v28  ;;  %v7588_v34 = vadd.f32 %v787_v38, %v6729_v19  ;;  %v7591_v12 = vadd.f32 %v960_v22, %v6738_v24  ;;  %v1005_v38 = vpop.f32.mrb[59].mxu0 }
 0x181   : > { %v7594_v10 = vmul.f32 0.2, %v7575_v52  ;;  %v1463_v43 = vmul.f32 0.2, %v786_v40  ;;  %v1465_v54 = vmul.f32 0.2, %v7579_v7  ;;  %v790_v25 = vadd.f32 %v789_v14, %v6732_v20 }
 0x182   : > { %2651 = vmatmul.mubr.bf16.gmra.mrb[152].mxu0 %v7582_v23  ;;  %v7600_v8 = vmul.f32 0.2, %v7588_v34  ;;  %v7603_v19 = vmul.f32 0.2, %v7591_v12  ;;  %v963_v24 = vadd.f32 %v962_v11, %v6743_v33  ;;  %vm1283_vm2 = vcmp.gt.f32.partialorder %v7508_v16, 0.0 }
 0x183   : > { %v1469_v44 = vmul.f32 0.2, %v790_v25  ;;  %vm1289_vm3 = vcmp.gt.f32.partialorder %v780_v55, 0.0  ;;  %v1619_v22 = vsel %vm1283_vm2, %v7508_v16, %v1451_v9  ;;  %vm1285_vm4 = vcmp.gt.f32.partialorder %v7511_v0, 0.0 }
 0x184   : > { %v1471_v20 = vmul.f32 0.2, %v963_v24  ;;  %v1625_v14 = vsel %vm1289_vm3, %v780_v55, %v1457_v60  ;;  %vm1291_vm5 = vcmp.gt.f32.partialorder %v953_v21, 0.0  ;;  %v1621_v47 = vsel %vm1285_vm4, %v7511_v0, %v7530_v4 }
 0x185   : > { %v7611_v49 = vpack.c.bf16 %v1625_v14, %v1619_v22  ;;  %v1627_v42 = vsel %vm1291_vm5, %v953_v21, %v1459_v61  ;;  %vm1282_vm6 = vcmp.gt.f32.partialorder %v7499_v29, 0.0  ;;  %vm1288_vm7 = vcmp.gt.f32.partialorder %v7520_v26, 0.0  ;;  %v1009_v9 = vpop.f32.mrb[60].mxu0 }
 0x186   : > { %v7615_v33 = vpack.c.bf16 %v1627_v42, %v1621_v47  ;;  %v1618_v11 = vsel %vm1282_vm6, %v7499_v29, %v7517_v6  ;;  %v1624_v16 = vsel %vm1288_vm7, %v7520_v26, %v7535_v48  ;;  %vm1284_vm8 = vcmp.gt.f32.partialorder %v7505_v30, 0.0  ;;  %v1011_v21 = vpop.f32.mrb[61].mxu0 }
 0x187   : > { %8650 = vst [vmem:[#allocation51_spill] sm:$0xff] %v7611_v49  ;;  %2513 = vmatprep.mubr.bf16.mxu1 %v7611_v49  ;;  %v7623_v0 = vpack.c.bf16 %v1624_v16, %v1618_v11  ;;  %vm1290_vm9 = vcmp.gt.f32.partialorder %v7523_v15, 0.0  ;;  %v1620_v4 = vsel %vm1284_vm8, %v7505_v30, %v7526_v1  ;;  %v1000_v55 = vadd.f32 %v999_v31, %v6745_v35  ;;  %v1013_v60 = vpop.f32.mrb[62].mxu0 }
 0x188   : > { %2658 = vmatprep.mubr.bf16.mxu0 %v7615_v33  ;;  %v1626_v29 = vsel %vm1290_vm9, %v7523_v15, %v7538_v37  ;;  %v7633_v6 = vadd.f32 %v1001_v5, %v6747_v36  ;;  %v1004_v26 = vadd.f32 %v1003_v59, %v6745_v35  ;;  %v7637_v48 = vadd.f32 %v1005_v38, %v6747_v36  ;;  %v1015_v61 = vpop.f32.mrb[63].mxu0 }
 0x189   : > { %8651 = vst [vmem:[#allocation52_spill] sm:$0xff] %v7623_v0  ;;  %2514 = vmatmul.mubr.bf16.gmra.mrb[100].mxu1 %v7623_v0  ;;  %v7640_v30 = vpack.c.bf16 %v1626_v29, %v1620_v4  ;;  %vm1142_vm10 = vcmp.gt.f32.partialorder %v1000_v55, 0.0  ;;  %v1310_v1 = vmul.f32 0.2, %v1000_v55  ;;  %vm1295_vm11 = vcmp.gt.f32.partialorder %v786_v40, 0.0 }
 0x18a   : > { %v7643_v17 = vmul.f32 0.2, %v7633_v6  ;;  %vm1148_vm12 = vcmp.gt.f32.partialorder %v1004_v26, 0.0  ;;  %v1316_v15 = vmul.f32 0.2, %v1004_v26  ;;  %vm1301_vm13 = vcmp.gt.f32.partialorder %v790_v25, 0.0 }
 0x18b   : > { %2659 = vmatmul.mubr.bf16.gmra.mrb[156].mxu0 %v7640_v30  ;;  %v7646_v37 = vsel %vm1142_vm10, %v1000_v55, %v1310_v1  ;;  %v7649_v31 = vmul.f32 0.2, %v7637_v48  ;;  %v1631_v62 = vsel %vm1295_vm11, %v786_v40, %v1463_v43  ;;  %v1637_v5 = vsel %vm1301_vm13, %v790_v25, %v1469_v44 }
 0x18c   : > { %v7651_v59 = vsel %vm1148_vm12, %v1004_v26, %v1316_v15  ;;  %v7653_v38 = vpack.c.bf16 %v1637_v5, %v1631_v62  ;;  %vm1297_vm14 = vcmp.gt.f32.partialorder %v7579_v7, 0.0  ;;  %vm1303_vm15 = vcmp.gt.f32.partialorder %v963_v24, 0.0 }
 0x18d   : > { %v1633_v14 = vsel %vm1297_vm14, %v7579_v7, %v1465_v54  ;;  %v1639_v47 = vsel %vm1303_vm15, %v963_v24, %v1471_v20  ;;  %vm1294_vm0 = vcmp.gt.f32.partialorder %v7569_v28, 0.0  ;;  %vm1300_vm1 = vcmp.gt.f32.partialorder %v7588_v34, 0.0  ;;  %v1019_v43 = vpop.f32.mrb[64].mxu0 }
 0x18e   : > { %8652 = vst [vmem:[#allocation53_spill] sm:$0xff] %v7653_v38  ;;  %2521 = vmatprep.mubr.bf16.mxu1 %v7653_v38  ;;  %v7661_v42 = vpack.c.bf16 %v1639_v47, %v1633_v14  ;;  %v1630_v40 = vsel %vm1294_vm0, %v7569_v28, %v7585_v56  ;;  %vm1296_vm2 = vcmp.gt.f32.partialorder %v7575_v52, 0.0  ;;  %v1636_v25 = vsel %vm1300_vm1, %v7588_v34, %v7600_v8  ;;  %v1021_v24 = vpop.f32.mrb[65].mxu0 }
 0x18f   : > { %vm1302_vm3 = vcmp.gt.f32.partialorder %v7591_v12, 0.0  ;;  %v1632_v7 = vsel %vm1296_vm2, %v7575_v52, %v7594_v10  ;;  %v1010_v54 = vadd.f32 %v1009_v9, %v6745_v35  ;;  %v7674_v44 = vpack.c.bf16 %v1636_v25, %v1630_v40  ;;  %v1023_v34 = vpop.f32.mrb[66].mxu0 }
 0x190   : > { %8653 = vst [vmem:[#allocation54_spill] sm:$0xff] %v7661_v42  ;;  %2666 = vmatprep.mubr.bf16.mxu0 %v7661_v42  ;;  %v1638_v28 = vsel %vm1302_vm3, %v7591_v12, %v7603_v19  ;;  %v1012_v56 = vadd.f32 %v1011_v21, %v6747_v36  ;;  %v1014_v20 = vadd.f32 %v1013_v60, %v6745_v35  ;;  %v1025_v10 = vpop.f32.mrb[67].mxu0  ;;  %v8656_v55 = vmov 0  }
 0x191   : > { %8654 = vst [vmem:[#allocation55_spill] sm:$0xff] %v7674_v44  ;;  %v7680_v8 = vpack.c.bf16 %v1638_v28, %v1632_v7  ;;  %vm1154_vm4 = vcmp.gt.f32.partialorder %v1010_v54, 0.0  ;;  %v1322_v11 = vmul.f32 0.2, %v1010_v54  ;;  %v1016_v52 = vadd.f32 %v1015_v61, %v6747_v36  ;;  %2522 = vmatmul.mubr.bf16.gmra.mrb[104].mxu1 %v7674_v44 }
 0x192   : > { %v1323_v16 = vmul.f32 0.2, %v1012_v56  ;;  %vm1160_vm5 = vcmp.gt.f32.partialorder %v1014_v20, 0.0  ;;  %v1328_v9 = vmul.f32 0.2, %v1014_v20  ;;  %v1020_v4 = vadd.f32 %v1019_v43, %v6745_v35  ;;  %2529 = vmatprep.mubr.bf16.mxu1 %v8656_v55 }
 0x193   : > { %8655 = vst [vmem:[#allocation56_spill] sm:$0xff] %v7680_v8  ;;  %2667 = vmatmul.mubr.bf16.gmra.mrb[160].mxu0 %v7680_v8  ;;  %v1490_v12 = vsel %vm1154_vm4, %v1010_v54, %v1322_v11  ;;  %v1329_v19 = vmul.f32 0.2, %v1016_v52  ;;  %v1022_v21 = vadd.f32 %v1021_v24, %v6747_v36  ;;  %v1024_v29 = vadd.f32 %v1023_v34, %v6745_v35 }
 0x194   : > { %v1496_v26 = vsel %vm1160_vm5, %v1014_v20, %v1328_v9  ;;  %2674 = vmatprep.mubr.bf16.mxu0 %v8656_v55  ;;  %v1334_v60 = vmul.f32 0.2, %v1020_v4  ;;  %v1026_v1 = vadd.f32 %v1025_v10, %v6747_v36  ;;  %vm1155_vm6 = vcmp.gt.f32.partialorder %v1012_v56, 0.0 }
 0x195   : > { %v7691_v61 = vpack.c.bf16 %v1496_v26, %v1490_v12  ;;  %v1335_v15 = vmul.f32 0.2, %v1022_v21  ;;  %v1340_v62 = vmul.f32 0.2, %v1024_v29  ;;  %vm1161_vm7 = vcmp.gt.f32.partialorder %v1016_v52, 0.0  ;;  %v1029_v40 = vpop.f32.mrb[68].mxu0 }
 0x196   : > { %v1341_v5 = vmul.f32 0.2, %v1026_v1  ;;  %v1491_v14 = vsel %vm1155_vm6, %v1012_v56, %v1323_v16  ;;  %v1497_v47 = vsel %vm1161_vm7, %v1016_v52, %v1329_v19  ;;  %vm1167_vm8 = vcmp.gt.f32.partialorder %v1022_v21, 0.0  ;;  %v1031_v7 = vpop.f32.mrb[69].mxu0 }
 0x197   : > { %v7693_v43 = vpack.c.bf16 %v1497_v47, %v1491_v14  ;;  %v1030_v25 = vadd.f32 %v1029_v40, %v6745_v35  ;;  %vm1173_vm9 = vcmp.gt.f32.partialorder %v1026_v1, 0.0  ;;  %v1503_v54 = vsel %vm1167_vm8, %v1022_v21, %v1335_v15  ;;  %v1033_v28 = vpop.f32.mrb[70].mxu0 }
 0x198   : > { %v1032_v24 = vadd.f32 %v1031_v7, %v6747_v36  ;;  %v1509_v20 = vsel %vm1173_vm9, %v1026_v1, %v1341_v5  ;;  %vm1166_vm10 = vcmp.gt.f32.partialorder %v1020_v4, 0.0  ;;  %vm1172_vm11 = vcmp.gt.f32.partialorder %v1024_v29, 0.0  ;;  %v1035_v56 = vpop.f32.mrb[71].mxu0 }
 0x199   : > { %v1346_v34 = vmul.f32 0.2, %v1030_v25  ;;  %v1034_v11 = vadd.f32 %v1033_v28, %v6745_v35  ;;  %v7698_v52 = vpack.c.bf16 %v1509_v20, %v1503_v54  ;;  %v1502_v10 = vsel %vm1166_vm10, %v1020_v4, %v1334_v60  ;;  %2530 = vmatmul.mubr.bf16.gmra.mrb[108].mxu1 %v8656_v55  ;;  %v6251_v20 = vld [vmem:[#allocation3 + $0xc8] sm:$0xff]  }
 0x19a   : > { %v1347_v16 = vmul.f32 0.2, %v1032_v24  ;;  %v1036_v9 = vadd.f32 %v1035_v56, %v6747_v36  ;;  %v1508_v12 = vsel %vm1172_vm11, %v1024_v29, %v1340_v62  ;;  %vm1179_vm12 = vcmp.gt.f32.partialorder %v1032_v24, 0.0  ;;  %2715 = vmatprep.mubr.bf16.mxu1 %v7693_v43 }
 0x19b   : > { %8657 = vst [vmem:[#allocation57_spill] sm:$0xff] %v7698_v52  ;;  %2675 = vmatmul.mubr.bf16.gmra.mrb[164].mxu0 %v8656_v55  ;;  %v1352_v19 = vmul.f32 0.2, %v1034_v11  ;;  %v7704_v21 = vpack.c.bf16 %v1508_v12, %v1502_v10  ;;  %vm1178_vm13 = vcmp.gt.f32.partialorder %v1030_v25, 0.0  ;;  %vm1184_vm14 = vcmp.gt.f32.partialorder %v1034_v11, 0.0  ;;  %v6253_v12 = vld [vmem:[#allocation3 + $0xd0] sm:$0xff]  }
 0x19c   : > { %v8659_v26 = vpack.c.bf16 %v6773_v58, %v6771_v57  ;;  %v1353_v4 = vmul.f32 0.2, %v1036_v9  ;;  %vm1185_vm15 = vcmp.gt.f32.partialorder %v1036_v9, 0.0  ;;  %v1515_v60 = vsel %vm1179_vm12, %v1032_v24, %v1347_v16  ;;  %v6250_v58 = vld [vmem:[#allocation3 + $0x80] sm:$0xff]   ;;  %v6252_v16 = vld [vmem:[#allocation3 + $0x88] sm:$0xff]  }
 0x19d   : > { %8658 = vst [vmem:[#allocation58_spill] sm:$0xff] %v7704_v21  ;;  %v1514_v1 = vsel %vm1178_vm13, %v1030_v25, %v1346_v34  ;;  %v1520_v15 = vsel %vm1184_vm14, %v1034_v11, %v1352_v19  ;;  %vm1147_vm0 = vcmp.gt.f32.partialorder %v6762_v50, 0.0  ;;  %vm1143_vm1 = vcmp.gt.f32.partialorder %v7633_v6, 0.0  ;;  %v1039_v29 = vpop.f32.mrb[72].mxu0  ;;  %v6262_v34 = vld [vmem:[#allocation3 + $0x100] sm:$0xff]  }
 0x19e   : > { %3148 = vmatprep.mubr.bf16.mxu0 %v8659_v26  ;;  %vm1149_vm2 = vcmp.gt.f32.partialorder %v7637_v48, 0.0  ;;  %v1521_v62 = vsel %vm1185_vm15, %v1036_v9, %v1353_v4  ;;  %v7712_v5 = vpack.c.bf16 %v1520_v15, %v1514_v1  ;;  %v7716_v14 = vsel %vm1147_vm0, %v6762_v50, %v6784_v3  ;;  %v1041_v40 = vpop.f32.mrb[73].mxu0  ;;  %v6264_v4 = vld [vmem:[#allocation3 + $0x108] sm:$0xff]   ;;  %v6266_v15 = vld [vmem:[#allocation3 + $0x150] sm:$0xff]  }
 0x19f   : > { %v7720_v57 = vsel %vm1143_vm1, %v7633_v6, %v7643_v17  ;;  %v1040_v47 = vadd.f32 %v1039_v29, %v6745_v35  ;;  %v7723_v25 = vpack.c.bf16 %v1521_v62, %v1515_v60  ;;  %v7729_v54 = vsel %vm1149_vm2, %v7637_v48, %v7649_v31  ;;  %v1043_v3 = vpop.f32.mrb[74].mxu0  ;;  %v6263_v48 = vld [vmem:[#allocation3 + $0x148] sm:$0xff]  }
 0x1a0   : > { %8660 = vst [vmem:[#allocation59_spill] sm:$0xff] %v7712_v5  ;;  %v1042_v50 = vadd.f32 %v1041_v40, %v6747_v36  ;;  %v1044_v24 = vadd.f32 %v1043_v3, %v6745_v35  ;;  %v1045_v28 = vpop.f32.mrb[75].mxu0  ;;  %v8662_v31 = vpack.c.bf16 %v6764_v51, %v6754_v45 }
 0x1a1   : > { %8661 = vst [vmem:[#allocation60_spill] sm:$0xff] %v7723_v25  ;;  %v1358_v17 = vmul.f32 0.2, %v1040_v47  ;;  %2716 = vmatmul.mubr.bf16.vlgmr.msra.gmra.mrb[112].mxu1 %v7691_v61  ;;  %v1046_v56 = vadd.f32 %v1045_v28, %v6747_v36  ;;  %vm1190_vm3 = vcmp.gt.f32.partialorder %v1040_v47, 0.0  ;;  %v6268_v28 = vld [vmem:[#allocation3 + $0x110] sm:$0xff]  }
 0x1a2   : > { %v1359_v11 = vmul.f32 0.2, %v1042_v50  ;;  %5578 = vmatpush3.bf16.msra.mxu1 %v6250_v58  ;;  %v1364_v10 = vmul.f32 0.2, %v1044_v24  ;;  %vm1191_vm4 = vcmp.gt.f32.partialorder %v1042_v50, 0.0  ;;  %vm1196_vm5 = vcmp.gt.f32.partialorder %v1044_v24, 0.0  ;;  %2723 = vmatprep.mubr.bf16.mxu1 %v7698_v52 }
 0x1a3   : > { %3149 = vmatmul.mubr.bf16.vlgmr.msra.gmra.mrb[168].mxu0 %v8662_v31  ;;  %v1365_v9 = vmul.f32 0.2, %v1046_v56  ;;  %vm1197_vm6 = vcmp.gt.f32.partialorder %v1046_v56, 0.0  ;;  %5579 = vmatprep.subr.bf16.mxu1 %v6251_v20  ;;  %v1526_v19 = vsel %vm1190_vm3, %v1040_v47, %v1358_v17  ;;  %v6254_v47 = vld [vmem:[#allocation3 + $0x90] sm:$0xff]   ;;  %v6256_v31 = vld [vmem:[#allocation3 + $0x98] sm:$0xff]  }
 0x1a4   : > { %3156 = vmatprep.mubr.bf16.mxu0 %v6818_v18  ;;  %v1532_v26 = vsel %vm1196_vm5, %v1044_v24, %v1364_v10  ;;  %5678 = vmatpush3.bf16.msra.mxu0 %v6262_v34  ;;  %v1527_v45 = vsel %vm1191_vm4, %v1042_v50, %v1359_v11  ;;  %v6255_v24 = vld [vmem:[#allocation3 + $0xd8] sm:$0xff]  }
 0x1a5   : > { %v1049_v60 = vpop.f32.mrb[76].mxu0  ;;  %v1533_v51 = vsel %vm1197_vm6, %v1046_v56, %v1365_v9  ;;  %v7742_v1 = vpack.c.bf16 %v1532_v26, %v1526_v19  ;;  %5679 = vmatprep.subr.bf16.mxu0 %v6263_v48  ;;  %v6269_v11 = vld [vmem:[#allocation3 + $0x158] sm:$0xff]   ;;  %v6257_v9 = vld [vmem:[#allocation3 + $0xe0] sm:$0xff]  }
 0x1a6   : > { %5580 = vmatpush3.bf16.msra.mxu1 %v6252_v16  ;;  %v1050_v18 = vadd.f32 %v1049_v60, %v6745_v35  ;;  %v1051_v29 = vpop.f32.mrb[77].mxu0  ;;  %v7745_v62 = vpack.c.bf16 %v1533_v51, %v1527_v45  ;;  %v6271_v60 = vld [vmem:[#allocation3 + $0x160] sm:$0xff]  }
 0x1a7   : > { %8663 = vst [vmem:[#allocation61_spill] sm:$0xff] %v7742_v1  ;;  %v1052_v58 = vadd.f32 %v1051_v29, %v6747_v36  ;;  %v1053_v40 = vpop.f32.mrb[78].mxu0  ;;  %5581 = vmatprep.subr.bf16.mxu1 %v6253_v12  ;;  %v6270_v12 = vld [vmem:[#allocation3 + $0x118] sm:$0xff]  }
 0x1a8   : > { %8664 = vst [vmem:[#allocation62_spill] sm:$0xff] %v7745_v62  ;;  %v1370_v3 = vmul.f32 0.2, %v1050_v18  ;;  %v1054_v17 = vadd.f32 %v1053_v40, %v6745_v35  ;;  %v1055_v50 = vpop.f32.mrb[79].mxu0  ;;  %5680 = vmatpush3.bf16.msra.mxu0 %v6264_v4  ;;  %vm1202_vm7 = vcmp.gt.f32.partialorder %v1050_v18, 0.0  ;;  %v6258_v40 = vld [vmem:[#allocation3 + $0xa0] sm:$0xff]  }
 0x1a9   : > { %2724 = vmatmul.mubr.bf16.gmra.mrb[116].mxu1 %v7704_v21  ;;  %v1371_v20 = vmul.f32 0.2, %v1052_v58  ;;  %v1056_v34 = vadd.f32 %v1055_v50, %v6747_v36  ;;  %5681 = vmatprep.subr.bf16.mxu0 %v6266_v15  ;;  %vm1203_vm8 = vcmp.gt.f32.partialorder %v1052_v58, 0.0  ;;  %v6272_v50 = vld [vmem:[#allocation3 + $0x120] sm:$0xff]  }
 0x1aa   : > { %2731 = vmatprep.mubr.bf16.mxu1 %v7723_v25  ;;  %v1376_v56 = vmul.f32 0.2, %v1054_v17  ;;  %vm1208_vm9 = vcmp.gt.f32.partialorder %v1054_v17, 0.0  ;;  %5582 = vmatpush3.bf16.msra.mxu1 %v6254_v47  ;;  %v1538_v10 = vsel %vm1202_vm7, %v1050_v18, %v1370_v3 }
 0x1ab   : > { %3157 = vmatmul.mubr.bf16.gmra.mrb[172].mxu0 %v6792_v39  ;;  %v1377_v48 = vmul.f32 0.2, %v1056_v34  ;;  %vm1209_vm10 = vcmp.gt.f32.partialorder %v1056_v34, 0.0  ;;  %5583 = vmatprep.subr.bf16.mxu1 %v6255_v24  ;;  %v1539_v26 = vsel %vm1203_vm8, %v1052_v58, %v1371_v20  ;;  %v6259_v58 = vld [vmem:[#allocation3 + $0xe8] sm:$0xff]  }
 0x1ac   : > { %3164 = vmatprep.mubr.bf16.mxu0 %v6833_v46  ;;  %v1544_v16 = vsel %vm1208_vm9, %v1054_v17, %v1376_v56  ;;  %5682 = vmatpush3.bf16.msra.mxu0 %v6268_v28  ;;  %v6273_v20 = vld [vmem:[#allocation3 + $0x168] sm:$0xff]  }
 0x1ad   : > { %v1059_v19 = vpop.f32.mrb[80].mxu0  ;;  %v1545_v39 = vsel %vm1209_vm10, %v1056_v34, %v1377_v48  ;;  %v7754_v4 = vpack.c.bf16 %v1544_v16, %v1538_v10  ;;  %5683 = vmatprep.subr.bf16.mxu0 %v6269_v11  ;;  %v6260_v56 = vld [vmem:[#allocation3 + $0xa8] sm:$0xff]   ;;  %v6265_v10 = vld [vmem:[#allocation3 + $0xf0] sm:$0xff]  }
 0x1ae   : > { %v1060_v45 = vadd.f32 %v1059_v19, %v6745_v35  ;;  %v1061_v51 = vpop.f32.mrb[81].mxu0  ;;  %v7757_v15 = vpack.c.bf16 %v1545_v39, %v1539_v26  ;;  %5584 = vmatpush3.bf16.msra.mxu1 %v6256_v31  ;;  %v6274_v16 = vld [vmem:[#allocation3 + $0x128] sm:$0xff]   ;;  %v6277_v39 = vld [vmem:[#allocation3 + $0x170] sm:$0xff]  }
 0x1af   : > { %8665 = vst [vmem:[#allocation63_spill] sm:$0xff] %v7754_v4  ;;  %v1062_v29 = vadd.f32 %v1061_v51, %v6747_v36  ;;  %v1063_v18 = vpop.f32.mrb[82].mxu0  ;;  %5585 = vmatprep.subr.bf16.mxu1 %v6257_v9 }
 0x1b0   : > { %8666 = vst [vmem:[#allocation64_spill] sm:$0xff] %v7757_v15  ;;  %v1382_v47 = vmul.f32 0.2, %v1060_v45  ;;  %v1064_v3 = vadd.f32 %v1063_v18, %v6745_v35  ;;  %v1065_v17 = vpop.f32.mrb[83].mxu0  ;;  %5684 = vmatpush3.bf16.msra.mxu0 %v6270_v12  ;;  %vm1214_vm11 = vcmp.gt.f32.partialorder %v1060_v45, 0.0 }
 0x1b1   : > { %2732 = vmatmul.mubr.bf16.gmra.mrb[120].mxu1 %v7712_v5  ;;  %v1383_v24 = vmul.f32 0.2, %v1062_v29  ;;  %v1066_v28 = vadd.f32 %v1065_v17, %v6747_v36  ;;  %5685 = vmatprep.subr.bf16.mxu0 %v6271_v60  ;;  %vm1215_vm13 = vcmp.gt.f32.partialorder %v1062_v29, 0.0 }
 0x1b2   : > { %2739 = vmatprep.mubr.bf16.mxu1 %v7745_v62  ;;  %vm1220_vm12 = vcmp.gt.f32.partialorder %v1064_v3, 0.0  ;;  %v1388_v34 = vmul.f32 0.2, %v1064_v3  ;;  %5586 = vmatpush3.bf16.msra.mxu1 %v6258_v40  ;;  %v1550_v48 = vsel %vm1214_vm11, %v1060_v45, %v1382_v47  ;;  %v6267_v47 = vld [vmem:[#allocation3 + $0xb0] sm:$0xff]  }
 0x1b3   : > { %3165 = vmatmul.mubr.bf16.gmra.mrb[176].mxu0 %v6873_v27  ;;  %vm1221_vm14 = vcmp.gt.f32.partialorder %v1066_v28, 0.0  ;;  %v1389_v11 = vmul.f32 0.2, %v1066_v28  ;;  %5587 = vmatprep.subr.bf16.mxu1 %v6259_v58  ;;  %v1551_v12 = vsel %vm1215_vm13, %v1062_v29, %v1383_v24  ;;  %v6275_v29 = vld [vmem:[#allocation3 + $0xf8] sm:$0xff]  }
 0x1b4   : > { %3172 = vmatprep.mubr.bf16.mxu0 %v6892_v2  ;;  %v1556_v31 = vsel %vm1220_vm12, %v1064_v3, %v1388_v34  ;;  %5686 = vmatpush3.bf16.msra.mxu0 %v6272_v50  ;;  %v6278_v50 = vld [vmem:[#allocation3 + $0x130] sm:$0xff]  }
 0x1b5   : > { %v1069_v9 = vpop.f32.mrb[84].mxu0  ;;  %v1557_v19 = vsel %vm1221_vm14, %v1066_v28, %v1389_v11  ;;  %v7766_v26 = vpack.c.bf16 %v1556_v31, %v1550_v48  ;;  %5687 = vmatprep.subr.bf16.mxu0 %v6273_v20  ;;  %v6279_v20 = vld [vmem:[#allocation3 + $0x178] sm:$0xff]  }
 0x1b6   : > { %v1070_v60 = vadd.f32 %v1069_v9, %v6745_v35  ;;  %v1071_v51 = vpop.f32.mrb[85].mxu0  ;;  %v7769_v18 = vpack.c.bf16 %v1557_v19, %v1551_v12  ;;  %5588 = vmatpush3.bf16.msra.mxu1 %v6260_v56  ;;  %v8669_v11 = vld [vmem:[#allocation21_spill] sm:$0xff]  ;;  %v6281_v9 = vld [vmem:[#allocation3 + $0x340] sm:$0xff]  }
 0x1b7   : > { %8667 = vst [vmem:[#allocation65_spill] sm:$0xff] %v7766_v26  ;;  %v1072_v40 = vadd.f32 %v1071_v51, %v6747_v36  ;;  %v1073_v45 = vpop.f32.mrb[86].mxu0  ;;  %5589 = vmatprep.subr.bf16.mxu1 %v6265_v10  ;;  %v6276_v48 = vld [vmem:[#allocation3 + $0xb8] sm:$0xff]  }
 0x1b8   : > { %8668 = vst [vmem:[#allocation66_spill] sm:$0xff] %v7769_v18  ;;  %v1394_v3 = vmul.f32 0.2, %v1070_v60  ;;  %v1074_v17 = vadd.f32 %v1073_v45, %v6745_v35  ;;  %v1075_v58 = vpop.f32.mrb[87].mxu0  ;;  %5688 = vmatpush3.bf16.msra.mxu0 %v6274_v16  ;;  %vm1226_vm15 = vcmp.gt.f32.partialorder %v1070_v60, 0.0  ;;  %v6280_v16 = vld [vmem:[#allocation3 + $0x138] sm:$0xff]  }
 0x1b9   : > { %2740 = vmatmul.mubr.bf16.gmra.mrb[124].mxu1 %v7742_v1  ;;  %v1395_v24 = vmul.f32 0.2, %v1072_v40  ;;  %v1076_v28 = vadd.f32 %v1075_v58, %v6747_v36  ;;  %5689 = vmatprep.subr.bf16.mxu0 %v6277_v39  ;;  %vm1227_vm0 = vcmp.gt.f32.partialorder %v1072_v40, 0.0 }
 0x1ba   : > { %2747 = vmatprep.mubr.bf16.mxu1 %v7757_v15  ;;  %vm1232_vm1 = vcmp.gt.f32.partialorder %v1074_v17, 0.0  ;;  %v1400_v34 = vmul.f32 0.2, %v1074_v17  ;;  %5590 = vmatpush3.bf16.msra.mxu1 %v6267_v47  ;;  %v1562_v31 = vsel %vm1226_vm15, %v1070_v60, %v1394_v3 }
 0x1bb   : > { %3173 = vmatmul.mubr.bf16.gmra.mrb[180].mxu0 %v6949_v63  ;;  %vm1233_vm2 = vcmp.gt.f32.partialorder %v1076_v28, 0.0  ;;  %v1401_v56 = vmul.f32 0.2, %v1076_v28  ;;  %5591 = vmatprep.subr.bf16.mxu1 %v6275_v29  ;;  %v1563_v19 = vsel %vm1227_vm0, %v1072_v40, %v1395_v24 }
 0x1bc   : > { %3180 = vmatprep.mubr.bf16.mxu0 %v8669_v11  ;;  %v1568_v10 = vsel %vm1232_vm1, %v1074_v17, %v1400_v34  ;;  %5690 = vmatpush3.bf16.msra.mxu0 %v6278_v50  ;;  %v8672_v50 = vld [vmem:[#allocation23_spill] sm:$0xff] }
 0x1bd   : > { %v1079_v12 = vpop.f32.mrb[88].mxu0  ;;  %v1569_v39 = vsel %vm1233_vm2, %v1076_v28, %v1401_v56  ;;  %v7778_v51 = vpack.c.bf16 %v1568_v10, %v1562_v31  ;;  %5691 = vmatprep.subr.bf16.mxu0 %v6279_v20  ;;  %v8673_v28 = vld [vmem:[#allocation25_spill] sm:$0xff] }
 0x1be   : > { %v1080_v45 = vadd.f32 %v1079_v12, %v6745_v35  ;;  %v1081_v58 = vpop.f32.mrb[89].mxu0  ;;  %v7781_v22 = vpack.c.bf16 %v1569_v39, %v1563_v19  ;;  %5592 = vmatpush3.bf16.msra.mxu1 %v6276_v48 }
 0x1bf   : > { %8670 = vst [vmem:[#allocation67_spill] sm:$0xff] %v7778_v51  ;;  %v1082_v47 = vadd.f32 %v1081_v58, %v6747_v36  ;;  %v1083_v6 = vpop.f32.mrb[90].mxu0  ;;  %5777 = vmatprep.subr.bf16.mxu1 %v6281_v9 }
 0x1c0   : > { %8671 = vst [vmem:[#allocation68_spill] sm:$0xff] %v7781_v22  ;;  %v1406_v60 = vmul.f32 0.2, %v1080_v45  ;;  %v1084_v3 = vadd.f32 %v1083_v6, %v6745_v35  ;;  %v1085_v17 = vpop.f32.mrb[91].mxu0  ;;  %5692 = vmatpush3.bf16.msra.mxu0 %v6280_v16  ;;  %vm1238_vm3 = vcmp.gt.f32.partialorder %v1080_v45, 0.0 }
 0x1c1   : > { %2748 = vmatmul.mubr.bf16.gmra.mrb[128].mxu1 %v7754_v4  ;;  %v1407_v40 = vmul.f32 0.2, %v1082_v47  ;;  %v1086_v29 = vadd.f32 %v1085_v17, %v6747_v36  ;;  %vm1239_vm4 = vcmp.gt.f32.partialorder %v1082_v47, 0.0 }
 0x1c2   : > { %2755 = vmatprep.mubr.bf16.mxu1 %v7769_v18  ;;  %vm1244_vm5 = vcmp.gt.f32.partialorder %v1084_v3, 0.0  ;;  %v1412_v24 = vmul.f32 0.2, %v1084_v3  ;;  %v1574_v20 = vsel %vm1238_vm3, %v1080_v45, %v1406_v60  ;;  %v8676_v60 = vld [vmem:[#allocation27_spill] sm:$0xff] }
 0x1c3   : > { %3181 = vmatmul.mubr.bf16.gmra.mrb[184].mxu0 %v8672_v50  ;;  %vm1245_vm6 = vcmp.gt.f32.partialorder %v1086_v29, 0.0  ;;  %v1413_v6 = vmul.f32 0.2, %v1086_v29  ;;  %v1575_v48 = vsel %vm1239_vm4, %v1082_v47, %v1407_v40  ;;  %v8677_v40 = vld [vmem:[#allocation29_spill] sm:$0xff] }
 0x1c4   : > { %3188 = vmatprep.mubr.bf16.mxu0 %v8673_v28  ;;  %v1580_v34 = vsel %vm1244_vm5, %v1084_v3, %v1412_v24 }
 0x1c5   : > { %v1089_v56 = vpop.f32.mrb[92].mxu0  ;;  %v1581_v31 = vsel %vm1245_vm6, %v1086_v29, %v1413_v6  ;;  %v7790_v10 = vpack.c.bf16 %v1580_v34, %v1574_v20 }
 0x1c6   : > { %v1090_v16 = vadd.f32 %v1089_v56, %v6745_v35  ;;  %v1091_v9 = vpop.f32.mrb[93].mxu0  ;;  %v7793_v12 = vpack.c.bf16 %v1581_v31, %v1575_v48 }
 0x1c7   : > { %8674 = vst [vmem:[#allocation69_spill] sm:$0xff] %v7790_v10  ;;  %v1092_v19 = vadd.f32 %v1091_v9, %v6747_v36  ;;  %v1093_v39 = vpop.f32.mrb[94].mxu0 }
 0x1c8   : > { %8675 = vst [vmem:[#allocation70_spill] sm:$0xff] %v7793_v12  ;;  %v1418_v58 = vmul.f32 0.2, %v1090_v16  ;;  %v1094_v17 = vadd.f32 %v1093_v39, %v6745_v35  ;;  %v1095_v7 = vpop.f32.mrb[95].mxu0  ;;  %vm1250_vm7 = vcmp.gt.f32.partialorder %v1090_v16, 0.0 }
 0x1c9   : > { %2756 = vmatmul.mubr.bf16.gmra.mrb[132].mxu1 %v7766_v26  ;;  %v1419_v45 = vmul.f32 0.2, %v1092_v19  ;;  %v1096_v47 = vadd.f32 %v1095_v7, %v6747_v36  ;;  %vm1251_vm8 = vcmp.gt.f32.partialorder %v1092_v19, 0.0 }
 0x1ca   : > { %2763 = vmatprep.mubr.bf16.mxu1 %v7781_v22  ;;  %vm1256_vm9 = vcmp.gt.f32.partialorder %v1094_v17, 0.0  ;;  %v1424_v3 = vmul.f32 0.2, %v1094_v17  ;;  %v1586_v24 = vsel %vm1250_vm7, %v1090_v16, %v1418_v58  ;;  %v8680_v58 = vld [vmem:[#allocation31_spill] sm:$0xff] }
 0x1cb   : > { %3189 = vmatmul.mubr.bf16.gmra.mrb[188].mxu0 %v8676_v60  ;;  %vm1257_vm10 = vcmp.gt.f32.partialorder %v1096_v47, 0.0  ;;  %v1425_v29 = vmul.f32 0.2, %v1096_v47  ;;  %v1587_v34 = vsel %vm1251_vm8, %v1092_v19, %v1419_v45  ;;  %v8681_v45 = vld [vmem:[#allocation33_spill] sm:$0xff] }
 0x1cc   : > { %3196 = vmatprep.mubr.bf16.mxu0 %v8677_v40  ;;  %v1592_v6 = vsel %vm1256_vm9, %v1094_v17, %v1424_v3 }
 0x1cd   : > { %v1099_v20 = vpop.f32.mrb[96].mxu0  ;;  %v1593_v56 = vsel %vm1257_vm10, %v1096_v47, %v1425_v29  ;;  %v7802_v48 = vpack.c.bf16 %v1592_v6, %v1586_v24 }
 0x1ce   : > { %v1100_v7 = vadd.f32 %v1099_v20, %v6745_v35  ;;  %v1101_v31 = vpop.f32.mrb[97].mxu0  ;;  %v7805_v9 = vpack.c.bf16 %v1593_v56, %v1587_v34 }
 0x1cf   : > { %8678 = vst [vmem:[#allocation71_spill] sm:$0xff] %v7802_v48  ;;  %v1102_v39 = vadd.f32 %v1101_v31, %v6747_v36  ;;  %v1103_v60 = vpop.f32.mrb[98].mxu0 }
 0x1d0   : > { %8679 = vst [vmem:[#allocation72_spill] sm:$0xff] %v7805_v9  ;;  %v1430_v28 = vmul.f32 0.2, %v1100_v7  ;;  %v1104_v40 = vadd.f32 %v1103_v60, %v6745_v35  ;;  %v1105_v50 = vpop.f32.mrb[99].mxu0  ;;  %vm1262_vm11 = vcmp.gt.f32.partialorder %v1100_v7, 0.0 }
 0x1d1   : > { %2764 = vmatmul.mubr.bf16.gmra.mrb[136].mxu1 %v7778_v51  ;;  %v1431_v16 = vmul.f32 0.2, %v1102_v39  ;;  %v1106_v19 = vadd.f32 %v1105_v50, %v6747_v36  ;;  %vm1263_vm12 = vcmp.gt.f32.partialorder %v1102_v39, 0.0 }
 0x1d2   : > { %2771 = vmatprep.mubr.bf16.mxu1 %v7793_v12  ;;  %vm1268_vm13 = vcmp.gt.f32.partialorder %v1104_v40, 0.0  ;;  %v1436_v17 = vmul.f32 0.2, %v1104_v40  ;;  %v1598_v3 = vsel %vm1262_vm11, %v1100_v7, %v1430_v28  ;;  %v8684_v7 = vld [vmem:[#allocation35_spill] sm:$0xff]  ;;  %vm4613_vm11 = vcmask 785408  }
 0x1d3   : > { %3197 = vmatmul.mubr.bf16.gmra.mrb[192].mxu0 %v8680_v58  ;;  %vm1269_vm14 = vcmp.gt.f32.partialorder %v1106_v19, 0.0  ;;  %v1437_v47 = vmul.f32 0.2, %v1106_v19  ;;  %v1599_v24 = vsel %vm1263_vm12, %v1102_v39, %v1431_v16  ;;  %v8685_v16 = vld [vmem:[#allocation37_spill] sm:$0xff] }
 0x1d4   : > { %3204 = vmatprep.mubr.bf16.mxu0 %v8681_v45  ;;  %v1604_v60 = vsel %vm1268_vm13, %v1104_v40, %v1436_v17 }
 0x1d5   : > { %v1109_v29 = vpop.f32.mrb[100].mxu0  ;;  %v1605_v6 = vsel %vm1269_vm14, %v1106_v19, %v1437_v47  ;;  %v7814_v20 = vpack.c.bf16 %v1604_v60, %v1598_v3 }
 0x1d6   : > { %v1110_v50 = vadd.f32 %v1109_v29, %v6745_v35  ;;  %v1111_v34 = vpop.f32.mrb[101].mxu0  ;;  %v7817_v56 = vpack.c.bf16 %v1605_v6, %v1599_v24 }
 0x1d7   : > { %8682 = vst [vmem:[#allocation73_spill] sm:$0xff] %v7814_v20  ;;  %v1112_v31 = vadd.f32 %v1111_v34, %v6747_v36  ;;  %v1113_v58 = vpop.f32.mrb[102].mxu0 }
 0x1d8   : > { %8683 = vst [vmem:[#allocation74_spill] sm:$0xff] %v7817_v56  ;;  %v1442_v11 = vmul.f32 0.2, %v1110_v50  ;;  %v1114_v45 = vadd.f32 %v1113_v58, %v6745_v35  ;;  %v1115_v63 = vpop.f32.mrb[103].mxu0  ;;  %vm1274_vm15 = vcmp.gt.f32.partialorder %v1110_v50, 0.0 }
 0x1d9   : > { %2772 = vmatmul.mubr.bf16.gmra.mrb[140].mxu1 %v7790_v10  ;;  %v1443_v28 = vmul.f32 0.2, %v1112_v31  ;;  %v1116_v40 = vadd.f32 %v1115_v63, %v6747_v36  ;;  %vm1275_vm0 = vcmp.gt.f32.partialorder %v1112_v31, 0.0 }
 0x1da   : > { %2779 = vmatprep.mubr.bf16.mxu1 %v7805_v9  ;;  %vm1280_vm1 = vcmp.gt.f32.partialorder %v1114_v45, 0.0  ;;  %v1448_v39 = vmul.f32 0.2, %v1114_v45  ;;  %v1610_v17 = vsel %vm1274_vm15, %v1110_v50, %v1442_v11  ;;  %v8688_v50 = vld [vmem:[#allocation39_spill] sm:$0xff] }
 0x1db   : > { %3205 = vmatmul.mubr.bf16.gmra.mrb[196].mxu0 %v8684_v7  ;;  %vm1281_vm2 = vcmp.gt.f32.partialorder %v1116_v40, 0.0  ;;  %v1449_v19 = vmul.f32 0.2, %v1116_v40  ;;  %v1611_v3 = vsel %vm1275_vm0, %v1112_v31, %v1443_v28  ;;  %v8689_v28 = vld [vmem:[#allocation41_spill] sm:$0xff] }
 0x1dc   : > { %3212 = vmatprep.mubr.bf16.mxu0 %v8685_v16  ;;  %v1616_v58 = vsel %vm1280_vm1, %v1114_v45, %v1448_v39  ;;  %v6293_v39 = vld [vmem:[#allocation3 + $0x3c0] sm:$0xff]  }
 0x1dd   : > { %v1119_v47 = vpop.f32.mrb[104].mxu0  ;;  %v1617_v60 = vsel %vm1281_vm2, %v1116_v40, %v1449_v19  ;;  %v7826_v29 = vpack.c.bf16 %v1616_v58, %v1610_v17  ;;  %5877 = vmatprep.subr.bf16.mxu0 %v6293_v39 }
 0x1de   : > { %v1120_v63 = vadd.f32 %v1119_v47, %v6745_v35  ;;  %v1121_v24 = vpop.f32.mrb[105].mxu0  ;;  %v7829_v6 = vpack.c.bf16 %v1617_v60, %v1611_v3 }
 0x1df   : > { %8686 = vst [vmem:[#allocation75_spill] sm:$0xff] %v7826_v29  ;;  %v1122_v34 = vadd.f32 %v1121_v24, %v6747_v36  ;;  %v1123_v7 = vpop.f32.mrb[106].mxu0 }
 0x1e0   : > { %8687 = vst [vmem:[#allocation76_spill] sm:$0xff] %v7829_v6  ;;  %v1454_v2 = vmul.f32 0.2, %v1120_v63  ;;  %v1124_v16 = vadd.f32 %v1123_v7, %v6745_v35  ;;  %v1125_v27 = vpop.f32.mrb[107].mxu0  ;;  %vm1286_vm3 = vcmp.gt.f32.partialorder %v1120_v63, 0.0 }
 0x1e1   : > { %2780 = vmatmul.mubr.bf16.gmra.mrb[144].mxu1 %v7802_v48  ;;  %v1455_v11 = vmul.f32 0.2, %v1122_v34  ;;  %v1126_v45 = vadd.f32 %v1125_v27, %v6747_v36  ;;  %vm1287_vm4 = vcmp.gt.f32.partialorder %v1122_v34, 0.0 }
 0x1e2   : > { %2787 = vmatprep.mubr.bf16.mxu1 %v7817_v56  ;;  %vm1292_vm5 = vcmp.gt.f32.partialorder %v1124_v16, 0.0  ;;  %v1460_v31 = vmul.f32 0.2, %v1124_v16  ;;  %v1622_v7 = vsel %vm1286_vm3, %v1120_v63, %v1454_v2  ;;  %v8692_v63 = vld [vmem:[#allocation43_spill] sm:$0xff] }
 0x1e3   : > { %3213 = vmatmul.mubr.bf16.gmra.mrb[200].mxu0 %v8688_v50  ;;  %vm1293_vm6 = vcmp.gt.f32.partialorder %v1126_v45, 0.0  ;;  %v1461_v40 = vmul.f32 0.2, %v1126_v45  ;;  %v1623_v58 = vsel %vm1287_vm4, %v1122_v34, %v1455_v11  ;;  %v8693_v11 = vld [vmem:[#allocation45_spill] sm:$0xff] }
 0x1e4   : > { %3220 = vmatprep.mubr.bf16.mxu0 %v8689_v28  ;;  %v1628_v19 = vsel %vm1292_vm5, %v1124_v16, %v1460_v31 }
 0x1e5   : > { %v1129_v17 = vpop.f32.mrb[108].mxu0  ;;  %v1629_v47 = vsel %vm1293_vm6, %v1126_v45, %v1461_v40  ;;  %v7838_v3 = vpack.c.bf16 %v1628_v19, %v1622_v7 }
 0x1e6   : > { %v1130_v27 = vadd.f32 %v1129_v17, %v6745_v35  ;;  %v1131_v60 = vpop.f32.mrb[109].mxu0  ;;  %v7841_v24 = vpack.c.bf16 %v1629_v47, %v1623_v58 }
 0x1e7   : > { %8690 = vst [vmem:[#allocation77_spill] sm:$0xff] %v7838_v3  ;;  %v1132_v50 = vadd.f32 %v1131_v60, %v6747_v36  ;;  %v1133_v46 = vpop.f32.mrb[110].mxu0 }
 0x1e8   : > { %8691 = vst [vmem:[#allocation78_spill] sm:$0xff] %v7841_v24  ;;  %v1466_v28 = vmul.f32 0.2, %v1130_v27  ;;  %v1134_v8 = vadd.f32 %v1133_v46, %v6745_v35  ;;  %v1135_v42 = vpop.f32.mrb[111].mxu0  ;;  %vm1298_vm7 = vcmp.gt.f32.partialorder %v1130_v27, 0.0 }
 0x1e9   : > { %2788 = vmatmul.mubr.bf16.gmra.mrb[148].mxu1 %v7814_v20  ;;  %v1467_v2 = vmul.f32 0.2, %v1132_v50  ;;  %v1136_v16 = vadd.f32 %v1135_v42, %v6747_v36  ;;  %vm1299_vm8 = vcmp.gt.f32.partialorder %v1132_v50, 0.0  ;;  %v8696_v36 = vld [vmem:[#allocation47_spill] sm:$0xff] }
 0x1ea   : > { %2795 = vmatprep.mubr.bf16.mxu1 %v7829_v6  ;;  %vm1304_vm9 = vcmp.gt.f32.partialorder %v1134_v8, 0.0  ;;  %v1472_v34 = vmul.f32 0.2, %v1134_v8  ;;  %v1634_v31 = vsel %vm1298_vm7, %v1130_v27, %v1466_v28 }
 0x1eb   : > { %3221 = vmatmul.mubr.bf16.gmra.mrb[204].mxu0 %v8692_v63  ;;  %vm1305_vm10 = vcmp.gt.f32.partialorder %v1136_v16, 0.0  ;;  %v1473_v45 = vmul.f32 0.2, %v1136_v16  ;;  %v1635_v46 = vsel %vm1299_vm8, %v1132_v50, %v1467_v2 }
 0x1ec   : > { %3228 = vmatprep.mubr.bf16.mxu0 %v8693_v11  ;;  %v1640_v35 = vsel %vm1304_vm9, %v1134_v8, %v1472_v34  ;;  %v8721_v11 = vld [vmem:[#allocation42_spill] sm:$0xff] }
 0x1ed   : > { %v1641_v40 = vsel %vm1305_vm10, %v1136_v16, %v1473_v45  ;;  %v7850_v39 = vpack.c.bf16 %v1640_v35, %v1634_v31 }
 0x1ee   : > { %v7852_v7 = vpack.c.bf16 %v1641_v40, %v1635_v46 }
 0x1ef   : > { %8694 = vst [vmem:[#allocation43_spill] sm:$0xff] %v7850_v39 }
 0x1f0   : > { %8695 = vst [vmem:[#allocation79_spill] sm:$0xff] %v7852_v7 }
 0x1f1   : > { %2796 = vmatmul.mubr.bf16.gmra.mrb[152].mxu1 %v7826_v29 }
 0x1f2   : > { %2803 = vmatprep.mubr.bf16.mxu1 %v7841_v24 }
 0x1f3   : > { %3229 = vmatmul.mubr.bf16.gmra.mrb[208].mxu0 %v8696_v36 }
 0x1f4   : > { %3236 = vmatprep.mubr.bf16.mxu0 %v7550_v53 }
 0x1f7   : > { %v5193_v42 = vpop.f32.mrb[56].mxu1 }
 0x1f8   : > { %v5194_v19 = vpop.f32.mrb[57].mxu1 }
 0x1f9   : > { %2804 = vmatmul.mubr.bf16.gmra.mrb[156].mxu1 %v7838_v3  ;;  %v5195_v50 = vadd.f32 %v5194_v19, %v5193_v42  ;;  %v5196_v28 = vpop.f32.mrb[58].mxu1 }
 0x1fa   : > { %2811 = vmatprep.mubr.bf16.mxu1 %v7852_v7  ;;  %v5293_v8 = vpop.f32.mrb[112].mxu0  ;;  %v5197_v58 = vpop.f32.mrb[59].mxu1 }
 0x1fb   : > { %3237 = vmatmul.mubr.bf16.gmra.mrb[212].mxu0 %v7563_v32  ;;  %v5294_v17 = vpop.f32.mrb[113].mxu0  ;;  %v5198_v60 = vadd.f32 %v5197_v58, %v5196_v28 }
 0x1fc   : > { %3244 = vmatprep.mubr.bf16.mxu0 %v7611_v49  ;;  %v5295_v47 = vadd.f32 %v5294_v17, %v5293_v8  ;;  %v5296_v27 = vpop.f32.mrb[114].mxu0 }
 0x1fd   : > { %v5297_v2 = vpop.f32.mrb[115].mxu0 }
 0x1fe   : > { %v7862_v16 = vadd.f32 %v5295_v47, %v5195_v50  ;;  %v5298_v34 = vadd.f32 %v5297_v2, %v5296_v27  ;;  %v8697_v2 = vpack.c.bf16 %v7716_v14, %v7166_v41  ;;  %v6283_v14 = vld [vmem:[#allocation3 + $0x348] sm:$0xff]  }
 0x200   : > { %v7864_v45 = vadd.f32 %v5298_v34, %v5198_v60  ;;  %v5199_v31 = vpop.f32.mrb[60].mxu1 }
 0x201   : > { %2812 = vmatmul.mubr.bf16.gmra.mrb[160].mxu1 %v7850_v39  ;;  %v5200_v35 = vpop.f32.mrb[61].mxu1 }
 0x202   : > { %2819 = vmatprep.mubr.bf16.mxu1 %v8656_v55  ;;  %v5201_v46 = vadd.f32 %v5200_v35, %v5199_v31  ;;  %v5202_v40 = vpop.f32.mrb[62].mxu1  ;;  %v8698_v31 = vpack.c.bf16 %v7729_v54, %v7720_v57 }
 0x203   : > { %3245 = vmatmul.mubr.bf16.gmra.mrb[216].mxu0 %v7623_v0  ;;  %v5299_v42 = vpop.f32.mrb[116].mxu0  ;;  %v5203_v19 = vpop.f32.mrb[63].mxu1  ;;  %v8709_v0 = vld [vmem:[#allocation22_spill] sm:$0xff] }
 0x204   : > { %3252 = vmatprep.mubr.bf16.mxu0 %v7653_v38  ;;  %v5300_v8 = vpop.f32.mrb[117].mxu0  ;;  %v5204_v50 = vadd.f32 %v5203_v19, %v5202_v40  ;;  %v8700_v38 = vld [vmem:[#allocation9_spill] sm:$0xff] }
 0x205   : > { %v5301_v28 = vadd.f32 %v5300_v8, %v5299_v42  ;;  %v5302_v17 = vpop.f32.mrb[118].mxu0 }
 0x206   : > { %v5303_v58 = vpop.f32.mrb[119].mxu0 }
 0x207   : > { %v7870_v47 = vadd.f32 %v5301_v28, %v5201_v46  ;;  %v5304_v27 = vadd.f32 %v5303_v58, %v5302_v17 }
 0x209   : > { %2820 = vmatmul.mubr.bf16.gmra.mrb[164].mxu1 %v8656_v55  ;;  %v7873_v60 = vadd.f32 %v5304_v27, %v5204_v50  ;;  %v6282_v55 = vld [vmem:[#allocation3 + $0x300] sm:$0xff]  }
 0x20a   : > { %3293 = vmatprep.mubr.bf16.mxu1 %v8697_v2  ;;  %v6294_v2 = vld [vmem:[#allocation3 + $0x380] sm:$0xff]  }
 0x20b   : > { %3253 = vmatmul.mubr.bf16.gmra.mrb[220].mxu0 %v7674_v44  ;;  %v5205_v34 = vpop.f32.mrb[64].mxu1  ;;  %v8699_v44 = vld [vmem:[#allocation10_spill] sm:$0xff] }
 0x20c   : > { %3438 = vmatprep.mubr.bf16.mxu0 %v8698_v31  ;;  %v5305_v35 = vpop.f32.mrb[120].mxu0  ;;  %v5206_v40 = vpop.f32.mrb[65].mxu1  ;;  %v8701_v57 = vpack.c.bf16 %v8699_v44, %v8700_v38  ;;  %v8702_v31 = vpack.c.bf16 %v7651_v59, %v7646_v37  ;;  %v6296_v38 = vld [vmem:[#allocation3 + $0x388] sm:$0xff]  }
 0x20d   : > { %v5207_v46 = vadd.f32 %v5206_v40, %v5205_v34  ;;  %v5306_v42 = vpop.f32.mrb[121].mxu0  ;;  %v5208_v19 = vpop.f32.mrb[66].mxu1  ;;  %v6295_v34 = vld [vmem:[#allocation3 + $0x3c8] sm:$0xff]  }
 0x20e   : > { %v5307_v8 = vadd.f32 %v5306_v42, %v5305_v35  ;;  %v5308_v28 = vpop.f32.mrb[122].mxu0  ;;  %v5209_v50 = vpop.f32.mrb[67].mxu1  ;;  %v8703_v35 = vld [vmem:[#allocation12_spill] sm:$0xff] }
 0x20f   : > { %v5210_v17 = vadd.f32 %v5209_v50, %v5208_v19  ;;  %v5309_v58 = vpop.f32.mrb[123].mxu0 }
 0x210   : > { %v7882_v27 = vadd.f32 %v5307_v8, %v5207_v46  ;;  %v5310_v41 = vadd.f32 %v5309_v58, %v5308_v28  ;;  %v6284_v46 = vld [vmem:[#allocation3 + $0x308] sm:$0xff]   ;;  %v6285_v8 = vld [vmem:[#allocation3 + $0x350] sm:$0xff]  }
 0x211   : > { %3294 = vmatmul.mubr.bf16.vlgmr.msra.gmra.mrb[168].mxu1 %v8701_v57 }
 0x212   : > { %v7887_v54 = vadd.f32 %v5310_v41, %v5210_v17  ;;  %3301 = vmatprep.mubr.bf16.mxu1 %v8703_v35  ;;  %5778 = vmatpush3.bf16.msra.mxu1 %v6282_v55  ;;  %v6298_v17 = vld [vmem:[#allocation3 + $0x3d0] sm:$0xff]   ;;  %v8704_v35 = vld [vmem:[#allocation11_spill] sm:$0xff] }
 0x213   : > { %3439 = vmatmul.mubr.bf16.vlgmr.msra.gmra.mrb[224].mxu0 %v8702_v31  ;;  %5779 = vmatprep.subr.bf16.mxu1 %v6283_v14  ;;  %v6286_v55 = vld [vmem:[#allocation3 + $0x310] sm:$0xff]   ;;  %v6287_v14 = vld [vmem:[#allocation3 + $0x358] sm:$0xff]  }
 0x214   : > { %3446 = vmatprep.mubr.bf16.mxu0 %v7693_v43  ;;  %v5211_v40 = vpop.f32.mrb[68].mxu1  ;;  %v5311_v42 = vpop.f32.mrb[124].mxu0  ;;  %5878 = vmatpush3.bf16.msra.mxu0 %v6294_v2  ;;  %v6300_v2 = vld [vmem:[#allocation3 + $0x390] sm:$0xff]  }
 0x215   : > { %v5212_v19 = vpop.f32.mrb[69].mxu1  ;;  %v5312_v28 = vpop.f32.mrb[125].mxu0  ;;  %5879 = vmatprep.subr.bf16.mxu0 %v6295_v34  ;;  %v8705_v34 = vld [vmem:[#allocation14_spill] sm:$0xff] }
 0x216   : > { %v5213_v44 = vadd.f32 %v5212_v19, %v5211_v40  ;;  %v5214_v50 = vpop.f32.mrb[70].mxu1  ;;  %v5313_v37 = vadd.f32 %v5312_v28, %v5311_v42  ;;  %v5314_v59 = vpop.f32.mrb[126].mxu0  ;;  %5780 = vmatpush3.bf16.msra.mxu1 %v6284_v46  ;;  %v6301_v40 = vld [vmem:[#allocation3 + $0x3d8] sm:$0xff]  }
 0x217   : > { %v5215_v58 = vpop.f32.mrb[71].mxu1  ;;  %v5315_v57 = vpop.f32.mrb[127].mxu0  ;;  %5781 = vmatprep.subr.bf16.mxu1 %v6285_v8  ;;  %v6288_v46 = vld [vmem:[#allocation3 + $0x318] sm:$0xff]   ;;  %v6289_v8 = vld [vmem:[#allocation3 + $0x360] sm:$0xff]  }
 0x218   : > { %v5216_v41 = vadd.f32 %v5215_v58, %v5214_v50  ;;  %v7894_v43 = vadd.f32 %v5313_v37, %v5213_v44  ;;  %v5316_v31 = vadd.f32 %v5315_v57, %v5314_v59  ;;  %5880 = vmatpush3.bf16.msra.mxu0 %v6296_v38  ;;  %v6302_v38 = vld [vmem:[#allocation3 + $0x398] sm:$0xff]   ;;  %v6303_v50 = vld [vmem:[#allocation3 + $0x3e0] sm:$0xff]  }
 0x219   : > { %3302 = vmatmul.mubr.bf16.gmra.mrb[172].mxu1 %v8704_v35  ;;  %5881 = vmatprep.subr.bf16.mxu0 %v6298_v17  ;;  %v6290_v57 = vld [vmem:[#allocation3 + $0x320] sm:$0xff]   ;;  %v6291_v35 = vld [vmem:[#allocation3 + $0x368] sm:$0xff]  }
 0x21a   : > { %3309 = vmatprep.mubr.bf16.mxu1 %v8705_v34  ;;  %v7899_v42 = vadd.f32 %v5316_v31, %v5216_v41  ;;  %5782 = vmatpush3.bf16.msra.mxu1 %v6286_v55 }
 0x21b   : > { %3447 = vmatmul.mubr.bf16.gmra.mrb[228].mxu0 %v7691_v61  ;;  %5783 = vmatprep.subr.bf16.mxu1 %v6287_v14  ;;  %v6304_v14 = vld [vmem:[#allocation3 + $0x3a0] sm:$0xff]  }
 0x21c   : > { %3454 = vmatprep.mubr.bf16.mxu0 %v7698_v52  ;;  %5882 = vmatpush3.bf16.msra.mxu0 %v6300_v2  ;;  %v8706_v2 = vld [vmem:[#allocation16_spill] sm:$0xff] }
 0x21d   : > { %v5217_v19 = vpop.f32.mrb[72].mxu1  ;;  %5883 = vmatprep.subr.bf16.mxu0 %v6301_v40 }
 0x21e   : > { %v5317_v44 = vpop.f32.mrb[128].mxu0  ;;  %v5218_v28 = vpop.f32.mrb[73].mxu1  ;;  %5784 = vmatpush3.bf16.msra.mxu1 %v6288_v46 }
 0x21f   : > { %v5219_v17 = vadd.f32 %v5218_v28, %v5217_v19  ;;  %v5318_v37 = vpop.f32.mrb[129].mxu0  ;;  %v5220_v61 = vpop.f32.mrb[74].mxu1  ;;  %5785 = vmatprep.subr.bf16.mxu1 %v6289_v8  ;;  %v6305_v19 = vld [vmem:[#allocation3 + $0x3e8] sm:$0xff]  }
 0x220   : > { %v5319_v59 = vadd.f32 %v5318_v37, %v5317_v44  ;;  %v5320_v58 = vpop.f32.mrb[130].mxu0  ;;  %v5221_v41 = vpop.f32.mrb[75].mxu1  ;;  %5884 = vmatpush3.bf16.msra.mxu0 %v6302_v38  ;;  %v8707_v44 = vld [vmem:[#allocation18_spill] sm:$0xff]  ;;  %v6292_v8 = vld [vmem:[#allocation3 + $0x328] sm:$0xff]   ;;  %v6297_v38 = vld [vmem:[#allocation3 + $0x370] sm:$0xff]  }
 0x221   : > { %v5222_v31 = vadd.f32 %v5221_v41, %v5220_v61  ;;  %v5321_v55 = vpop.f32.mrb[131].mxu0  ;;  %3310 = vmatmul.mubr.bf16.gmra.mrb[176].mxu1 %v8706_v2  ;;  %5885 = vmatprep.subr.bf16.mxu0 %v6303_v50  ;;  %v6306_v28 = vld [vmem:[#allocation3 + $0x3a8] sm:$0xff]   ;;  %v6299_v41 = vld [vmem:[#allocation3 + $0x330] sm:$0xff]  }
 0x222   : > { %v7903_v52 = vadd.f32 %v5319_v59, %v5219_v17  ;;  %v5322_v40 = vadd.f32 %v5321_v55, %v5320_v58  ;;  %3317 = vmatprep.mubr.bf16.mxu1 %v8707_v44  ;;  %5786 = vmatpush3.bf16.msra.mxu1 %v6290_v57  ;;  %v6309_v17 = vld [vmem:[#allocation3 + $0x3f0] sm:$0xff]  }
 0x223   : > { %3455 = vmatmul.mubr.bf16.gmra.mrb[232].mxu0 %v7704_v21  ;;  %5787 = vmatprep.subr.bf16.mxu1 %v6291_v35  ;;  %v6310_v57 = vld [vmem:[#allocation3 + $0x3b0] sm:$0xff]  }
 0x224   : > { %3462 = vmatprep.mubr.bf16.mxu0 %v7723_v25  ;;  %v7908_v46 = vadd.f32 %v5322_v40, %v5222_v31  ;;  %5886 = vmatpush3.bf16.msra.mxu0 %v6304_v14  ;;  %v6307_v31 = vld [vmem:[#allocation3 + $0x378] sm:$0xff]   ;;  %v8708_v40 = vld [vmem:[#allocation20_spill] sm:$0xff] }
 0x225   : > { %5887 = vmatprep.subr.bf16.mxu0 %v6305_v19  ;;  %v6311_v19 = vld [vmem:[#allocation3 + $0x3f8] sm:$0xff]  }
 0x226   : > { %v5223_v37 = vpop.f32.mrb[76].mxu1  ;;  %5788 = vmatpush3.bf16.msra.mxu1 %v6292_v8 }
 0x227   : > { %v5224_v61 = vpop.f32.mrb[77].mxu1  ;;  %5789 = vmatprep.subr.bf16.mxu1 %v6297_v38 }
 0x228   : > { %v5323_v50 = vpop.f32.mrb[132].mxu0  ;;  %v5225_v59 = vadd.f32 %v5224_v61, %v5223_v37  ;;  %v5226_v58 = vpop.f32.mrb[78].mxu1  ;;  %5888 = vmatpush3.bf16.msra.mxu0 %v6306_v28  ;;  %v6308_v28 = vld [vmem:[#allocation3 + $0x338] sm:$0xff]  }
 0x229   : > { %v5324_v55 = vpop.f32.mrb[133].mxu0  ;;  %v5227_v21 = vpop.f32.mrb[79].mxu1  ;;  %3318 = vmatmul.mubr.bf16.gmra.mrb[180].mxu1 %v8708_v40  ;;  %5889 = vmatprep.subr.bf16.mxu0 %v6309_v17  ;;  %v6312_v61 = vld [vmem:[#allocation3 + $0x3b8] sm:$0xff]  }
 0x22a   : > { %v5325_v35 = vadd.f32 %v5324_v55, %v5323_v50  ;;  %v5326_v14 = vpop.f32.mrb[134].mxu0  ;;  %v5228_v25 = vadd.f32 %v5227_v21, %v5226_v58  ;;  %3325 = vmatprep.mubr.bf16.mxu1 %v8709_v0  ;;  %5790 = vmatpush3.bf16.msra.mxu1 %v6299_v41  ;;  %v6313_v50 = vld [vmem:[#allocation3 + $0x440] sm:$0xff]  }
 0x22b   : > { %3463 = vmatmul.mubr.bf16.gmra.mrb[236].mxu0 %v7712_v5  ;;  %v5327_v37 = vpop.f32.mrb[135].mxu0  ;;  %5791 = vmatprep.subr.bf16.mxu1 %v6307_v31  ;;  %v8711_v31 = vld [vmem:[#allocation26_spill] sm:$0xff] }
 0x22c   : > { %3470 = vmatprep.mubr.bf16.mxu0 %v7745_v62  ;;  %v7914_v8 = vadd.f32 %v5325_v35, %v5225_v59  ;;  %v5328_v38 = vadd.f32 %v5327_v37, %v5326_v14  ;;  %5890 = vmatpush3.bf16.msra.mxu0 %v6310_v57  ;;  %v8710_v59 = vld [vmem:[#allocation24_spill] sm:$0xff] }
 0x22d   : > { %5891 = vmatprep.subr.bf16.mxu0 %v6311_v19 }
 0x22e   : > { %v7916_v55 = vadd.f32 %v5328_v38, %v5228_v25  ;;  %5792 = vmatpush3.bf16.msra.mxu1 %v6308_v28 }
 0x22f   : > { %v5229_v21 = vpop.f32.mrb[80].mxu1  ;;  %5977 = vmatprep.subr.bf16.mxu1 %v6313_v50 }
 0x230   : > { %v5230_v17 = vpop.f32.mrb[81].mxu1  ;;  %5892 = vmatpush3.bf16.msra.mxu0 %v6312_v61 }
 0x231   : > { %v5329_v58 = vpop.f32.mrb[136].mxu0  ;;  %v5231_v5 = vadd.f32 %v5230_v17, %v5229_v21  ;;  %v5232_v49 = vpop.f32.mrb[82].mxu1  ;;  %3326 = vmatmul.mubr.bf16.gmra.mrb[184].mxu1 %v8710_v59  ;;  %v8712_v21 = vld [vmem:[#allocation28_spill] sm:$0xff] }
 0x232   : > { %v5330_v35 = vpop.f32.mrb[137].mxu0  ;;  %v5233_v41 = vpop.f32.mrb[83].mxu1  ;;  %3333 = vmatprep.mubr.bf16.mxu1 %v8711_v31 }
 0x233   : > { %3471 = vmatmul.mubr.bf16.gmra.mrb[240].mxu0 %v7742_v1  ;;  %v5331_v57 = vadd.f32 %v5330_v35, %v5329_v58  ;;  %v5332_v25 = vpop.f32.mrb[138].mxu0  ;;  %v5234_v14 = vadd.f32 %v5233_v41, %v5232_v49  ;;  %v8713_v58 = vld [vmem:[#allocation30_spill] sm:$0xff] }
 0x234   : > { %3478 = vmatprep.mubr.bf16.mxu0 %v7757_v15  ;;  %v5333_v19 = vpop.f32.mrb[139].mxu0 }
 0x235   : > { %v7922_v37 = vadd.f32 %v5331_v57, %v5231_v5  ;;  %v5334_v38 = vadd.f32 %v5333_v19, %v5332_v25 }
 0x237   : > { %v7924_v28 = vadd.f32 %v5334_v38, %v5234_v14 }
 0x238   : > { %v5235_v61 = vpop.f32.mrb[84].mxu1 }
 0x239   : > { %v5236_v50 = vpop.f32.mrb[85].mxu1  ;;  %3334 = vmatmul.mubr.bf16.gmra.mrb[188].mxu1 %v8712_v21 }
 0x23a   : > { %v5335_v17 = vpop.f32.mrb[140].mxu0  ;;  %v5237_v62 = vadd.f32 %v5236_v50, %v5235_v61  ;;  %v5238_v1 = vpop.f32.mrb[86].mxu1  ;;  %3341 = vmatprep.mubr.bf16.mxu1 %v8713_v58  ;;  %v8714_v61 = vld [vmem:[#allocation32_spill] sm:$0xff] }
 0x23b   : > { %3479 = vmatmul.mubr.bf16.gmra.mrb[244].mxu0 %v7754_v4  ;;  %v5336_v49 = vpop.f32.mrb[141].mxu0  ;;  %v5239_v35 = vpop.f32.mrb[87].mxu1  ;;  %v8715_v4 = vld [vmem:[#allocation34_spill] sm:$0xff] }
 0x23c   : > { %3486 = vmatprep.mubr.bf16.mxu0 %v7769_v18  ;;  %v5337_v5 = vadd.f32 %v5336_v49, %v5335_v17  ;;  %v5338_v41 = vpop.f32.mrb[142].mxu0  ;;  %v5240_v57 = vadd.f32 %v5239_v35, %v5238_v1 }
 0x23d   : > { %v5339_v25 = vpop.f32.mrb[143].mxu0 }
 0x23e   : > { %v7930_v14 = vadd.f32 %v5337_v5, %v5237_v62  ;;  %v5340_v19 = vadd.f32 %v5339_v25, %v5338_v41 }
 0x240   : > { %v7932_v38 = vadd.f32 %v5340_v19, %v5240_v57  ;;  %v8716_v19 = vld [vmem:[#allocation36_spill] sm:$0xff] }
 0x241   : > { %v5241_v15 = vpop.f32.mrb[88].mxu1  ;;  %3342 = vmatmul.mubr.bf16.gmra.mrb[192].mxu1 %v8714_v61 }
 0x242   : > { %v5242_v50 = vpop.f32.mrb[89].mxu1  ;;  %3349 = vmatprep.mubr.bf16.mxu1 %v8715_v4 }
 0x243   : > { %3487 = vmatmul.mubr.bf16.gmra.mrb[248].mxu0 %v7766_v26  ;;  %v5341_v32 = vpop.f32.mrb[144].mxu0  ;;  %v5243_v53 = vadd.f32 %v5242_v50, %v5241_v15  ;;  %v5244_v18 = vpop.f32.mrb[90].mxu1  ;;  %v8717_v15 = vld [vmem:[#allocation38_spill] sm:$0xff] }
 0x244   : > { %3494 = vmatprep.mubr.bf16.mxu0 %v7781_v22  ;;  %v5342_v1 = vpop.f32.mrb[145].mxu0  ;;  %v5245_v17 = vpop.f32.mrb[91].mxu1 }
 0x245   : > { %v5343_v62 = vadd.f32 %v5342_v1, %v5341_v32  ;;  %v5344_v49 = vpop.f32.mrb[146].mxu0  ;;  %v5246_v35 = vadd.f32 %v5245_v17, %v5244_v18 }
 0x246   : > { %v5345_v5 = vpop.f32.mrb[147].mxu0 }
 0x247   : > { %v7938_v41 = vadd.f32 %v5343_v62, %v5243_v53  ;;  %v5346_v57 = vadd.f32 %v5345_v5, %v5344_v49 }
 0x249   : > { %v7940_v25 = vadd.f32 %v5346_v57, %v5246_v35  ;;  %3350 = vmatmul.mubr.bf16.gmra.mrb[196].mxu1 %v8716_v19 }
 0x24a   : > { %v5247_v26 = vpop.f32.mrb[92].mxu1  ;;  %3357 = vmatprep.mubr.bf16.mxu1 %v8717_v15 }
 0x24b   : > { %3495 = vmatmul.mubr.bf16.gmra.mrb[252].mxu0 %v7778_v51  ;;  %v5248_v50 = vpop.f32.mrb[93].mxu1  ;;  %v8720_v51 = vld [vmem:[#allocation40_spill] sm:$0xff] }
 0x24c   : > { %3502 = vmatprep.mubr.bf16.mxu0 %v7793_v12  ;;  %v5347_v22 = vpop.f32.mrb[148].mxu0  ;;  %v5249_v32 = vadd.f32 %v5248_v50, %v5247_v26  ;;  %v5250_v1 = vpop.f32.mrb[94].mxu1 }
 0x24d   : > { %v5348_v18 = vpop.f32.mrb[149].mxu0  ;;  %v5251_v17 = vpop.f32.mrb[95].mxu1 }
 0x24e   : > { %v5349_v53 = vadd.f32 %v5348_v18, %v5347_v22  ;;  %v5350_v62 = vpop.f32.mrb[150].mxu0  ;;  %v5252_v49 = vadd.f32 %v5251_v17, %v5250_v1 }
 0x24f   : > { %v5351_v35 = vpop.f32.mrb[151].mxu0 }
 0x250   : > { %v7946_v5 = vadd.f32 %v5349_v53, %v5249_v32  ;;  %v5352_v57 = vadd.f32 %v5351_v35, %v5350_v62 }
 0x251   : > { %3358 = vmatmul.mubr.bf16.gmra.mrb[200].mxu1 %v8720_v51 }
 0x252   : > { %8718 = vst [vmem:[#allocation10_spill] sm:$0xff] %v7946_v5  ;;  %v7948_v36 = vadd.f32 %v5352_v57, %v5252_v49  ;;  %3365 = vmatprep.mubr.bf16.mxu1 %v8721_v11 }
 0x253   : > { %3503 = vmatmul.mubr.bf16.gmra.mrb[0].mxu0 %v7790_v10  ;;  %v5253_v12 = vpop.f32.mrb[96].mxu1 }
 0x254   : > { %8719 = vst [vmem:[#allocation9_spill] sm:$0xff] %v7948_v36  ;;  %3510 = vmatprep.mubr.bf16.mxu0 %v7805_v9  ;;  %v5254_v26 = vpop.f32.mrb[97].mxu1  ;;  %v8723_v36 = vld [vmem:[#allocation44_spill] sm:$0xff]  ;;  %v8724_v9 = vld [vmem:[#allocation46_spill] sm:$0xff] }
 0x255   : > { %v5353_v50 = vpop.f32.mrb[152].mxu0  ;;  %v5255_v22 = vadd.f32 %v5254_v26, %v5253_v12  ;;  %v5256_v18 = vpop.f32.mrb[98].mxu1 }
 0x256   : > { %v5354_v1 = vpop.f32.mrb[153].mxu0  ;;  %v5257_v17 = vpop.f32.mrb[99].mxu1 }
 0x257   : > { %v5355_v32 = vadd.f32 %v5354_v1, %v5353_v50  ;;  %v5356_v53 = vpop.f32.mrb[154].mxu0  ;;  %v5258_v62 = vadd.f32 %v5257_v17, %v5256_v18 }
 0x258   : > { %v5357_v49 = vpop.f32.mrb[155].mxu0 }
 0x259   : > { %v7954_v35 = vadd.f32 %v5355_v32, %v5255_v22  ;;  %v5358_v57 = vadd.f32 %v5357_v49, %v5356_v53  ;;  %3366 = vmatmul.mubr.bf16.gmra.mrb[204].mxu1 %v8723_v36 }
 0x25a   : > { %3373 = vmatprep.mubr.bf16.mxu1 %v8724_v9 }
 0x25b   : > { %8722 = vst [vmem:[#allocation12_spill] sm:$0xff] %v7954_v35  ;;  %v7957_v10 = vadd.f32 %v5358_v57, %v5258_v62  ;;  %3511 = vmatmul.mubr.bf16.gmra.mrb[4].mxu0 %v7802_v48  ;;  %v8726_v57 = vld [vmem:[#allocation48_spill] sm:$0xff] }
 0x25c   : > { %3518 = vmatprep.mubr.bf16.mxu0 %v7817_v56  ;;  %v5259_v12 = vpop.f32.mrb[100].mxu1 }
 0x25d   : > { %v5260_v26 = vpop.f32.mrb[101].mxu1 }
 0x25e   : > { %v5359_v5 = vpop.f32.mrb[156].mxu0  ;;  %v5261_v50 = vadd.f32 %v5260_v26, %v5259_v12  ;;  %v5262_v1 = vpop.f32.mrb[102].mxu1 }
 0x25f   : > { %v5360_v18 = vpop.f32.mrb[157].mxu0  ;;  %v5263_v17 = vpop.f32.mrb[103].mxu1 }
 0x260   : > { %v5361_v22 = vadd.f32 %v5360_v18, %v5359_v5  ;;  %v5362_v32 = vpop.f32.mrb[158].mxu0  ;;  %v5264_v53 = vadd.f32 %v5263_v17, %v5262_v1 }
 0x261   : > { %v5363_v49 = vpop.f32.mrb[159].mxu0  ;;  %3374 = vmatmul.mubr.bf16.gmra.mrb[208].mxu1 %v8726_v57 }
 0x262   : > { %v7962_v35 = vadd.f32 %v5361_v22, %v5261_v50  ;;  %v5364_v62 = vadd.f32 %v5363_v49, %v5362_v32  ;;  %3381 = vmatprep.mubr.bf16.mxu1 %v7555_v13 }
 0x263   : > { %3519 = vmatmul.mubr.bf16.gmra.mrb[8].mxu0 %v7814_v20 }
 0x264   : > { %8725 = vst [vmem:[#allocation11_spill] sm:$0xff] %v7962_v35  ;;  %v7967_v56 = vadd.f32 %v5364_v62, %v5264_v53  ;;  %3526 = vmatprep.mubr.bf16.mxu0 %v7829_v6  ;;  %v5265_v12 = vpop.f32.mrb[104].mxu1 }
 0x265   : > { %v5266_v48 = vpop.f32.mrb[105].mxu1 }
 0x266   : > { %v5365_v26 = vpop.f32.mrb[160].mxu0  ;;  %v5267_v5 = vadd.f32 %v5266_v48, %v5265_v12  ;;  %v5268_v1 = vpop.f32.mrb[106].mxu1 }
 0x267   : > { %v5366_v18 = vpop.f32.mrb[161].mxu0  ;;  %v5269_v22 = vpop.f32.mrb[107].mxu1 }
 0x268   : > { %v5367_v17 = vadd.f32 %v5366_v18, %v5365_v26  ;;  %v5368_v50 = vpop.f32.mrb[162].mxu0  ;;  %v5270_v32 = vadd.f32 %v5269_v22, %v5268_v1 }
 0x269   : > { %v5369_v49 = vpop.f32.mrb[163].mxu0  ;;  %3382 = vmatmul.mubr.bf16.gmra.mrb[212].mxu1 %v7582_v23 }
 0x26a   : > { %v7970_v35 = vadd.f32 %v5367_v17, %v5267_v5  ;;  %v5370_v20 = vadd.f32 %v5369_v49, %v5368_v50  ;;  %3389 = vmatprep.mubr.bf16.mxu1 %v7615_v33 }
 0x26b   : > { %3527 = vmatmul.mubr.bf16.gmra.mrb[12].mxu0 %v7826_v29 }
 0x26c   : > { %v7975_v53 = vadd.f32 %v5370_v20, %v5270_v32  ;;  %3534 = vmatprep.mubr.bf16.mxu0 %v7841_v24  ;;  %v5271_v48 = vpop.f32.mrb[108].mxu1  ;;  %v8729_v20 = vld [vmem:[#allocation54_spill] sm:$0xff] }
 0x26d   : > { %v5272_v12 = vpop.f32.mrb[109].mxu1 }
 0x26e   : > { %8727 = vst [vmem:[#allocation14_spill] sm:$0xff] %v7975_v53  ;;  %v5371_v62 = vpop.f32.mrb[164].mxu0  ;;  %v5273_v26 = vadd.f32 %v5272_v12, %v5271_v48  ;;  %v5274_v1 = vpop.f32.mrb[110].mxu1  ;;  %v8730_v53 = vld [vmem:[#allocation56_spill] sm:$0xff] }
 0x26f   : > { %v5372_v18 = vpop.f32.mrb[165].mxu0  ;;  %v5275_v17 = vpop.f32.mrb[111].mxu1 }
 0x270   : > { %v5373_v22 = vadd.f32 %v5372_v18, %v5371_v62  ;;  %v5374_v5 = vpop.f32.mrb[166].mxu0  ;;  %v5276_v50 = vadd.f32 %v5275_v17, %v5274_v1 }
 0x271   : > { %v5375_v49 = vpop.f32.mrb[167].mxu0  ;;  %3390 = vmatmul.mubr.bf16.gmra.mrb[216].mxu1 %v7640_v30 }
 0x272   : > { %v7978_v6 = vadd.f32 %v5373_v22, %v5273_v26  ;;  %v5376_v29 = vadd.f32 %v5375_v49, %v5374_v5  ;;  %3397 = vmatprep.mubr.bf16.mxu1 %v8729_v20 }
 0x273   : > { %3535 = vmatmul.mubr.bf16.gmra.mrb[16].mxu0 %v7838_v3 }
 0x274   : > { %8728 = vst [vmem:[#allocation16_spill] sm:$0xff] %v7978_v6  ;;  %v7983_v32 = vadd.f32 %v5376_v29, %v5276_v50  ;;  %3542 = vmatprep.mubr.bf16.mxu0 %v7852_v7  ;;  %v5393_v48 = vpop.f32.mrb[112].mxu1  ;;  %v8732_v7 = vld [vmem:[#allocation13_spill] sm:$0xff] }
 0x275   : > { %v5394_v62 = vpop.f32.mrb[113].mxu1 }
 0x276   : > { %v5493_v12 = vpop.f32.mrb[168].mxu0  ;;  %v5395_v18 = vadd.f32 %v5394_v62, %v5393_v48  ;;  %v5396_v1 = vpop.f32.mrb[114].mxu1 }
 0x277   : > { %v5494_v24 = vpop.f32.mrb[169].mxu0  ;;  %v5397_v22 = vpop.f32.mrb[115].mxu1 }
 0x278   : > { %v5495_v17 = vadd.f32 %v5494_v24, %v5493_v12  ;;  %v5496_v26 = vpop.f32.mrb[170].mxu0  ;;  %v2718_v5 = vadd.f32 %v5395_v18, %v7862_v16  ;;  %v5398_v49 = vadd.f32 %v5397_v22, %v5396_v1  ;;  %v6314_v22 = vld [vmem:[#allocation3 + $0x400] sm:$0xff]  }
 0x279   : > { %v5497_v6 = vpop.f32.mrb[171].mxu0  ;;  %3398 = vmatmul.mubr.bf16.gmra.mrb[220].mxu1 %v8730_v53 }
 0x27a   : > { %v5498_v3 = vadd.f32 %v5497_v6, %v5496_v26  ;;  %v7988_v29 = vadd.f32 %v5495_v17, %v2718_v5  ;;  %v2721_v50 = vadd.f32 %v5398_v49, %v7864_v45  ;;  %4052 = vmatprep.mubr.bf16.mxu1 %v8732_v7 }
 0x27b   : > { %3543 = vmatmul.mubr.bf16.gmra.mrb[20].mxu0 %v7850_v39  ;;  %v6315_v39 = vld [vmem:[#allocation3 + $0x448] sm:$0xff]  }
 0x27c   : > { %8731 = vst [vmem:[#allocation18_spill] sm:$0xff] %v7988_v29  ;;  %4197 = vmatprep.mubr.bf16.mxu0 %v8705_v34  ;;  %v7994_v24 = vadd.f32 %v5498_v3, %v2721_v50  ;;  %v5399_v48 = vpop.f32.mrb[116].mxu1  ;;  %v8733_v29 = vld [vmem:[#allocation15_spill] sm:$0xff]  ;;  %v8734_v50 = vld [vmem:[#allocation17_spill] sm:$0xff] }
 0x27d   : > { %v5400_v16 = vpop.f32.mrb[117].mxu1 }
 0x27e   : > { %v5499_v12 = vpop.f32.mrb[172].mxu0  ;;  %v5401_v62 = vadd.f32 %v5400_v16, %v5399_v48  ;;  %v5402_v6 = vpop.f32.mrb[118].mxu1  ;;  %v6316_v48 = vld [vmem:[#allocation3 + $0x408] sm:$0xff]   ;;  %v6317_v16 = vld [vmem:[#allocation3 + $0x450] sm:$0xff]  }
 0x27f   : > { %v5500_v18 = vpop.f32.mrb[173].mxu0  ;;  %v5403_v17 = vpop.f32.mrb[119].mxu1 }
 0x280   : > { %v5501_v1 = vadd.f32 %v5500_v18, %v5499_v12  ;;  %v5502_v26 = vpop.f32.mrb[174].mxu0  ;;  %v2726_v45 = vadd.f32 %v5401_v62, %v7870_v47  ;;  %v5404_v5 = vadd.f32 %v5403_v17, %v5402_v6 }
 0x281   : > { %v5503_v49 = vpop.f32.mrb[175].mxu0  ;;  %4053 = vmatmul.mubr.bf16.vlgmr.msra.gmra.mrb[224].mxu1 %v8733_v29 }
 0x282   : > { %v5504_v7 = vadd.f32 %v5503_v49, %v5502_v26  ;;  %v7998_v3 = vadd.f32 %v5501_v1, %v2726_v45  ;;  %v2729_v34 = vadd.f32 %v5404_v5, %v7873_v60  ;;  %4060 = vmatprep.mubr.bf16.mxu1 %v8734_v50  ;;  %5978 = vmatpush3.bf16.msra.mxu1 %v6314_v22  ;;  %v6319_v5 = vld [vmem:[#allocation3 + $0x458] sm:$0xff]  }
 0x283   : > { %4198 = vmatmul.mubr.bf16.vlgmr.msra.gmra.mrb[24].mxu0 %v8706_v2  ;;  %5979 = vmatprep.subr.bf16.mxu1 %v6315_v39  ;;  %v6318_v2 = vld [vmem:[#allocation3 + $0x410] sm:$0xff]   ;;  %v8736_v50 = vld [vmem:[#allocation21_spill] sm:$0xff] }
 0x284   : > { %4205 = vmatprep.mubr.bf16.mxu0 %v8707_v44  ;;  %v8004_v12 = vadd.f32 %v5504_v7, %v2729_v34  ;;  %v5405_v47 = vpop.f32.mrb[120].mxu1  ;;  %v8735_v7 = vld [vmem:[#allocation19_spill] sm:$0xff] }
 0x285   : > { %v5406_v18 = vpop.f32.mrb[121].mxu1 }
 0x286   : > { %v5505_v62 = vpop.f32.mrb[176].mxu0  ;;  %v5407_v29 = vadd.f32 %v5406_v18, %v5405_v47  ;;  %v5408_v1 = vpop.f32.mrb[122].mxu1  ;;  %5980 = vmatpush3.bf16.msra.mxu1 %v6316_v48  ;;  %v6320_v48 = vld [vmem:[#allocation3 + $0x418] sm:$0xff]  }
 0x287   : > { %v5506_v6 = vpop.f32.mrb[177].mxu0  ;;  %v5409_v17 = vpop.f32.mrb[123].mxu1  ;;  %5981 = vmatprep.subr.bf16.mxu1 %v6317_v16  ;;  %v6321_v16 = vld [vmem:[#allocation3 + $0x460] sm:$0xff]  }
 0x288   : > { %v5507_v26 = vadd.f32 %v5506_v6, %v5505_v62  ;;  %v5508_v60 = vpop.f32.mrb[178].mxu0  ;;  %v2734_v45 = vadd.f32 %v5407_v29, %v7882_v27  ;;  %v5410_v44 = vadd.f32 %v5409_v17, %v5408_v1 }
 0x289   : > { %v5509_v22 = vpop.f32.mrb[179].mxu0  ;;  %4061 = vmatmul.mubr.bf16.gmra.mrb[228].mxu1 %v8735_v7  ;;  %v8738_v7 = vld [vmem:[#allocation25_spill] sm:$0xff] }
 0x28a   : > { %v5510_v49 = vadd.f32 %v5509_v22, %v5508_v60  ;;  %v8008_v39 = vadd.f32 %v5507_v26, %v2734_v45  ;;  %v2737_v34 = vadd.f32 %v5410_v44, %v7887_v54  ;;  %4068 = vmatprep.mubr.bf16.mxu1 %v8736_v50  ;;  %5982 = vmatpush3.bf16.msra.mxu1 %v6318_v2  ;;  %v6323_v45 = vld [vmem:[#allocation3 + $0x468] sm:$0xff]  }
 0x28b   : > { %4206 = vmatmul.mubr.bf16.gmra.mrb[28].mxu0 %v8708_v40  ;;  %5983 = vmatprep.subr.bf16.mxu1 %v6319_v5  ;;  %v6322_v40 = vld [vmem:[#allocation3 + $0x420] sm:$0xff]   ;;  %v8737_v22 = vld [vmem:[#allocation23_spill] sm:$0xff] }
 0x28c   : > { %4213 = vmatprep.mubr.bf16.mxu0 %v8709_v0  ;;  %v8014_v27 = vadd.f32 %v5510_v49, %v2737_v34  ;;  %v5411_v47 = vpop.f32.mrb[124].mxu1  ;;  %v6324_v34 = vld [vmem:[#allocation3 + $0x428] sm:$0xff]  }
 0x28d   : > { %v5412_v18 = vpop.f32.mrb[125].mxu1 }
 0x28e   : > { %v5511_v62 = vpop.f32.mrb[180].mxu0  ;;  %v5413_v29 = vadd.f32 %v5412_v18, %v5411_v47  ;;  %v5414_v1 = vpop.f32.mrb[126].mxu1  ;;  %5984 = vmatpush3.bf16.msra.mxu1 %v6320_v48  ;;  %v6325_v48 = vld [vmem:[#allocation3 + $0x470] sm:$0xff]  }
 0x28f   : > { %v5512_v6 = vpop.f32.mrb[181].mxu0  ;;  %v5415_v60 = vpop.f32.mrb[127].mxu1  ;;  %5985 = vmatprep.subr.bf16.mxu1 %v6321_v16 }
 0x290   : > { %v5513_v26 = vadd.f32 %v5512_v6, %v5511_v62  ;;  %v5514_v54 = vpop.f32.mrb[182].mxu0  ;;  %v2742_v17 = vadd.f32 %v5413_v29, %v7894_v43  ;;  %v5416_v0 = vadd.f32 %v5415_v60, %v5414_v1  ;;  %v6327_v60 = vld [vmem:[#allocation3 + $0x478] sm:$0xff]  }
 0x291   : > { %v5515_v2 = vpop.f32.mrb[183].mxu0  ;;  %4069 = vmatmul.mubr.bf16.gmra.mrb[232].mxu1 %v8737_v22 }
 0x292   : > { %v5516_v44 = vadd.f32 %v5515_v2, %v5514_v54  ;;  %v8018_v5 = vadd.f32 %v5513_v26, %v2742_v17  ;;  %v2745_v49 = vadd.f32 %v5416_v0, %v7899_v42  ;;  %4076 = vmatprep.mubr.bf16.mxu1 %v8738_v7  ;;  %5986 = vmatpush3.bf16.msra.mxu1 %v6322_v40  ;;  %v8739_v17 = vld [vmem:[#allocation27_spill] sm:$0xff] }
 0x293   : > { %4214 = vmatmul.mubr.bf16.gmra.mrb[32].mxu0 %v8710_v59  ;;  %5987 = vmatprep.subr.bf16.mxu1 %v6323_v45  ;;  %v6326_v59 = vld [vmem:[#allocation3 + $0x430] sm:$0xff]   ;;  %v8740_v45 = vld [vmem:[#allocation29_spill] sm:$0xff] }
 0x294   : > { %4221 = vmatprep.mubr.bf16.mxu0 %v8711_v31  ;;  %v8024_v43 = vadd.f32 %v5516_v44, %v2745_v49  ;;  %v5417_v50 = vpop.f32.mrb[128].mxu1  ;;  %v6328_v44 = vld [vmem:[#allocation3 + $0x438] sm:$0xff]  }
 0x295   : > { %v5418_v16 = vpop.f32.mrb[129].mxu1 }
 0x296   : > { %v5517_v47 = vpop.f32.mrb[184].mxu0  ;;  %v5419_v62 = vadd.f32 %v5418_v16, %v5417_v50  ;;  %v5420_v29 = vpop.f32.mrb[130].mxu1  ;;  %5988 = vmatpush3.bf16.msra.mxu1 %v6324_v34 }
 0x297   : > { %v5518_v18 = vpop.f32.mrb[185].mxu0  ;;  %v5421_v1 = vpop.f32.mrb[131].mxu1  ;;  %5989 = vmatprep.subr.bf16.mxu1 %v6325_v48 }
 0x298   : > { %v5519_v6 = vadd.f32 %v5518_v18, %v5517_v47  ;;  %v5520_v42 = vpop.f32.mrb[186].mxu0  ;;  %v2750_v26 = vadd.f32 %v5419_v62, %v7903_v52  ;;  %v5422_v31 = vadd.f32 %v5421_v1, %v5420_v29  ;;  %v8741_v29 = vld [vmem:[#allocation31_spill] sm:$0xff]  ;;  %v8742_v1 = vld [vmem:[#allocation33_spill] sm:$0xff] }
 0x299   : > { %v5521_v54 = vpop.f32.mrb[187].mxu0  ;;  %4077 = vmatmul.mubr.bf16.gmra.mrb[236].mxu1 %v8739_v17 }
 0x29a   : > { %v5522_v40 = vadd.f32 %v5521_v54, %v5520_v42  ;;  %v8028_v0 = vadd.f32 %v5519_v6, %v2750_v26  ;;  %v2753_v2 = vadd.f32 %v5422_v31, %v7908_v46  ;;  %4084 = vmatprep.mubr.bf16.mxu1 %v8740_v45  ;;  %5990 = vmatpush3.bf16.msra.mxu1 %v6326_v59 }
 0x29b   : > { %4222 = vmatmul.mubr.bf16.gmra.mrb[36].mxu0 %v8712_v21  ;;  %5991 = vmatprep.subr.bf16.mxu1 %v6327_v60 }
 0x29c   : > { %4229 = vmatprep.mubr.bf16.mxu0 %v8713_v58  ;;  %v8034_v52 = vadd.f32 %v5522_v40, %v2753_v2  ;;  %v5423_v22 = vpop.f32.mrb[132].mxu1 }
 0x29d   : > { %v5424_v7 = vpop.f32.mrb[133].mxu1 }
 0x29e   : > { %v5523_v49 = vpop.f32.mrb[188].mxu0  ;;  %v5425_v34 = vadd.f32 %v5424_v7, %v5423_v22  ;;  %v5426_v48 = vpop.f32.mrb[134].mxu1  ;;  %5992 = vmatpush3.bf16.msra.mxu1 %v6328_v44 }
 0x29f   : > { %v5524_v50 = vpop.f32.mrb[189].mxu0  ;;  %v5427_v46 = vpop.f32.mrb[135].mxu1 }
 0x2a0   : > { %v5525_v47 = vadd.f32 %v5524_v50, %v5523_v49  ;;  %v5526_v16 = vpop.f32.mrb[190].mxu0  ;;  %v2758_v21 = vadd.f32 %v5425_v34, %v7914_v8  ;;  %v5428_v62 = vadd.f32 %v5427_v46, %v5426_v48  ;;  %v8743_v49 = vld [vmem:[#allocation35_spill] sm:$0xff]  ;;  %v8744_v34 = vld [vmem:[#allocation37_spill] sm:$0xff] }
 0x2a1   : > { %v5527_v18 = vpop.f32.mrb[191].mxu0  ;;  %4085 = vmatmul.mubr.bf16.gmra.mrb[240].mxu1 %v8741_v29 }
 0x2a2   : > { %v5528_v58 = vadd.f32 %v5527_v18, %v5526_v16  ;;  %v8038_v6 = vadd.f32 %v5525_v47, %v2758_v21  ;;  %v2761_v42 = vadd.f32 %v5428_v62, %v7916_v55  ;;  %4092 = vmatprep.mubr.bf16.mxu1 %v8742_v1  ;;  %v8745_v1 = vld [vmem:[#allocation39_spill] sm:$0xff] }
 0x2a3   : > { %4230 = vmatmul.mubr.bf16.gmra.mrb[40].mxu0 %v8714_v61 }
 0x2a4   : > { %4237 = vmatprep.mubr.bf16.mxu0 %v8715_v4  ;;  %v8044_v59 = vadd.f32 %v5528_v58, %v2761_v42  ;;  %v5429_v26 = vpop.f32.mrb[136].mxu1 }
 0x2a5   : > { %v5430_v8 = vpop.f32.mrb[137].mxu1 }
 0x2a6   : > { %v5529_v31 = vpop.f32.mrb[192].mxu0  ;;  %v5431_v54 = vadd.f32 %v5430_v8, %v5429_v26  ;;  %v5432_v40 = vpop.f32.mrb[138].mxu1 }
 0x2a7   : > { %v5530_v60 = vpop.f32.mrb[193].mxu0  ;;  %v5433_v45 = vpop.f32.mrb[139].mxu1 }
 0x2a8   : > { %v5531_v17 = vadd.f32 %v5530_v60, %v5529_v31  ;;  %v5532_v2 = vpop.f32.mrb[194].mxu0  ;;  %v2766_v44 = vadd.f32 %v5431_v54, %v7922_v37  ;;  %v5434_v55 = vadd.f32 %v5433_v45, %v5432_v40  ;;  %v8746_v31 = vld [vmem:[#allocation41_spill] sm:$0xff] }
 0x2a9   : > { %v5533_v22 = vpop.f32.mrb[195].mxu0  ;;  %4093 = vmatmul.mubr.bf16.gmra.mrb[244].mxu1 %v8743_v49 }
 0x2aa   : > { %v5534_v61 = vadd.f32 %v5533_v22, %v5532_v2  ;;  %v8048_v7 = vadd.f32 %v5531_v17, %v2766_v44  ;;  %v2769_v4 = vadd.f32 %v5434_v55, %v7924_v28  ;;  %4100 = vmatprep.mubr.bf16.mxu1 %v8744_v34 }
 0x2ab   : > { %4238 = vmatmul.mubr.bf16.gmra.mrb[44].mxu0 %v8716_v19 }
 0x2ac   : > { %4245 = vmatprep.mubr.bf16.mxu0 %v8717_v15  ;;  %v8054_v50 = vadd.f32 %v5534_v61, %v2769_v4  ;;  %v5435_v48 = vpop.f32.mrb[140].mxu1  ;;  %v8747_v4 = vld [vmem:[#allocation45_spill] sm:$0xff] }
 0x2ad   : > { %v5436_v37 = vpop.f32.mrb[141].mxu1 }
 0x2ae   : > { %v5535_v47 = vpop.f32.mrb[196].mxu0  ;;  %v5437_v16 = vadd.f32 %v5436_v37, %v5435_v48  ;;  %v5438_v21 = vpop.f32.mrb[142].mxu1 }
 0x2af   : > { %v5536_v46 = vpop.f32.mrb[197].mxu0  ;;  %v5439_v58 = vpop.f32.mrb[143].mxu1 }
 0x2b0   : > { %v5537_v62 = vadd.f32 %v5536_v46, %v5535_v47  ;;  %v5538_v18 = vpop.f32.mrb[198].mxu0  ;;  %v2774_v29 = vadd.f32 %v5437_v16, %v7930_v14  ;;  %v5440_v28 = vadd.f32 %v5439_v58, %v5438_v21 }
 0x2b1   : > { %v5539_v42 = vpop.f32.mrb[199].mxu0  ;;  %4101 = vmatmul.mubr.bf16.gmra.mrb[248].mxu1 %v8745_v1  ;;  %v8751_v1 = vld [vmem:[#allocation49_spill] sm:$0xff] }
 0x2b2   : > { %v5540_v19 = vadd.f32 %v5539_v42, %v5538_v18  ;;  %v8058_v26 = vadd.f32 %v5537_v62, %v2774_v29  ;;  %v2777_v15 = vadd.f32 %v5440_v28, %v7932_v38  ;;  %4108 = vmatprep.mubr.bf16.mxu1 %v8746_v31  ;;  %v8748_v18 = vld [vmem:[#allocation10_spill] sm:$0xff]  ;;  %v8749_v28 = vld [vmem:[#allocation47_spill] sm:$0xff] }
 0x2b3   : > { %4246 = vmatmul.mubr.bf16.gmra.mrb[48].mxu0 %v8720_v51 }
 0x2b4   : > { %4253 = vmatprep.mubr.bf16.mxu0 %v8721_v11  ;;  %v8064_v8 = vadd.f32 %v5540_v19, %v2777_v15  ;;  %v5441_v54 = vpop.f32.mrb[144].mxu1 }
 0x2b5   : > { %v5442_v14 = vpop.f32.mrb[145].mxu1 }
 0x2b6   : > { %v5541_v60 = vpop.f32.mrb[200].mxu0  ;;  %v5443_v40 = vadd.f32 %v5442_v14, %v5441_v54  ;;  %v5444_v2 = vpop.f32.mrb[146].mxu1 }
 0x2b7   : > { %v5542_v17 = vpop.f32.mrb[201].mxu0  ;;  %v5445_v55 = vpop.f32.mrb[147].mxu1 }
 0x2b8   : > { %v5543_v45 = vadd.f32 %v5542_v17, %v5541_v60  ;;  %v5544_v44 = vpop.f32.mrb[202].mxu0  ;;  %v2782_v22 = vadd.f32 %v5443_v40, %v7938_v41  ;;  %v5446_v38 = vadd.f32 %v5445_v55, %v5444_v2  ;;  %v8752_v55 = vld [vmem:[#allocation12_spill] sm:$0xff] }
 0x2b9   : > { %v5545_v61 = vpop.f32.mrb[203].mxu0  ;;  %4109 = vmatmul.mubr.bf16.gmra.mrb[252].mxu1 %v8692_v63 }
 0x2ba   : > { %v5546_v51 = vadd.f32 %v5545_v61, %v5544_v44  ;;  %v8068_v49 = vadd.f32 %v5543_v45, %v2782_v22  ;;  %v2785_v11 = vadd.f32 %v5446_v38, %v7940_v25  ;;  %4116 = vmatprep.mubr.bf16.mxu1 %v8747_v4  ;;  %v8754_v4 = vld [vmem:[#allocation51_spill] sm:$0xff] }
 0x2bb   : > { %4254 = vmatmul.mubr.bf16.gmra.mrb[52].mxu0 %v8723_v36 }
 0x2bc   : > { %4261 = vmatprep.mubr.bf16.mxu0 %v8724_v9  ;;  %v8074_v34 = vadd.f32 %v5546_v51, %v2785_v11  ;;  %v5447_v48 = vpop.f32.mrb[148].mxu1  ;;  %v8750_v9 = vld [vmem:[#allocation9_spill] sm:$0xff]  ;;  %v8753_v51 = vld [vmem:[#allocation50_spill] sm:$0xff] }
 0x2bd   : > { %v5448_v41 = vpop.f32.mrb[149].mxu1 }
 0x2be   : > { %v5547_v47 = vpop.f32.mrb[204].mxu0  ;;  %v5449_v37 = vadd.f32 %v5448_v41, %v5447_v48  ;;  %v5450_v46 = vpop.f32.mrb[150].mxu1 }
 0x2bf   : > { %v5548_v16 = vpop.f32.mrb[205].mxu0  ;;  %v5451_v62 = vpop.f32.mrb[151].mxu1 }
 0x2c0   : > { %v5549_v21 = vadd.f32 %v5548_v16, %v5547_v47  ;;  %v5550_v63 = vpop.f32.mrb[206].mxu0  ;;  %v2790_v58 = vadd.f32 %v5449_v37, %v8748_v18  ;;  %v5452_v25 = vadd.f32 %v5451_v62, %v5450_v46 }
 0x2c1   : > { %v5551_v29 = vpop.f32.mrb[207].mxu0  ;;  %4117 = vmatmul.mubr.bf16.gmra.mrb[0].mxu1 %v8749_v28 }
 0x2c2   : > { %v5552_v36 = vadd.f32 %v5551_v29, %v5550_v63  ;;  %v8078_v42 = vadd.f32 %v5549_v21, %v2790_v58  ;;  %v2793_v19 = vadd.f32 %v5452_v25, %v8750_v9  ;;  %4124 = vmatprep.mubr.bf16.mxu1 %v8751_v1  ;;  %v8755_v58 = vld [vmem:[#allocation11_spill] sm:$0xff]  ;;  %v8757_v9 = vld [vmem:[#allocation53_spill] sm:$0xff] }
 0x2c3   : > { %4262 = vmatmul.mubr.bf16.gmra.mrb[56].mxu0 %v8726_v57 }
 0x2c4   : > { %4269 = vmatprep.mubr.bf16.mxu0 %v7555_v13  ;;  %v8084_v15 = vadd.f32 %v5552_v36, %v2793_v19  ;;  %v5453_v31 = vpop.f32.mrb[152].mxu1  ;;  %v8756_v36 = vld [vmem:[#allocation52_spill] sm:$0xff] }
 0x2c5   : > { %v5454_v60 = vpop.f32.mrb[153].mxu1 }
 0x2c6   : > { %v5553_v54 = vpop.f32.mrb[208].mxu0  ;;  %v5455_v14 = vadd.f32 %v5454_v60, %v5453_v31  ;;  %v5456_v17 = vpop.f32.mrb[154].mxu1 }
 0x2c7   : > { %v5554_v40 = vpop.f32.mrb[209].mxu0  ;;  %v5457_v44 = vpop.f32.mrb[155].mxu1 }
 0x2c8   : > { %v5555_v2 = vadd.f32 %v5554_v40, %v5553_v54  ;;  %v5556_v45 = vpop.f32.mrb[210].mxu0  ;;  %v2798_v22 = vadd.f32 %v5455_v14, %v8752_v55  ;;  %v5458_v38 = vadd.f32 %v5457_v44, %v5456_v17 }
 0x2c9   : > { %v5557_v61 = vpop.f32.mrb[211].mxu0  ;;  %4125 = vmatmul.mubr.bf16.gmra.mrb[4].mxu1 %v8753_v51 }
 0x2ca   : > { %v5558_v57 = vadd.f32 %v5557_v61, %v5556_v45  ;;  %v8088_v11 = vadd.f32 %v5555_v2, %v2798_v22  ;;  %v2801_v13 = vadd.f32 %v5458_v38, %v7957_v10  ;;  %4132 = vmatprep.mubr.bf16.mxu1 %v8754_v4  ;;  %v8758_v22 = vld [vmem:[#allocation55_spill] sm:$0xff] }
 0x2cb   : > { %4270 = vmatmul.mubr.bf16.gmra.mrb[60].mxu0 %v7582_v23 }
 0x2cc   : > { %4277 = vmatprep.mubr.bf16.mxu0 %v7615_v33  ;;  %v8094_v48 = vadd.f32 %v5558_v57, %v2801_v13  ;;  %v5459_v47 = vpop.f32.mrb[156].mxu1  ;;  %v8760_v57 = vmov 0  }
 0x2cd   : > { %v5460_v37 = vpop.f32.mrb[157].mxu1 }
 0x2ce   : > { %v5559_v41 = vpop.f32.mrb[212].mxu0  ;;  %v5461_v16 = vadd.f32 %v5460_v37, %v5459_v47  ;;  %v5462_v21 = vpop.f32.mrb[158].mxu1 }
 0x2cf   : > { %v5560_v46 = vpop.f32.mrb[213].mxu0  ;;  %v5463_v18 = vpop.f32.mrb[159].mxu1 }
 0x2d0   : > { %v5561_v63 = vadd.f32 %v5560_v46, %v5559_v41  ;;  %v5562_v62 = vpop.f32.mrb[214].mxu0  ;;  %v2806_v25 = vadd.f32 %v5461_v16, %v8755_v58  ;;  %v5464_v10 = vadd.f32 %v5463_v18, %v5462_v21 }
 0x2d1   : > { %v5563_v29 = vpop.f32.mrb[215].mxu0  ;;  %4133 = vmatmul.mubr.bf16.gmra.mrb[8].mxu1 %v8756_v36 }
 0x2d2   : > { %v5564_v23 = vadd.f32 %v5563_v29, %v5562_v62  ;;  %v8098_v28 = vadd.f32 %v5561_v63, %v2806_v25  ;;  %v2809_v33 = vadd.f32 %v5464_v10, %v7967_v56  ;;  %4140 = vmatprep.mubr.bf16.mxu1 %v8757_v9  ;;  %v8761_v63 = vld [vmem:[#allocation16_spill] sm:$0xff] }
 0x2d3   : > { %4278 = vmatmul.mubr.bf16.gmra.mrb[64].mxu0 %v7640_v30 }
 0x2d4   : > { %4285 = vmatprep.mubr.bf16.mxu0 %v8729_v20  ;;  %v8104_v19 = vadd.f32 %v5564_v23, %v2809_v33  ;;  %v5465_v1 = vpop.f32.mrb[160].mxu1  ;;  %v8759_v20 = vld [vmem:[#allocation14_spill] sm:$0xff] }
 0x2d5   : > { %v5466_v54 = vpop.f32.mrb[161].mxu1 }
 0x2d6   : > { %v5565_v31 = vpop.f32.mrb[216].mxu0  ;;  %v5467_v60 = vadd.f32 %v5466_v54, %v5465_v1  ;;  %v5468_v40 = vpop.f32.mrb[162].mxu1 }
 0x2d7   : > { %v5566_v14 = vpop.f32.mrb[217].mxu0  ;;  %v5469_v45 = vpop.f32.mrb[163].mxu1 }
 0x2d8   : > { %v5567_v17 = vadd.f32 %v5566_v14, %v5565_v31  ;;  %v5568_v2 = vpop.f32.mrb[218].mxu0  ;;  %v2814_v44 = vadd.f32 %v5467_v60, %v7970_v35  ;;  %v5470_v56 = vadd.f32 %v5469_v45, %v5468_v40  ;;  %v8762_v40 = vld [vmem:[#allocation18_spill] sm:$0xff] }
 0x2d9   : > { %v5569_v55 = vpop.f32.mrb[219].mxu0  ;;  %4141 = vmatmul.mubr.bf16.gmra.mrb[12].mxu1 %v8758_v22 }
 0x2da   : > { %v5570_v30 = vadd.f32 %v5569_v55, %v5568_v2  ;;  %v8108_v38 = vadd.f32 %v5567_v17, %v2814_v44  ;;  %v2817_v61 = vadd.f32 %v5470_v56, %v8759_v20  ;;  %4148 = vmatprep.mubr.bf16.mxu1 %v8760_v57  ;;  %v8763_v55 = vld [vmem:[#allocation57_spill] sm:$0xff] }
 0x2db   : > { %4286 = vmatmul.mubr.bf16.gmra.mrb[68].mxu0 %v8730_v53 }
 0x2dc   : > { %4293 = vmatprep.mubr.bf16.mxu0 %v8760_v57  ;;  %v8114_v51 = vadd.f32 %v5570_v30, %v2817_v61  ;;  %v5471_v13 = vpop.f32.mrb[164].mxu1 }
 0x2dd   : > { %v5472_v35 = vpop.f32.mrb[165].mxu1 }
 0x2de   : > { %v5571_v4 = vpop.f32.mrb[220].mxu0  ;;  %v5473_v47 = vadd.f32 %v5472_v35, %v5471_v13  ;;  %v5474_v37 = vpop.f32.mrb[166].mxu1 }
 0x2df   : > { %v5572_v41 = vpop.f32.mrb[221].mxu0  ;;  %v5475_v21 = vpop.f32.mrb[167].mxu1 }
 0x2e0   : > { %v5573_v16 = vadd.f32 %v5572_v41, %v5571_v4  ;;  %v5574_v46 = vpop.f32.mrb[222].mxu0  ;;  %v2822_v62 = vadd.f32 %v5473_v47, %v8761_v63  ;;  %v5476_v18 = vadd.f32 %v5475_v21, %v5474_v37  ;;  %v8764_v63 = vld [vmem:[#allocation58_spill] sm:$0xff] }
 0x2e1   : > { %v5575_v58 = vpop.f32.mrb[223].mxu0  ;;  %4149 = vmatmul.mubr.bf16.gmra.mrb[16].mxu1 %v8760_v57 }
 0x2e2   : > { %v5576_v53 = vadd.f32 %v5575_v58, %v5574_v46  ;;  %v8118_v25 = vadd.f32 %v5573_v16, %v2822_v62  ;;  %v2825_v10 = vadd.f32 %v5476_v18, %v7983_v32  ;;  %4156 = vmatprep.mubr.bf16.mxu1 %v8760_v57  ;;  %v8765_v58 = vld [vmem:[#allocation60_spill] sm:$0xff] }
 0x2e3   : > { %4294 = vmatmul.mubr.bf16.gmra.mrb[72].mxu0 %v8760_v57 }
 0x2e4   : > { %4301 = vmatprep.mubr.bf16.mxu0 %v8760_v57  ;;  %v8124_v29 = vadd.f32 %v5576_v53, %v2825_v10  ;;  %v5593_v23 = vpop.f32.mrb[168].mxu1 }
 0x2e5   : > { %v5594_v33 = vpop.f32.mrb[169].mxu1 }
 0x2e6   : > { %v5693_v36 = vpop.f32.mrb[224].mxu0  ;;  %v5595_v9 = vadd.f32 %v5594_v33, %v5593_v23  ;;  %v5596_v31 = vpop.f32.mrb[170].mxu1 }
 0x2e7   : > { %v5694_v1 = vpop.f32.mrb[225].mxu0  ;;  %v5597_v14 = vpop.f32.mrb[171].mxu1 }
 0x2e8   : > { %v5695_v54 = vadd.f32 %v5694_v1, %v5693_v36  ;;  %v5696_v60 = vpop.f32.mrb[226].mxu0  ;;  %v3296_v17 = vadd.f32 %v5595_v9, %v8762_v40  ;;  %v5598_v32 = vadd.f32 %v5597_v14, %v5596_v31 }
 0x2e9   : > { %v5697_v2 = vpop.f32.mrb[227].mxu0  ;;  %4157 = vmatmul.mubr.bf16.gmra.mrb[20].mxu1 %v8760_v57 }
 0x2ea   : > { %v5698_v45 = vadd.f32 %v5697_v2, %v5696_v60  ;;  %v8128_v44 = vadd.f32 %v5695_v54, %v3296_v17  ;;  %v3299_v56 = vadd.f32 %v5598_v32, %v7994_v24  ;;  %4342 = vmatprep.mubr.bf16.mxu1 %v8763_v55  ;;  %v8766_v32 = vld [vmem:[#allocation59_spill] sm:$0xff] }
 0x2eb   : > { %4302 = vmatmul.mubr.bf16.gmra.mrb[76].mxu0 %v8760_v57 }
 0x2ec   : > { %v8133_v30 = vadd.f32 %v5698_v45, %v3299_v56  ;;  %v5599_v22 = vpop.f32.mrb[172].mxu1  ;;  %v8767_v45 = vld [vmem:[#allocation62_spill] sm:$0xff] }
 0x2ed   : > { %v5600_v61 = vpop.f32.mrb[173].mxu1 }
 0x2ee   : > { %v5699_v20 = vpop.f32.mrb[228].mxu0  ;;  %v5601_v13 = vadd.f32 %v5600_v61, %v5599_v22  ;;  %v5602_v35 = vpop.f32.mrb[174].mxu1 }
 0x2ef   : > { %v5700_v4 = vpop.f32.mrb[229].mxu0  ;;  %v5603_v37 = vpop.f32.mrb[175].mxu1 }
 0x2f0   : > { %v5701_v47 = vadd.f32 %v5700_v4, %v5699_v20  ;;  %v5702_v41 = vpop.f32.mrb[230].mxu0  ;;  %v3304_v16 = vadd.f32 %v5601_v13, %v7998_v3  ;;  %v5604_v46 = vadd.f32 %v5603_v37, %v5602_v35 }
 0x2f1   : > { %v5703_v21 = vpop.f32.mrb[231].mxu0  ;;  %4343 = vmatmul.mubr.bf16.vlgmr.msra.gmra.mrb[24].mxu1 %v8764_v63  ;;  %v8769_v63 = vld [vmem:[#allocation64_spill] sm:$0xff] }
 0x2f2   : > { %v5704_v24 = vadd.f32 %v5703_v21, %v5702_v41  ;;  %v8137_v62 = vadd.f32 %v5701_v47, %v3304_v16  ;;  %v3307_v18 = vadd.f32 %v5604_v46, %v8004_v12  ;;  %4350 = vmatprep.mubr.bf16.mxu1 %v8765_v58  ;;  %v8768_v21 = vld [vmem:[#allocation61_spill] sm:$0xff] }
 0x2f4   : > { %v8141_v53 = vadd.f32 %v5704_v24, %v3307_v18  ;;  %v5605_v10 = vpop.f32.mrb[176].mxu1 }
 0x2f5   : > { %v5606_v36 = vpop.f32.mrb[177].mxu1 }
 0x2f6   : > { %v5705_v23 = vpop.f32.mrb[232].mxu0  ;;  %v5607_v33 = vadd.f32 %v5606_v36, %v5605_v10  ;;  %v5608_v1 = vpop.f32.mrb[178].mxu1 }
 0x2f7   : > { %v5706_v9 = vpop.f32.mrb[233].mxu0  ;;  %v5609_v54 = vpop.f32.mrb[179].mxu1 }
 0x2f8   : > { %v5707_v3 = vadd.f32 %v5706_v9, %v5705_v23  ;;  %v5708_v31 = vpop.f32.mrb[234].mxu0  ;;  %v3312_v60 = vadd.f32 %v5607_v33, %v8008_v39  ;;  %v5610_v14 = vadd.f32 %v5609_v54, %v5608_v1 }
 0x2f9   : > { %v5709_v40 = vpop.f32.mrb[235].mxu0  ;;  %4351 = vmatmul.mubr.bf16.gmra.mrb[28].mxu1 %v8766_v32  ;;  %v8771_v32 = vld [vmem:[#allocation66_spill] sm:$0xff] }
 0x2fa   : > { %v5710_v17 = vadd.f32 %v5709_v40, %v5708_v31  ;;  %v8145_v12 = vadd.f32 %v5707_v3, %v3312_v60  ;;  %v3315_v2 = vadd.f32 %v5610_v14, %v8014_v27  ;;  %4358 = vmatprep.mubr.bf16.mxu1 %v8767_v45  ;;  %v8770_v40 = vld [vmem:[#allocation63_spill] sm:$0xff] }
 0x2fc   : > { %v8149_v56 = vadd.f32 %v5710_v17, %v3315_v2  ;;  %v5611_v55 = vpop.f32.mrb[180].mxu1 }
 0x2fd   : > { %v5612_v20 = vpop.f32.mrb[181].mxu1 }
 0x2fe   : > { %v5711_v22 = vpop.f32.mrb[236].mxu0  ;;  %v5613_v61 = vadd.f32 %v5612_v20, %v5611_v55  ;;  %v5614_v4 = vpop.f32.mrb[182].mxu1 }
 0x2ff   : > { %v5712_v13 = vpop.f32.mrb[237].mxu0  ;;  %v5615_v47 = vpop.f32.mrb[183].mxu1 }
 0x300   : > { %v5713_v39 = vadd.f32 %v5712_v13, %v5711_v22  ;;  %v5714_v35 = vpop.f32.mrb[238].mxu0  ;;  %v3320_v41 = vadd.f32 %v5613_v61, %v8018_v5  ;;  %v5616_v37 = vadd.f32 %v5615_v47, %v5614_v4 }
 0x301   : > { %v5715_v16 = vpop.f32.mrb[239].mxu0  ;;  %4359 = vmatmul.mubr.bf16.gmra.mrb[32].mxu1 %v8768_v21  ;;  %v8773_v21 = vld [vmem:[#allocation68_spill] sm:$0xff] }
 0x302   : > { %v5716_v46 = vadd.f32 %v5715_v16, %v5714_v35  ;;  %v8153_v27 = vadd.f32 %v5713_v39, %v3320_v41  ;;  %v3323_v24 = vadd.f32 %v5616_v37, %v8024_v43  ;;  %4366 = vmatprep.mubr.bf16.mxu1 %v8769_v63  ;;  %v8772_v16 = vld [vmem:[#allocation65_spill] sm:$0xff] }
 0x304   : > { %v8157_v18 = vadd.f32 %v5716_v46, %v3323_v24  ;;  %v5617_v58 = vpop.f32.mrb[184].mxu1 }
 0x305   : > { %v5618_v23 = vpop.f32.mrb[185].mxu1 }
 0x306   : > { %v5717_v10 = vpop.f32.mrb[240].mxu0  ;;  %v5619_v36 = vadd.f32 %v5618_v23, %v5617_v58  ;;  %v5620_v9 = vpop.f32.mrb[186].mxu1 }
 0x307   : > { %v5718_v33 = vpop.f32.mrb[241].mxu0  ;;  %v5621_v3 = vpop.f32.mrb[187].mxu1 }
 0x308   : > { %v5719_v5 = vadd.f32 %v5718_v33, %v5717_v10  ;;  %v5720_v1 = vpop.f32.mrb[242].mxu0  ;;  %v3328_v31 = vadd.f32 %v5619_v36, %v8028_v0  ;;  %v5622_v54 = vadd.f32 %v5621_v3, %v5620_v9 }
 0x309   : > { %v5721_v60 = vpop.f32.mrb[243].mxu0  ;;  %4367 = vmatmul.mubr.bf16.gmra.mrb[36].mxu1 %v8770_v40  ;;  %v8775_v40 = vld [vmem:[#allocation70_spill] sm:$0xff] }
 0x30a   : > { %v5722_v14 = vadd.f32 %v5721_v60, %v5720_v1  ;;  %v8161_v43 = vadd.f32 %v5719_v5, %v3328_v31  ;;  %v3331_v17 = vadd.f32 %v5622_v54, %v8034_v52  ;;  %4374 = vmatprep.mubr.bf16.mxu1 %v8771_v32  ;;  %v8774_v60 = vld [vmem:[#allocation67_spill] sm:$0xff] }
 0x30c   : > { %v8165_v2 = vadd.f32 %v5722_v14, %v3331_v17  ;;  %v5623_v45 = vpop.f32.mrb[188].mxu1 }
 0x30d   : > { %v5624_v22 = vpop.f32.mrb[189].mxu1 }
 0x30e   : > { %v5723_v55 = vpop.f32.mrb[244].mxu0  ;;  %v5625_v20 = vadd.f32 %v5624_v22, %v5623_v45  ;;  %v5626_v13 = vpop.f32.mrb[190].mxu1 }
 0x30f   : > { %v5724_v61 = vpop.f32.mrb[245].mxu0  ;;  %v5627_v39 = vpop.f32.mrb[191].mxu1 }
 0x310   : > { %v5725_v0 = vadd.f32 %v5724_v61, %v5723_v55  ;;  %v5726_v4 = vpop.f32.mrb[246].mxu0  ;;  %v3336_v35 = vadd.f32 %v5625_v20, %v8038_v6  ;;  %v5628_v47 = vadd.f32 %v5627_v39, %v5626_v13 }
 0x311   : > { %v5727_v41 = vpop.f32.mrb[247].mxu0  ;;  %4375 = vmatmul.mubr.bf16.gmra.mrb[40].mxu1 %v8772_v16  ;;  %v8777_v16 = vld [vmem:[#allocation72_spill] sm:$0xff] }
 0x312   : > { %v5728_v37 = vadd.f32 %v5727_v41, %v5726_v4  ;;  %v8169_v52 = vadd.f32 %v5725_v0, %v3336_v35  ;;  %v3339_v46 = vadd.f32 %v5628_v47, %v8044_v59  ;;  %4382 = vmatprep.mubr.bf16.mxu1 %v8773_v21  ;;  %v8776_v41 = vld [vmem:[#allocation69_spill] sm:$0xff] }
 0x314   : > { %v8173_v24 = vadd.f32 %v5728_v37, %v3339_v46  ;;  %v5629_v63 = vpop.f32.mrb[192].mxu1 }
 0x315   : > { %v5630_v10 = vpop.f32.mrb[193].mxu1 }
 0x316   : > { %v5729_v58 = vpop.f32.mrb[248].mxu0  ;;  %v5631_v23 = vadd.f32 %v5630_v10, %v5629_v63  ;;  %v5632_v33 = vpop.f32.mrb[194].mxu1 }
 0x317   : > { %v5730_v36 = vpop.f32.mrb[249].mxu0  ;;  %v5633_v5 = vpop.f32.mrb[195].mxu1 }
 0x318   : > { %v5731_v6 = vadd.f32 %v5730_v36, %v5729_v58  ;;  %v5732_v9 = vpop.f32.mrb[250].mxu0  ;;  %v3344_v1 = vadd.f32 %v5631_v23, %v8048_v7  ;;  %v5634_v3 = vadd.f32 %v5633_v5, %v5632_v33 }
 0x319   : > { %v5733_v31 = vpop.f32.mrb[251].mxu0  ;;  %4383 = vmatmul.mubr.bf16.gmra.mrb[44].mxu1 %v8774_v60  ;;  %v8779_v60 = vld [vmem:[#allocation74_spill] sm:$0xff] }
 0x31a   : > { %v5734_v54 = vadd.f32 %v5733_v31, %v5732_v9  ;;  %v8177_v59 = vadd.f32 %v5731_v6, %v3344_v1  ;;  %v3347_v14 = vadd.f32 %v5634_v3, %v8054_v50  ;;  %4390 = vmatprep.mubr.bf16.mxu1 %v8775_v40  ;;  %v8778_v31 = vld [vmem:[#allocation71_spill] sm:$0xff] }
 0x31c   : > { %v8181_v17 = vadd.f32 %v5734_v54, %v3347_v14  ;;  %v5635_v32 = vpop.f32.mrb[196].mxu1 }
 0x31d   : > { %v5636_v55 = vpop.f32.mrb[197].mxu1 }
 0x31e   : > { %v5735_v45 = vpop.f32.mrb[252].mxu0  ;;  %v5637_v22 = vadd.f32 %v5636_v55, %v5635_v32  ;;  %v5638_v61 = vpop.f32.mrb[198].mxu1 }
 0x31f   : > { %v5736_v20 = vpop.f32.mrb[253].mxu0  ;;  %v5639_v0 = vpop.f32.mrb[199].mxu1 }
 0x320   : > { %v5737_v7 = vadd.f32 %v5736_v20, %v5735_v45  ;;  %v5738_v13 = vpop.f32.mrb[254].mxu0  ;;  %v3352_v4 = vadd.f32 %v5637_v22, %v8058_v26  ;;  %v5640_v39 = vadd.f32 %v5639_v0, %v5638_v61 }
 0x321   : > { %v5739_v35 = vpop.f32.mrb[255].mxu0  ;;  %4391 = vmatmul.mubr.bf16.gmra.mrb[48].mxu1 %v8776_v41  ;;  %v8781_v41 = vld [vmem:[#allocation76_spill] sm:$0xff] }
 0x322   : > { %v5740_v47 = vadd.f32 %v5739_v35, %v5738_v13  ;;  %v8185_v50 = vadd.f32 %v5737_v7, %v3352_v4  ;;  %v3355_v37 = vadd.f32 %v5640_v39, %v8064_v8  ;;  %4398 = vmatprep.mubr.bf16.mxu1 %v8777_v16  ;;  %v8780_v35 = vld [vmem:[#allocation73_spill] sm:$0xff] }
 0x324   : > { %v8189_v46 = vadd.f32 %v5740_v47, %v3355_v37  ;;  %v5641_v21 = vpop.f32.mrb[200].mxu1 }
 0x325   : > { %v5642_v58 = vpop.f32.mrb[201].mxu1 }
 0x326   : > { %v5741_v63 = vpop.f32.mrb[0].mxu0  ;;  %v5643_v10 = vadd.f32 %v5642_v58, %v5641_v21  ;;  %v5644_v36 = vpop.f32.mrb[202].mxu1 }
 0x327   : > { %v5742_v23 = vpop.f32.mrb[1].mxu0  ;;  %v5645_v6 = vpop.f32.mrb[203].mxu1 }
 0x328   : > { %v5743_v26 = vadd.f32 %v5742_v23, %v5741_v63  ;;  %v5744_v33 = vpop.f32.mrb[2].mxu0  ;;  %v3360_v9 = vadd.f32 %v5643_v10, %v8068_v49  ;;  %v5646_v5 = vadd.f32 %v5645_v6, %v5644_v36 }
 0x329   : > { %v5745_v1 = vpop.f32.mrb[3].mxu0  ;;  %4399 = vmatmul.mubr.bf16.gmra.mrb[52].mxu1 %v8778_v31  ;;  %v8783_v31 = vld [vmem:[#allocation78_spill] sm:$0xff] }
 0x32a   : > { %v5746_v3 = vadd.f32 %v5745_v1, %v5744_v33  ;;  %v8193_v8 = vadd.f32 %v5743_v26, %v3360_v9  ;;  %v3363_v54 = vadd.f32 %v5646_v5, %v8074_v34  ;;  %4406 = vmatprep.mubr.bf16.mxu1 %v8779_v60  ;;  %v8782_v1 = vld [vmem:[#allocation75_spill] sm:$0xff] }
 0x32c   : > { %v8197_v14 = vadd.f32 %v5746_v3, %v3363_v54  ;;  %v5647_v40 = vpop.f32.mrb[204].mxu1 }
 0x32d   : > { %v5648_v45 = vpop.f32.mrb[205].mxu1 }
 0x32e   : > { %v5747_v32 = vpop.f32.mrb[4].mxu0  ;;  %v5649_v55 = vadd.f32 %v5648_v45, %v5647_v40  ;;  %v5650_v20 = vpop.f32.mrb[206].mxu1 }
 0x32f   : > { %v5748_v22 = vpop.f32.mrb[5].mxu0  ;;  %v5651_v7 = vpop.f32.mrb[207].mxu1 }
 0x330   : > { %v5749_v49 = vadd.f32 %v5748_v22, %v5747_v32  ;;  %v5750_v61 = vpop.f32.mrb[6].mxu0  ;;  %v3368_v13 = vadd.f32 %v5649_v55, %v8078_v42  ;;  %v5652_v0 = vadd.f32 %v5651_v7, %v5650_v20 }
 0x331   : > { %v5751_v4 = vpop.f32.mrb[7].mxu0  ;;  %4407 = vmatmul.mubr.bf16.gmra.mrb[56].mxu1 %v8780_v35  ;;  %v8787_v35 = vld [vmem:[#allocation79_spill] sm:$0xff] }
 0x332   : > { %v5752_v39 = vadd.f32 %v5751_v4, %v5750_v61  ;;  %v8201_v34 = vadd.f32 %v5749_v49, %v3368_v13  ;;  %v3371_v47 = vadd.f32 %v5652_v0, %v8084_v15  ;;  %4414 = vmatprep.mubr.bf16.mxu1 %v8781_v41  ;;  %v8785_v4 = vld [vmem:[#allocation77_spill] sm:$0xff] }
 0x334   : > { %v8205_v37 = vadd.f32 %v5752_v39, %v3371_v47  ;;  %v5653_v16 = vpop.f32.mrb[208].mxu1 }
 0x335   : > { %v5654_v63 = vpop.f32.mrb[209].mxu1 }
 0x336   : > { %v5753_v21 = vpop.f32.mrb[8].mxu0  ;;  %v5655_v58 = vadd.f32 %v5654_v63, %v5653_v16  ;;  %v5656_v23 = vpop.f32.mrb[210].mxu1 }
 0x337   : > { %v5754_v10 = vpop.f32.mrb[9].mxu0  ;;  %v5657_v26 = vpop.f32.mrb[211].mxu1 }
 0x338   : > { %v5755_v42 = vadd.f32 %v5754_v10, %v5753_v21  ;;  %v5756_v36 = vpop.f32.mrb[10].mxu0  ;;  %v3376_v33 = vadd.f32 %v5655_v58, %v8088_v11  ;;  %v5658_v6 = vadd.f32 %v5657_v26, %v5656_v23 }
 0x339   : > { %v5757_v9 = vpop.f32.mrb[11].mxu0  ;;  %4415 = vmatmul.mubr.bf16.gmra.mrb[60].mxu1 %v8782_v1 }
 0x33a   : > { %v5758_v5 = vadd.f32 %v5757_v9, %v5756_v36  ;;  %v8209_v15 = vadd.f32 %v5755_v42, %v3376_v33  ;;  %v3379_v3 = vadd.f32 %v5658_v6, %v8094_v48  ;;  %4422 = vmatprep.mubr.bf16.mxu1 %v8783_v31  ;;  %v8789_v9 = vld [vmem:[#allocation43_spill] sm:$0xff] }
 0x33c   : > { %v8213_v54 = vadd.f32 %v5758_v5, %v3379_v3  ;;  %v5659_v60 = vpop.f32.mrb[212].mxu1 }
 0x33d   : > { %v5660_v32 = vpop.f32.mrb[213].mxu1 }
 0x33e   : > { %8784 = vst [vmem:[#allocation20_spill] sm:$0xff] %v8213_v54  ;;  %v5759_v40 = vpop.f32.mrb[12].mxu0  ;;  %v5661_v45 = vadd.f32 %v5660_v32, %v5659_v60  ;;  %v5662_v22 = vpop.f32.mrb[214].mxu1 }
 0x33f   : > { %v5760_v55 = vpop.f32.mrb[13].mxu0  ;;  %v5663_v49 = vpop.f32.mrb[215].mxu1 }
 0x340   : > { %v5761_v11 = vadd.f32 %v5760_v55, %v5759_v40  ;;  %v5762_v20 = vpop.f32.mrb[14].mxu0  ;;  %v3384_v61 = vadd.f32 %v5661_v45, %v8098_v28  ;;  %v5664_v7 = vadd.f32 %v5663_v49, %v5662_v22 }
 0x341   : > { %v5763_v13 = vpop.f32.mrb[15].mxu0  ;;  %4423 = vmatmul.mubr.bf16.gmra.mrb[64].mxu1 %v8785_v4 }
 0x342   : > { %v5764_v0 = vadd.f32 %v5763_v13, %v5762_v20  ;;  %v8217_v48 = vadd.f32 %v5761_v11, %v3384_v61  ;;  %v3387_v39 = vadd.f32 %v5664_v7, %v8104_v19  ;;  %4430 = vmatprep.mubr.bf16.mxu1 %v8787_v35 }
 0x344   : > { %8786 = vst [vmem:[#allocation22_spill] sm:$0xff] %v8217_v48  ;;  %v8221_v47 = vadd.f32 %v5764_v0, %v3387_v39  ;;  %v5665_v41 = vpop.f32.mrb[216].mxu1 }
 0x345   : > { %v5666_v21 = vpop.f32.mrb[217].mxu1 }
 0x346   : > { %8788 = vst [vmem:[#allocation24_spill] sm:$0xff] %v8221_v47  ;;  %v5765_v16 = vpop.f32.mrb[16].mxu0  ;;  %v5667_v63 = vadd.f32 %v5666_v21, %v5665_v41  ;;  %v5668_v10 = vpop.f32.mrb[218].mxu1 }
 0x347   : > { %v5766_v58 = vpop.f32.mrb[17].mxu0  ;;  %v5669_v42 = vpop.f32.mrb[219].mxu1 }
 0x348   : > { %v5767_v28 = vadd.f32 %v5766_v58, %v5765_v16  ;;  %v5768_v23 = vpop.f32.mrb[18].mxu0  ;;  %v3392_v36 = vadd.f32 %v5667_v63, %v8108_v38  ;;  %v5670_v26 = vadd.f32 %v5669_v42, %v5668_v10 }
 0x349   : > { %v5769_v33 = vpop.f32.mrb[19].mxu0  ;;  %4431 = vmatmul.mubr.bf16.gmra.mrb[68].mxu1 %v8789_v9 }
 0x34a   : > { %v5770_v6 = vadd.f32 %v5769_v33, %v5768_v23  ;;  %v8225_v19 = vadd.f32 %v5767_v28, %v3392_v36  ;;  %v3395_v5 = vadd.f32 %v5670_v26, %v8114_v51  ;;  %4438 = vmatprep.mubr.bf16.mxu1 %v8760_v57 }
 0x34c   : > { %8790 = vst [vmem:[#allocation26_spill] sm:$0xff] %v8225_v19  ;;  %v8229_v1 = vadd.f32 %v5770_v6, %v3395_v5  ;;  %v5671_v3 = vpop.f32.mrb[220].mxu1 }
 0x34d   : > { %v5672_v60 = vpop.f32.mrb[221].mxu1 }
 0x34e   : > { %8791 = vst [vmem:[#allocation28_spill] sm:$0xff] %v8229_v1  ;;  %v5771_v31 = vpop.f32.mrb[20].mxu0  ;;  %v5673_v40 = vadd.f32 %v5672_v60, %v5671_v3  ;;  %v5674_v45 = vpop.f32.mrb[222].mxu1 }
 0x34f   : > { %v5772_v32 = vpop.f32.mrb[21].mxu0  ;;  %v5675_v22 = vpop.f32.mrb[223].mxu1 }
 0x350   : > { %v5773_v38 = vadd.f32 %v5772_v32, %v5771_v31  ;;  %v5774_v55 = vpop.f32.mrb[22].mxu0  ;;  %v3400_v11 = vadd.f32 %v5673_v40, %v8118_v25  ;;  %v5676_v20 = vadd.f32 %v5675_v22, %v5674_v45 }
 0x351   : > { %v5775_v49 = vpop.f32.mrb[23].mxu0  ;;  %4439 = vmatmul.mubr.bf16.gmra.mrb[72].mxu1 %v8760_v57 }
 0x352   : > { %v5776_v61 = vadd.f32 %v5775_v49, %v5774_v55  ;;  %v8233_v51 = vadd.f32 %v5773_v38, %v3400_v11  ;;  %v3403_v7 = vadd.f32 %v5676_v20, %v8124_v29  ;;  %4446 = vmatprep.mubr.bf16.mxu1 %v8760_v57  ;;  %v8598_v29 = vmov 0.0|0.0  }
 0x353   : > { %6077 = vmatprep.subr.bf16.mxu0 %v8598_v29 }
 0x354   : > { %8792 = vst [vmem:[#allocation30_spill] sm:$0xff] %v8233_v51  ;;  %v8237_v13 = vadd.f32 %v5776_v61, %v3403_v7  ;;  %v5793_v0 = vpop.f32.mrb[224].mxu1 }
 0x355   : > { %v5794_v39 = vpop.f32.mrb[225].mxu1 }
 0x356   : > { %8793 = vst [vmem:[#allocation32_spill] sm:$0xff] %v8237_v13  ;;  %v5893_v4 = vpop.f32.mrb[24].mxu0  ;;  %v5795_v35 = vadd.f32 %v5794_v39, %v5793_v0  ;;  %v5796_v16 = vpop.f32.mrb[226].mxu1 }
 0x357   : > { %v5894_v41 = vpop.f32.mrb[25].mxu0  ;;  %v5797_v63 = vpop.f32.mrb[227].mxu1 }
 0x358   : > { %v5895_v25 = vadd.f32 %v5894_v41, %v5893_v4  ;;  %v5896_v21 = vpop.f32.mrb[26].mxu0  ;;  %v5798_v58 = vadd.f32 %v5797_v63, %v5796_v16 }
 0x359   : > { %v5897_v10 = vpop.f32.mrb[27].mxu0  ;;  %4447 = vmatmul.mubr.bf16.gmra.mrb[76].mxu1 %v8760_v57 }
 0x35a   : > { %v8239_v28 = vadd.f32 %v5895_v25, %v5795_v35  ;;  %v5898_v23 = vadd.f32 %v5897_v10, %v5896_v21  ;;  %4827 = vmatprep.mubr.bf16.mxu1 %v8760_v57 }
 0x35c   : > { %v8244_v42 = vadd.f32 %v5898_v23, %v5798_v58  ;;  %v5799_v36 = vpop.f32.mrb[228].mxu1 }
 0x35d   : > { %v5800_v33 = vpop.f32.mrb[229].mxu1 }
 0x35e   : > { %v5899_v26 = vpop.f32.mrb[28].mxu0  ;;  %v5801_v6 = vadd.f32 %v5800_v33, %v5799_v36  ;;  %v5802_v5 = vpop.f32.mrb[230].mxu1 }
 0x35f   : > { %v5900_v9 = vpop.f32.mrb[29].mxu0  ;;  %v5803_v60 = vpop.f32.mrb[231].mxu1 }
 0x360   : > { %v5901_v3 = vadd.f32 %v5900_v9, %v5899_v26  ;;  %v5902_v31 = vpop.f32.mrb[30].mxu0  ;;  %v5804_v40 = vadd.f32 %v5803_v60, %v5802_v5 }
 0x361   : > { %v5903_v32 = vpop.f32.mrb[31].mxu0 }
 0x362   : > { %v8246_v45 = vadd.f32 %v5901_v3, %v5801_v6  ;;  %v5904_v38 = vadd.f32 %v5903_v32, %v5902_v31 }
 0x364   : > { %v8248_v55 = vadd.f32 %v5904_v38, %v5804_v40  ;;  %v5805_v22 = vpop.f32.mrb[232].mxu1 }
 0x365   : > { %v5806_v11 = vpop.f32.mrb[233].mxu1 }
 0x366   : > { %v5905_v57 = vpop.f32.mrb[32].mxu0  ;;  %v5807_v20 = vadd.f32 %v5806_v11, %v5805_v22  ;;  %v5808_v61 = vpop.f32.mrb[234].mxu1 }
 0x367   : > { %v5906_v49 = vpop.f32.mrb[33].mxu0  ;;  %v5809_v4 = vpop.f32.mrb[235].mxu1 }
 0x368   : > { %v5907_v7 = vadd.f32 %v5906_v49, %v5905_v57  ;;  %v5908_v0 = vpop.f32.mrb[34].mxu0  ;;  %v5810_v39 = vadd.f32 %v5809_v4, %v5808_v61 }
 0x369   : > { %v5909_v35 = vpop.f32.mrb[35].mxu0 }
 0x36a   : > { %v8250_v41 = vadd.f32 %v5907_v7, %v5807_v20  ;;  %v5910_v16 = vadd.f32 %v5909_v35, %v5908_v0 }
 0x36c   : > { %v8252_v25 = vadd.f32 %v5910_v16, %v5810_v39  ;;  %v5811_v21 = vpop.f32.mrb[236].mxu1 }
 0x36d   : > { %v5812_v58 = vpop.f32.mrb[237].mxu1 }
 0x36e   : > { %v5911_v63 = vpop.f32.mrb[36].mxu0  ;;  %v5813_v10 = vadd.f32 %v5812_v58, %v5811_v21  ;;  %v5814_v36 = vpop.f32.mrb[238].mxu1 }
 0x36f   : > { %v5912_v23 = vpop.f32.mrb[37].mxu0  ;;  %v5815_v6 = vpop.f32.mrb[239].mxu1 }
 0x370   : > { %v5913_v26 = vadd.f32 %v5912_v23, %v5911_v63  ;;  %v5914_v33 = vpop.f32.mrb[38].mxu0  ;;  %v5816_v9 = vadd.f32 %v5815_v6, %v5814_v36 }
 0x371   : > { %v5915_v5 = vpop.f32.mrb[39].mxu0 }
 0x372   : > { %v8254_v3 = vadd.f32 %v5913_v26, %v5813_v10  ;;  %v5916_v31 = vadd.f32 %v5915_v5, %v5914_v33 }
 0x374   : > { %v8256_v60 = vadd.f32 %v5916_v31, %v5816_v9  ;;  %v5817_v40 = vpop.f32.mrb[240].mxu1 }
 0x375   : > { %v5818_v38 = vpop.f32.mrb[241].mxu1 }
 0x376   : > { %v5917_v32 = vpop.f32.mrb[40].mxu0  ;;  %v5819_v22 = vadd.f32 %v5818_v38, %v5817_v40  ;;  %v5820_v11 = vpop.f32.mrb[242].mxu1 }
 0x377   : > { %v5918_v57 = vpop.f32.mrb[41].mxu0  ;;  %v5821_v61 = vpop.f32.mrb[243].mxu1 }
 0x378   : > { %v5919_v20 = vadd.f32 %v5918_v57, %v5917_v32  ;;  %v5920_v49 = vpop.f32.mrb[42].mxu0  ;;  %v5822_v7 = vadd.f32 %v5821_v61, %v5820_v11 }
 0x379   : > { %v5921_v0 = vpop.f32.mrb[43].mxu0 }
 0x37a   : > { %v8258_v4 = vadd.f32 %v5919_v20, %v5819_v22  ;;  %v5922_v39 = vadd.f32 %v5921_v0, %v5920_v49 }
 0x37c   : > { %v8260_v35 = vadd.f32 %v5922_v39, %v5822_v7  ;;  %v5823_v16 = vpop.f32.mrb[244].mxu1 }
 0x37d   : > { %v5824_v63 = vpop.f32.mrb[245].mxu1 }
 0x37e   : > { %v5923_v21 = vpop.f32.mrb[44].mxu0  ;;  %v5825_v58 = vadd.f32 %v5824_v63, %v5823_v16  ;;  %v5826_v23 = vpop.f32.mrb[246].mxu1 }
 0x37f   : > { %v5924_v10 = vpop.f32.mrb[45].mxu0  ;;  %v5827_v33 = vpop.f32.mrb[247].mxu1 }
 0x380   : > { %v5925_v36 = vadd.f32 %v5924_v10, %v5923_v21  ;;  %v5926_v26 = vpop.f32.mrb[46].mxu0  ;;  %v5828_v6 = vadd.f32 %v5827_v33, %v5826_v23 }
 0x381   : > { %v5927_v9 = vpop.f32.mrb[47].mxu0 }
 0x382   : > { %v8262_v5 = vadd.f32 %v5925_v36, %v5825_v58  ;;  %v5928_v31 = vadd.f32 %v5927_v9, %v5926_v26 }
 0x384   : > { %v8264_v40 = vadd.f32 %v5928_v31, %v5828_v6  ;;  %v5829_v32 = vpop.f32.mrb[248].mxu1 }
 0x385   : > { %v5830_v22 = vpop.f32.mrb[249].mxu1 }
 0x386   : > { %v5929_v38 = vpop.f32.mrb[48].mxu0  ;;  %v5831_v57 = vadd.f32 %v5830_v22, %v5829_v32  ;;  %v5832_v20 = vpop.f32.mrb[250].mxu1 }
 0x387   : > { %v5930_v11 = vpop.f32.mrb[49].mxu0  ;;  %v5833_v7 = vpop.f32.mrb[251].mxu1 }
 0x388   : > { %v5931_v49 = vadd.f32 %v5930_v11, %v5929_v38  ;;  %v5932_v61 = vpop.f32.mrb[50].mxu0  ;;  %v5834_v0 = vadd.f32 %v5833_v7, %v5832_v20 }
 0x389   : > { %v5933_v39 = vpop.f32.mrb[51].mxu0 }
 0x38a   : > { %v8266_v16 = vadd.f32 %v5931_v49, %v5831_v57  ;;  %v5934_v21 = vadd.f32 %v5933_v39, %v5932_v61 }
 0x38c   : > { %v8268_v63 = vadd.f32 %v5934_v21, %v5834_v0  ;;  %v5835_v58 = vpop.f32.mrb[252].mxu1 }
 0x38d   : > { %v5836_v23 = vpop.f32.mrb[253].mxu1 }
 0x38e   : > { %v5935_v10 = vpop.f32.mrb[52].mxu0  ;;  %v5837_v36 = vadd.f32 %v5836_v23, %v5835_v58  ;;  %v5838_v33 = vpop.f32.mrb[254].mxu1 }
 0x38f   : > { %v5936_v26 = vpop.f32.mrb[53].mxu0  ;;  %v5839_v31 = vpop.f32.mrb[255].mxu1 }
 0x390   : > { %v5937_v6 = vadd.f32 %v5936_v26, %v5935_v10  ;;  %v5938_v9 = vpop.f32.mrb[54].mxu0  ;;  %v5840_v32 = vadd.f32 %v5839_v31, %v5838_v33 }
 0x391   : > { %v5939_v38 = vpop.f32.mrb[55].mxu0 }
 0x392   : > { %v8270_v22 = vadd.f32 %v5937_v6, %v5837_v36  ;;  %v5940_v11 = vadd.f32 %v5939_v38, %v5938_v9 }
 0x394   : > { %v8272_v20 = vadd.f32 %v5940_v11, %v5840_v32  ;;  %v5841_v57 = vpop.f32.mrb[0].mxu1 }
 0x395   : > { %v5842_v61 = vpop.f32.mrb[1].mxu1 }
 0x396   : > { %v5941_v49 = vpop.f32.mrb[56].mxu0  ;;  %v5843_v7 = vadd.f32 %v5842_v61, %v5841_v57  ;;  %v5844_v39 = vpop.f32.mrb[2].mxu1 }
 0x397   : > { %v5942_v0 = vpop.f32.mrb[57].mxu0  ;;  %v5845_v23 = vpop.f32.mrb[3].mxu1 }
 0x398   : > { %v5943_v21 = vadd.f32 %v5942_v0, %v5941_v49  ;;  %v5944_v58 = vpop.f32.mrb[58].mxu0  ;;  %v5846_v29 = vadd.f32 %v5845_v23, %v5844_v39 }
 0x399   : > { %v5945_v10 = vpop.f32.mrb[59].mxu0 }
 0x39a   : > { %v8274_v26 = vadd.f32 %v5943_v21, %v5843_v7  ;;  %v5946_v33 = vadd.f32 %v5945_v10, %v5944_v58 }
 0x39c   : > { %v8276_v31 = vadd.f32 %v5946_v33, %v5846_v29  ;;  %v5847_v36 = vpop.f32.mrb[4].mxu1 }
 0x39d   : > { %v5848_v9 = vpop.f32.mrb[5].mxu1 }
 0x39e   : > { %v5947_v6 = vpop.f32.mrb[60].mxu0  ;;  %v5849_v32 = vadd.f32 %v5848_v9, %v5847_v36  ;;  %v5850_v11 = vpop.f32.mrb[6].mxu1 }
 0x39f   : > { %v5948_v38 = vpop.f32.mrb[61].mxu0  ;;  %v5851_v61 = vpop.f32.mrb[7].mxu1 }
 0x3a0   : > { %v5949_v13 = vadd.f32 %v5948_v38, %v5947_v6  ;;  %v5950_v57 = vpop.f32.mrb[62].mxu0  ;;  %v5852_v51 = vadd.f32 %v5851_v61, %v5850_v11 }
 0x3a1   : > { %v5951_v49 = vpop.f32.mrb[63].mxu0 }
 0x3a2   : > { %v8278_v0 = vadd.f32 %v5949_v13, %v5849_v32  ;;  %v5952_v39 = vadd.f32 %v5951_v49, %v5950_v57 }
 0x3a4   : > { %v8280_v23 = vadd.f32 %v5952_v39, %v5852_v51  ;;  %v5853_v7 = vpop.f32.mrb[8].mxu1 }
 0x3a5   : > { %v5854_v29 = vpop.f32.mrb[9].mxu1 }
 0x3a6   : > { %v5953_v21 = vpop.f32.mrb[64].mxu0  ;;  %v5855_v58 = vadd.f32 %v5854_v29, %v5853_v7  ;;  %v5856_v33 = vpop.f32.mrb[10].mxu1 }
 0x3a7   : > { %v5954_v10 = vpop.f32.mrb[65].mxu0  ;;  %v5857_v9 = vpop.f32.mrb[11].mxu1 }
 0x3a8   : > { %v5955_v1 = vadd.f32 %v5954_v10, %v5953_v21  ;;  %v5956_v36 = vpop.f32.mrb[66].mxu0  ;;  %v5858_v19 = vadd.f32 %v5857_v9, %v5856_v33 }
 0x3a9   : > { %v5957_v6 = vpop.f32.mrb[67].mxu0 }
 0x3aa   : > { %v8282_v38 = vadd.f32 %v5955_v1, %v5855_v58  ;;  %v5958_v11 = vadd.f32 %v5957_v6, %v5956_v36 }
 0x3ac   : > { %v8284_v61 = vadd.f32 %v5958_v11, %v5858_v19  ;;  %v5859_v13 = vpop.f32.mrb[12].mxu1 }
 0x3ad   : > { %v5860_v51 = vpop.f32.mrb[13].mxu1 }
 0x3ae   : > { %8794 = vst [vmem:[#allocation34_spill] sm:$0xff] %v8284_v61  ;;  %v5959_v32 = vpop.f32.mrb[68].mxu0  ;;  %v5861_v57 = vadd.f32 %v5860_v51, %v5859_v13  ;;  %v5862_v39 = vpop.f32.mrb[14].mxu1 }
 0x3af   : > { %v5960_v49 = vpop.f32.mrb[69].mxu0  ;;  %v5863_v29 = vpop.f32.mrb[15].mxu1 }
 0x3b0   : > { %v5961_v47 = vadd.f32 %v5960_v49, %v5959_v32  ;;  %v5962_v7 = vpop.f32.mrb[70].mxu0  ;;  %v5864_v48 = vadd.f32 %v5863_v29, %v5862_v39 }
 0x3b1   : > { %v5963_v21 = vpop.f32.mrb[71].mxu0 }
 0x3b2   : > { %v8286_v10 = vadd.f32 %v5961_v47, %v5861_v57  ;;  %v5964_v33 = vadd.f32 %v5963_v21, %v5962_v7  ;;  %v8297_v7 = vld [vmem:[%s8479_s7] sm:$0x3] }
 0x3b4   : > { %v8288_v9 = vadd.f32 %v5964_v33, %v5864_v48  ;;  %v5865_v1 = vpop.f32.mrb[16].mxu1 }
 0x3b5   : > { %v5866_v19 = vpop.f32.mrb[17].mxu1 }
 0x3b6   : > { %v5965_v58 = vpop.f32.mrb[72].mxu0  ;;  %v5867_v36 = vadd.f32 %v5866_v19, %v5865_v1  ;;  %v5868_v11 = vpop.f32.mrb[18].mxu1 }
 0x3b7   : > { %v5966_v6 = vpop.f32.mrb[73].mxu0  ;;  %v5869_v51 = vpop.f32.mrb[19].mxu1 }
 0x3b8   : > { %v5967_v54 = vadd.f32 %v5966_v6, %v5965_v58  ;;  %v5968_v13 = vpop.f32.mrb[74].mxu0  ;;  %v5870_v61 = vadd.f32 %v5869_v51, %v5868_v11  ;;  %v8795_v58 = vld [vmem:[#allocation8_spill] sm:$0xff]  ;;  %v6331_v51 = vld [vmem:[%s8477_s5 + $0x4] ss:$8 sps:$4 sm:$0xff]  }
 0x3b9   : > { %v5969_v32 = vpop.f32.mrb[75].mxu0  ;;  %v4611_v19 = vrot.slane %v8297_v7, %v8795_v58  ;;  %4795 = vmatprep.subr.bf16.mxu1 %v6331_v51  ;;  %v8330_v51 = vld [vmem:[%s8476_s4] ss:$0 sm:$0xff]  ;;  %v6344_v58 = vld [vmem:[%s8477_s5 + $0x50] ss:$8 sps:$4 sm:$0xff]  }
 0x3ba   : > { %v8290_v49 = vadd.f32 %v5967_v54, %v5867_v36  ;;  %v5970_v39 = vadd.f32 %v5969_v32, %v5968_v13  ;;  %v6329_v13 = vld [vmem:[%s8477_s5] ss:$8 sps:$4 sm:$0xff]  }
 0x3bb   : > { %5158 = vmatprep.mubr.msk.f32.mxu0 %vm4613_vm11, %v4611_v19  ;;  %4796 = vmatpush1.bf16.msra.mxu1 %v6329_v13  ;;  %v6340_v13 = vld [vmem:[%s8477_s5 + $0x34] ss:$8 sps:$4 sm:$0xff]  }
 0x3bc   : > { %v8292_v29 = vadd.f32 %v5970_v39, %v5870_v61  ;;  %v5871_v47 = vpop.f32.mrb[20].mxu1 }
 0x3bd   : > { %v5872_v48 = vpop.f32.mrb[21].mxu1 }
 0x3be   : > { %v5971_v57 = vpop.f32.mrb[76].mxu0  ;;  %v5873_v21 = vadd.f32 %v5872_v48, %v5871_v47  ;;  %v5874_v1 = vpop.f32.mrb[22].mxu1  ;;  %v6334_v47 = vld [vmem:[%s8477_s5 + $0x14] ss:$8 sps:$4 sm:$0xff]   ;;  %v6332_v48 = vld [vmem:[%s8477_s5 + $0x10] ss:$8 sps:$4 sm:$0xff]  }
 0x3bf   : > { %v5972_v33 = vpop.f32.mrb[77].mxu0  ;;  %v5875_v6 = vpop.f32.mrb[23].mxu1  ;;  %4797 = vmatprep.subr.bf16.mxu1 %v6334_v47 }
 0x3c0   : > { %v5973_v54 = vadd.f32 %v5972_v33, %v5971_v57  ;;  %v5974_v36 = vpop.f32.mrb[78].mxu0  ;;  %v5876_v61 = vadd.f32 %v5875_v6, %v5874_v1  ;;  %4798 = vmatpush1.bf16.msra.mxu1 %v6332_v48  ;;  %v6335_v6 = vld [vmem:[%s8477_s5 + $0x20] ss:$8 sps:$4 sm:$0xff]  }
 0x3c1   : > { %v5975_v11 = vpop.f32.mrb[79].mxu0 }
 0x3c2   : > { %v8307_v32 = vadd.f32 %v5973_v54, %v5873_v21  ;;  %v5976_v39 = vadd.f32 %v5975_v11, %v5974_v36  ;;  %v6337_v21 = vld [vmem:[%s8477_s5 + $0x24] ss:$8 sps:$4 sm:$0xff]  }
 0x3c3   : > { %4799 = vmatprep.subr.bf16.mxu1 %v6337_v21 }
 0x3c4   : > { %v8312_v57 = vadd.f32 %v5976_v39, %v5876_v61  ;;  %v5993_v33 = vpop.f32.mrb[24].mxu1  ;;  %4800 = vmatpush1.bf16.msra.mxu1 %v6335_v6 }
 0x3c5   : > { %v5994_v1 = vpop.f32.mrb[25].mxu1  ;;  %4801 = vmatprep.subr.bf16.mxu1 %v6340_v13 }
 0x3c6   : > { %v5995_v19 = vadd.f32 %v5994_v1, %v5993_v33  ;;  %v5996_v54 = vpop.f32.mrb[26].mxu1  ;;  %v6343_v1 = vld [vmem:[%s8477_s5 + $0x44] ss:$8 sps:$4 sm:$0xff]  }
 0x3c7   : > { %v5997_v36 = vpop.f32.mrb[27].mxu1 }
 0x3c8   : > { %v4345_v61 = vadd.f32 %v5995_v19, %v8239_v28  ;;  %v5998_v11 = vadd.f32 %v5997_v36, %v5996_v54  ;;  %v6338_v28 = vld [vmem:[%s8477_s5 + $0x30] ss:$8 sps:$4 sm:$0xff]  }
 0x3c9   : > { %4802 = vmatpush1.bf16.msra.mxu1 %v6338_v28 }
 0x3ca   : > { %v4455_v39 = vadd.f32 %v4345_v61, %v8128_v44  ;;  %v4348_v47 = vadd.f32 %v5998_v11, %v8244_v42  ;;  %v6341_v61 = vld [vmem:[%s8477_s5 + $0x40] ss:$8 sps:$4 sm:$0xff]   ;;  %4803 = vmatprep.subr.bf16.mxu1 %v6343_v1 }
 0x3cc   : > { %v4490_v48 = vadd.f32 %v8330_v51, %v4455_v39  ;;  %v4456_v33 = vadd.f32 %v4348_v47, %v8133_v30  ;;  %v5999_v21 = vpop.f32.mrb[28].mxu1  ;;  %v6346_v39 = vld [vmem:[%s8477_s5 + $0x54] ss:$8 sps:$4 sm:$0xff]  }
 0x3cd   : > { %v6000_v19 = vpop.f32.mrb[29].mxu1  ;;  %4804 = vmatpush1.bf16.msra.mxu1 %v6341_v61 }
 0x3ce   : > { %v4546_v54 = vmul.f32 0.2, %v4490_v48  ;;  %v4491_v44 = vadd.f32 %v8330_v51, %v4456_v33  ;;  %v6001_v42 = vadd.f32 %v6000_v19, %v5999_v21  ;;  %v6002_v36 = vpop.f32.mrb[30].mxu1  ;;  %vm4518_vm12 = vcmp.gt.f32.partialorder %v4490_v48, 0.0  ;;  %4805 = vmatprep.subr.bf16.mxu1 %v6346_v39  ;;  %v6352_v39 = vld [vmem:[%s8477_s5 + $0x74] ss:$8 sps:$4 sm:$0xff]  }
 0x3cf   : > { %v6003_v6 = vpop.f32.mrb[31].mxu1 }
 0x3d0   : > { %v4547_v30 = vmul.f32 0.2, %v4491_v44  ;;  %v4353_v11 = vadd.f32 %v6001_v42, %v8246_v45  ;;  %v6004_v13 = vadd.f32 %v6003_v6, %v6002_v36  ;;  %vm4519_vm13 = vcmp.gt.f32.partialorder %v4491_v44, 0.0 }
 0x3d1   : > { %v4574_v21 = vsel %vm4518_vm12, %v4490_v48, %v4546_v54  ;;  %v8796_v6 = vmov 0.0|0.0   ;;  %4806 = vmatpush1.bf16.msra.mxu1 %v6344_v58 }
 0x3d2   : > { %v4457_v47 = vadd.f32 %v4353_v11, %v8137_v62  ;;  %v4356_v33 = vadd.f32 %v6004_v13, %v8248_v55  ;;  %v4575_v28 = vsel %vm4519_vm13, %v4491_v44, %v4547_v30  ;;  %v6349_v62 = vld [vmem:[%s8477_s5 + $0x64] ss:$8 sps:$4 sm:$0xff]  }
 0x3d3   : > { %v6078_v19 = vpack.c.bf16 %v4575_v28, %v4574_v21  ;;  %4807 = vmatprep.subr.bf16.mxu1 %v6349_v62 }
 0x3d4   : > { %v4492_v45 = vadd.f32 %v8330_v51, %v4457_v47  ;;  %v4458_v1 = vadd.f32 %v4356_v33, %v8141_v53  ;;  %v6005_v42 = vpop.f32.mrb[32].mxu1  ;;  %v6347_v53 = vld [vmem:[%s8477_s5 + $0x60] ss:$8 sps:$4 sm:$0xff]  }
 0x3d5   : > { %v6006_v36 = vpop.f32.mrb[33].mxu1  ;;  %6079 = vmatpush1.bf16.msra.mxu0 %v6078_v19  ;;  %4808 = vmatpush1.bf16.msra.mxu1 %v6347_v53  ;;  %v6350_v19 = vld [vmem:[%s8477_s5 + $0x70] ss:$8 sps:$4 sm:$0xff]  }
 0x3d6   : > { %v4548_v55 = vmul.f32 0.2, %v4492_v45  ;;  %v4493_v48 = vadd.f32 %v8330_v51, %v4458_v1  ;;  %v6007_v54 = vadd.f32 %v6006_v36, %v6005_v42  ;;  %v6008_v44 = vpop.f32.mrb[34].mxu1  ;;  %6080 = vmatprep.subr.bf16.mxu0 %v8796_v6  ;;  %vm4520_vm14 = vcmp.gt.f32.partialorder %v4492_v45, 0.0  ;;  %4809 = vmatprep.subr.bf16.mxu1 %v6352_v39 }
 0x3d7   : > { %v6009_v61 = vpop.f32.mrb[35].mxu1 }
 0x3d8   : > { %v4549_v30 = vmul.f32 0.2, %v4493_v48  ;;  %v4361_v11 = vadd.f32 %v6007_v54, %v8250_v41  ;;  %v6010_v13 = vadd.f32 %v6009_v61, %v6008_v44  ;;  %vm4521_vm15 = vcmp.gt.f32.partialorder %v4493_v48, 0.0 }
 0x3d9   : > { %v4576_v21 = vsel %vm4520_vm14, %v4492_v45, %v4548_v55  ;;  %4810 = vmatpush1.bf16.msra.mxu1 %v6350_v19 }
 0x3da   : > { %v4459_v47 = vadd.f32 %v4361_v11, %v8145_v12  ;;  %v4364_v33 = vadd.f32 %v6010_v13, %v8252_v25  ;;  %v4577_v58 = vsel %vm4521_vm15, %v4493_v48, %v4549_v30 }
 0x3db   : > { %v6081_v28 = vpack.c.bf16 %v4577_v58, %v4576_v21 }
 0x3dc   : > { %v4494_v41 = vadd.f32 %v8330_v51, %v4459_v47  ;;  %v4460_v1 = vadd.f32 %v4364_v33, %v8149_v56  ;;  %v6011_v42 = vpop.f32.mrb[36].mxu1 }
 0x3dd   : > { %v6012_v62 = vpop.f32.mrb[37].mxu1  ;;  %6082 = vmatpush1.bf16.msra.mxu0 %v6081_v28 }
 0x3de   : > { %v4550_v36 = vmul.f32 0.2, %v4494_v41  ;;  %v4495_v12 = vadd.f32 %v8330_v51, %v4460_v1  ;;  %v6013_v25 = vadd.f32 %v6012_v62, %v6011_v42  ;;  %v6014_v45 = vpop.f32.mrb[38].mxu1  ;;  %6083 = vmatprep.subr.bf16.mxu0 %v8796_v6  ;;  %vm4522_vm0 = vcmp.gt.f32.partialorder %v4494_v41, 0.0 }
 0x3df   : > { %v6015_v55 = vpop.f32.mrb[39].mxu1 }
 0x3e0   : > { %v4551_v48 = vmul.f32 0.2, %v4495_v12  ;;  %v4369_v54 = vadd.f32 %v6013_v25, %v8254_v3  ;;  %v6016_v44 = vadd.f32 %v6015_v55, %v6014_v45  ;;  %vm4523_vm1 = vcmp.gt.f32.partialorder %v4495_v12, 0.0 }
 0x3e1   : > { %v4578_v53 = vsel %vm4522_vm0, %v4494_v41, %v4550_v36 }
 0x3e2   : > { %v4461_v56 = vadd.f32 %v4369_v54, %v8153_v27  ;;  %v4372_v61 = vadd.f32 %v6016_v44, %v8256_v60  ;;  %v4579_v30 = vsel %vm4523_vm1, %v4495_v12, %v4551_v48 }
 0x3e3   : > { %v6084_v11 = vpack.c.bf16 %v4579_v30, %v4578_v53 }
 0x3e4   : > { %v4496_v13 = vadd.f32 %v8330_v51, %v4461_v56  ;;  %v4462_v39 = vadd.f32 %v4372_v61, %v8157_v18  ;;  %v6017_v47 = vpop.f32.mrb[40].mxu1 }
 0x3e5   : > { %v6018_v33 = vpop.f32.mrb[41].mxu1  ;;  %6085 = vmatpush1.bf16.msra.mxu0 %v6084_v11 }
 0x3e6   : > { %v4552_v21 = vmul.f32 0.2, %v4496_v13  ;;  %v4497_v58 = vadd.f32 %v8330_v51, %v4462_v39  ;;  %v6019_v3 = vadd.f32 %v6018_v33, %v6017_v47  ;;  %v6020_v28 = vpop.f32.mrb[42].mxu1  ;;  %6086 = vmatprep.subr.bf16.mxu0 %v8796_v6  ;;  %vm4524_vm2 = vcmp.gt.f32.partialorder %v4496_v13, 0.0 }
 0x3e7   : > { %v6021_v27 = vpop.f32.mrb[43].mxu1 }
 0x3e8   : > { %v4553_v60 = vmul.f32 0.2, %v4497_v58  ;;  %v4377_v19 = vadd.f32 %v6019_v3, %v8258_v4  ;;  %v6022_v41 = vadd.f32 %v6021_v27, %v6020_v28  ;;  %vm4525_vm3 = vcmp.gt.f32.partialorder %v4497_v58, 0.0 }
 0x3e9   : > { %v4580_v42 = vsel %vm4524_vm2, %v4496_v13, %v4552_v21 }
 0x3ea   : > { %v4463_v1 = vadd.f32 %v4377_v19, %v8161_v43  ;;  %v4380_v18 = vadd.f32 %v6022_v41, %v8260_v35  ;;  %v4581_v62 = vsel %vm4525_vm3, %v4497_v58, %v4553_v60 }
 0x3eb   : > { %v6087_v36 = vpack.c.bf16 %v4581_v62, %v4580_v42 }
 0x3ec   : > { %v4498_v12 = vadd.f32 %v8330_v51, %v4463_v1  ;;  %v4464_v25 = vadd.f32 %v4380_v18, %v8165_v2  ;;  %v6023_v45 = vpop.f32.mrb[44].mxu1 }
 0x3ed   : > { %v6024_v55 = vpop.f32.mrb[45].mxu1  ;;  %6088 = vmatpush1.bf16.msra.mxu0 %v6087_v36 }
 0x3ee   : > { %v4554_v48 = vmul.f32 0.2, %v4498_v12  ;;  %v4499_v54 = vadd.f32 %v8330_v51, %v4464_v25  ;;  %v6025_v4 = vadd.f32 %v6024_v55, %v6023_v45  ;;  %v6026_v44 = vpop.f32.mrb[46].mxu1  ;;  %6089 = vmatprep.subr.bf16.mxu0 %v8796_v6  ;;  %vm4526_vm4 = vcmp.gt.f32.partialorder %v4498_v12, 0.0 }
 0x3ef   : > { %v6027_v43 = vpop.f32.mrb[47].mxu1 }
 0x3f0   : > { %v4555_v35 = vmul.f32 0.2, %v4499_v54  ;;  %v4385_v56 = vadd.f32 %v6025_v4, %v8262_v5  ;;  %v6028_v61 = vadd.f32 %v6027_v43, %v6026_v44  ;;  %vm4527_vm5 = vcmp.gt.f32.partialorder %v4499_v54, 0.0 }
 0x3f1   : > { %v4582_v30 = vsel %vm4526_vm4, %v4498_v12, %v4554_v48 }
 0x3f2   : > { %v4465_v53 = vadd.f32 %v4385_v56, %v8169_v52  ;;  %v4388_v2 = vadd.f32 %v6028_v61, %v8264_v40  ;;  %v4583_v11 = vsel %vm4527_vm5, %v4499_v54, %v4555_v35 }
 0x3f3   : > { %v6090_v13 = vpack.c.bf16 %v4583_v11, %v4582_v30 }
 0x3f4   : > { %v4500_v39 = vadd.f32 %v8330_v51, %v4465_v53  ;;  %v4466_v47 = vadd.f32 %v4388_v2, %v8173_v24  ;;  %v6029_v33 = vpop.f32.mrb[48].mxu1 }
 0x3f5   : > { %v6030_v21 = vpop.f32.mrb[49].mxu1  ;;  %6091 = vmatpush1.bf16.msra.mxu0 %v6090_v13 }
 0x3f6   : > { %v4556_v58 = vmul.f32 0.2, %v4500_v39  ;;  %v4501_v3 = vadd.f32 %v8330_v51, %v4466_v47  ;;  %v6031_v5 = vadd.f32 %v6030_v21, %v6029_v33  ;;  %v6032_v28 = vpop.f32.mrb[50].mxu1  ;;  %6092 = vmatprep.subr.bf16.mxu0 %v8796_v6  ;;  %vm4528_vm6 = vcmp.gt.f32.partialorder %v4500_v39, 0.0 }
 0x3f7   : > { %v6033_v52 = vpop.f32.mrb[51].mxu1 }
 0x3f8   : > { %v4557_v40 = vmul.f32 0.2, %v4501_v3  ;;  %v4393_v27 = vadd.f32 %v6031_v5, %v8266_v16  ;;  %v6034_v60 = vadd.f32 %v6033_v52, %v6032_v28  ;;  %vm4529_vm7 = vcmp.gt.f32.partialorder %v4501_v3, 0.0 }
 0x3f9   : > { %v4584_v41 = vsel %vm4528_vm6, %v4500_v39, %v4556_v58 }
 0x3fa   : > { %v4467_v19 = vadd.f32 %v4393_v27, %v8177_v59  ;;  %v4396_v24 = vadd.f32 %v6034_v60, %v8268_v63  ;;  %v4585_v1 = vsel %vm4529_vm7, %v4501_v3, %v4557_v40 }
 0x3fb   : > { %v6093_v18 = vpack.c.bf16 %v4585_v1, %v4584_v41 }
 0x3fc   : > { %v4502_v42 = vadd.f32 %v8330_v51, %v4467_v19  ;;  %v4468_v62 = vadd.f32 %v4396_v24, %v8181_v17  ;;  %v6035_v36 = vpop.f32.mrb[52].mxu1 }
 0x3fd   : > { %v6036_v12 = vpop.f32.mrb[53].mxu1  ;;  %6094 = vmatpush1.bf16.msra.mxu0 %v6093_v18 }
 0x3fe   : > { %v4558_v25 = vmul.f32 0.2, %v4502_v42  ;;  %v4503_v45 = vadd.f32 %v8330_v51, %v4468_v62  ;;  %v6037_v16 = vadd.f32 %v6036_v12, %v6035_v36  ;;  %v6038_v55 = vpop.f32.mrb[54].mxu1  ;;  %6095 = vmatprep.subr.bf16.mxu0 %v8796_v6  ;;  %vm4530_vm8 = vcmp.gt.f32.partialorder %v4502_v42, 0.0 }
 0x3ff   : > { %v6039_v59 = vpop.f32.mrb[55].mxu1 }
 0x400   : > { %v4559_v63 = vmul.f32 0.2, %v4503_v45  ;;  %v4401_v48 = vadd.f32 %v6037_v16, %v8270_v22  ;;  %v6040_v54 = vadd.f32 %v6039_v59, %v6038_v55  ;;  %vm4531_vm9 = vcmp.gt.f32.partialorder %v4503_v45, 0.0 }
 0x401   : > { %v4586_v44 = vsel %vm4530_vm8, %v4502_v42, %v4558_v25 }
 0x402   : > { %v4469_v4 = vadd.f32 %v4401_v48, %v8185_v50  ;;  %v4404_v17 = vadd.f32 %v6040_v54, %v8272_v20  ;;  %v4587_v43 = vsel %vm4531_vm9, %v4503_v45, %v4559_v63 }
 0x403   : > { %v6096_v35 = vpack.c.bf16 %v4587_v43, %v4586_v44 }
 0x404   : > { %v4504_v56 = vadd.f32 %v8330_v51, %v4469_v4  ;;  %v4470_v61 = vadd.f32 %v4404_v17, %v8189_v46  ;;  %v6041_v53 = vpop.f32.mrb[56].mxu1 }
 0x405   : > { %v6042_v2 = vpop.f32.mrb[57].mxu1  ;;  %6097 = vmatpush1.bf16.msra.mxu0 %v6096_v35 }
 0x406   : > { %v4560_v30 = vmul.f32 0.2, %v4504_v56  ;;  %v4505_v11 = vadd.f32 %v8330_v51, %v4470_v61  ;;  %v6043_v22 = vadd.f32 %v6042_v2, %v6041_v53  ;;  %v6044_v13 = vpop.f32.mrb[58].mxu1  ;;  %6098 = vmatprep.subr.bf16.mxu0 %v8796_v6  ;;  %vm4532_vm10 = vcmp.gt.f32.partialorder %v4504_v56, 0.0 }
 0x407   : > { %v6045_v50 = vpop.f32.mrb[59].mxu1 }
 0x408   : > { %v4561_v20 = vmul.f32 0.2, %v4505_v11  ;;  %v4409_v39 = vadd.f32 %v6043_v22, %v8274_v26  ;;  %v6046_v47 = vadd.f32 %v6045_v50, %v6044_v13  ;;  %vm4533_vm11 = vcmp.gt.f32.partialorder %v4505_v11, 0.0 }
 0x409   : > { %v4588_v21 = vsel %vm4532_vm10, %v4504_v56, %v4560_v30  ;;  %v8798_v56 = vld [vmem:[#allocation20_spill] sm:$0xff] }
 0x40a   : > { %v4471_v33 = vadd.f32 %v4409_v39, %v8193_v8  ;;  %v4412_v46 = vadd.f32 %v6046_v47, %v8276_v31  ;;  %v4589_v58 = vsel %vm4533_vm11, %v4505_v11, %v4561_v20  ;;  %v8799_v39 = vld [vmem:[#allocation22_spill] sm:$0xff] }
 0x40b   : > { %v6099_v3 = vpack.c.bf16 %v4589_v58, %v4588_v21 }
 0x40c   : > { %v4506_v5 = vadd.f32 %v8330_v51, %v4471_v33  ;;  %v4472_v28 = vadd.f32 %v4412_v46, %v8197_v14  ;;  %v6047_v52 = vpop.f32.mrb[60].mxu1 }
 0x40d   : > { %v6048_v40 = vpop.f32.mrb[61].mxu1  ;;  %6100 = vmatpush1.bf16.msra.mxu0 %v6099_v3 }
 0x40e   : > { %v4562_v27 = vmul.f32 0.2, %v4506_v5  ;;  %v4507_v60 = vadd.f32 %v8330_v51, %v4472_v28  ;;  %v6049_v26 = vadd.f32 %v6048_v40, %v6047_v52  ;;  %v6050_v19 = vpop.f32.mrb[62].mxu1  ;;  %6101 = vmatprep.subr.bf16.mxu0 %v8796_v6  ;;  %vm4534_vm12 = vcmp.gt.f32.partialorder %v4506_v5, 0.0 }
 0x40f   : > { %v6051_v8 = vpop.f32.mrb[63].mxu1 }
 0x410   : > { %v4563_v31 = vmul.f32 0.2, %v4507_v60  ;;  %v4417_v24 = vadd.f32 %v6049_v26, %v8278_v0  ;;  %v6052_v41 = vadd.f32 %v6051_v8, %v6050_v19  ;;  %vm4535_vm13 = vcmp.gt.f32.partialorder %v4507_v60, 0.0 }
 0x411   : > { %v4590_v18 = vsel %vm4534_vm12, %v4506_v5, %v4562_v27  ;;  %v8800_v5 = vld [vmem:[#allocation24_spill] sm:$0xff] }
 0x412   : > { %v4473_v1 = vadd.f32 %v4417_v24, %v8201_v34  ;;  %v4420_v14 = vadd.f32 %v6052_v41, %v8280_v23  ;;  %v4591_v42 = vsel %vm4535_vm13, %v4507_v60, %v4563_v31  ;;  %v8801_v24 = vld [vmem:[#allocation26_spill] sm:$0xff] }
 0x413   : > { %v6102_v62 = vpack.c.bf16 %v4591_v42, %v4590_v18 }
 0x414   : > { %v4508_v36 = vadd.f32 %v8330_v51, %v4473_v1  ;;  %v4474_v12 = vadd.f32 %v4420_v14, %v8205_v37  ;;  %v6053_v25 = vpop.f32.mrb[64].mxu1  ;;  %v8797_v37 = vld [vmem:[#allocation34_spill] sm:$0xff] }
 0x415   : > { %v6054_v45 = vpop.f32.mrb[65].mxu1  ;;  %6103 = vmatpush1.bf16.msra.mxu0 %v6102_v62 }
 0x416   : > { %v4564_v16 = vmul.f32 0.2, %v4508_v36  ;;  %v4509_v55 = vadd.f32 %v8330_v51, %v4474_v12  ;;  %v6055_v0 = vadd.f32 %v6054_v45, %v6053_v25  ;;  %v6056_v59 = vpop.f32.mrb[66].mxu1  ;;  %6104 = vmatprep.subr.bf16.mxu0 %v8796_v6  ;;  %vm4536_vm14 = vcmp.gt.f32.partialorder %v4508_v36, 0.0 }
 0x417   : > { %v6057_v34 = vpop.f32.mrb[67].mxu1 }
 0x418   : > { %v4565_v23 = vmul.f32 0.2, %v4509_v55  ;;  %v4425_v63 = vadd.f32 %v6055_v0, %v8282_v38  ;;  %v6058_v48 = vadd.f32 %v6057_v34, %v6056_v59  ;;  %vm4537_vm15 = vcmp.gt.f32.partialorder %v4509_v55, 0.0 }
 0x419   : > { %v4592_v17 = vsel %vm4536_vm14, %v4508_v36, %v4564_v16  ;;  %v8802_v36 = vld [vmem:[#allocation28_spill] sm:$0xff] }
 0x41a   : > { %v4475_v54 = vadd.f32 %v4425_v63, %v8209_v15  ;;  %v4428_v4 = vadd.f32 %v6058_v48, %v8797_v37  ;;  %v4593_v44 = vsel %vm4537_vm15, %v4509_v55, %v4565_v23  ;;  %v8803_v63 = vld [vmem:[#allocation30_spill] sm:$0xff] }
 0x41b   : > { %v6105_v43 = vpack.c.bf16 %v4593_v44, %v4592_v17 }
 0x41c   : > { %v4510_v35 = vadd.f32 %v8330_v51, %v4475_v54  ;;  %v4476_v61 = vadd.f32 %v4428_v4, %v8798_v56  ;;  %v6059_v53 = vpop.f32.mrb[68].mxu1 }
 0x41d   : > { %v6060_v2 = vpop.f32.mrb[69].mxu1  ;;  %6106 = vmatpush1.bf16.msra.mxu0 %v6105_v43  ;;  %v8804_v43 = vld [vmem:[#allocation32_spill] sm:$0xff] }
 0x41e   : > { %v4566_v30 = vmul.f32 0.2, %v4510_v35  ;;  %v4511_v11 = vadd.f32 %v8330_v51, %v4476_v61  ;;  %v6061_v38 = vadd.f32 %v6060_v2, %v6059_v53  ;;  %v6062_v22 = vpop.f32.mrb[70].mxu1  ;;  %6107 = vmatprep.subr.bf16.mxu0 %v8796_v6  ;;  %vm4538_vm0 = vcmp.gt.f32.partialorder %v4510_v35, 0.0 }
 0x41f   : > { %v6063_v15 = vpop.f32.mrb[71].mxu1 }
 0x420   : > { %v4567_v13 = vmul.f32 0.2, %v4511_v11  ;;  %v4433_v50 = vadd.f32 %v6061_v38, %v8286_v10  ;;  %v6064_v20 = vadd.f32 %v6063_v15, %v6062_v22  ;;  %vm4539_vm1 = vcmp.gt.f32.partialorder %v4511_v11, 0.0 }
 0x421   : > { %v4594_v46 = vsel %vm4538_vm0, %v4510_v35, %v4566_v30  ;;  %v8805_v30 = vld [vmem:[#allocation7_spill] sm:$0xff] }
 0x422   : > { %v4477_v47 = vadd.f32 %v4433_v50, %v8799_v39  ;;  %v4436_v33 = vadd.f32 %v6064_v20, %v8288_v9  ;;  %v4595_v21 = vsel %vm4539_vm1, %v4511_v11, %v4567_v13  ;;  %v4607_v11 = vrot.slane %v8297_v7, %v8805_v30  ;;  %v8806_v20 = vld [vmem:[#allocation8_spill] sm:$0xff] }
 0x423   : > { %v6108_v58 = vpack.c.bf16 %v4595_v21, %v4594_v46  ;;  %v6399_v13 = vmov 1966171168  }
 0x424   : > { %v4512_v3 = vadd.f32 %v8330_v51, %v4477_v47  ;;  %v4478_v28 = vadd.f32 %v4436_v33, %v8800_v5  ;;  %v6065_v52 = vpop.f32.mrb[72].mxu1  ;;  %v4846_v50 = vunpack.c.l.s4 %v6399_v13 }
 0x425   : > { %v6066_v40 = vpop.f32.mrb[73].mxu1  ;;  %6109 = vmatpush1.bf16.msra.mxu0 %v6108_v58 }
 0x426   : > { %v4568_v27 = vmul.f32 0.2, %v4512_v3  ;;  %v4513_v60 = vadd.f32 %v8330_v51, %v4478_v28  ;;  %v6067_v10 = vadd.f32 %v6066_v40, %v6065_v52  ;;  %v6068_v26 = vpop.f32.mrb[74].mxu1  ;;  %6110 = vmatprep.subr.bf16.mxu0 %v8796_v6  ;;  %vm4540_vm2 = vcmp.gt.f32.partialorder %v4512_v3, 0.0  ;;  %v8807_v40 = vld [vmem:[#allocation6_spill] sm:$0xff] }
 0x427   : > { %v6069_v19 = vpop.f32.mrb[75].mxu1  ;;  %v4847_v46 = vunpack.c.0.s8 %v4846_v50 }
 0x428   : > { %v4569_v9 = vmul.f32 0.2, %v4513_v60  ;;  %v4441_v8 = vadd.f32 %v6067_v10, %v8290_v49  ;;  %v6070_v31 = vadd.f32 %v6069_v19, %v6068_v26  ;;  %vm4541_vm3 = vcmp.gt.f32.partialorder %v4513_v60, 0.0 }
 0x429   : > { %v4596_v14 = vsel %vm4540_vm2, %v4512_v3, %v4568_v27  ;;  %v4850_v27 = vsub.s32 %v4847_v46, %v8807_v40  ;;  %v8808_v19 = vlaneseq }
 0x42a   : > { %v4479_v41 = vadd.f32 %v4441_v8, %v8801_v24  ;;  %v4444_v1 = vadd.f32 %v6070_v31, %v8292_v29  ;;  %v4597_v18 = vsel %vm4541_vm3, %v4513_v60, %v4569_v9 }
 0x42b   : > { %v6111_v42 = vpack.c.bf16 %v4597_v18, %v4596_v14  ;;  %vm4862_vm10 = vcmp.lt.s32.totalorder %v8808_v19, 256 }
 0x42c   : > { %v4514_v62 = vadd.f32 %v8330_v51, %v4479_v41  ;;  %v4480_v12 = vadd.f32 %v4444_v1, %v8802_v36  ;;  %v6071_v25 = vpop.f32.mrb[76].mxu1 }
 0x42d   : > { %v6072_v45 = vpop.f32.mrb[77].mxu1  ;;  %6112 = vmatpush1.bf16.msra.mxu0 %v6111_v42 }
 0x42e   : > { %v4570_v16 = vmul.f32 0.2, %v4514_v62  ;;  %v4515_v55 = vadd.f32 %v8330_v51, %v4480_v12  ;;  %v6073_v49 = vadd.f32 %v6072_v45, %v6071_v25  ;;  %v6074_v0 = vpop.f32.mrb[78].mxu1  ;;  %6113 = vmatprep.subr.bf16.mxu0 %v8796_v6  ;;  %vm4542_vm4 = vcmp.gt.f32.partialorder %v4514_v62, 0.0 }
 0x42f   : > { %v6075_v59 = vpop.f32.mrb[79].mxu1 }
 0x430   : > { %v4571_v29 = vmul.f32 0.2, %v4515_v55  ;;  %v4449_v34 = vadd.f32 %v6073_v49, %v8307_v32  ;;  %v6076_v23 = vadd.f32 %v6075_v59, %v6074_v0  ;;  %vm4543_vm5 = vcmp.gt.f32.partialorder %v4515_v55, 0.0 }
 0x431   : > { %v4598_v37 = vsel %vm4542_vm4, %v4514_v62, %v4570_v16 }
 0x432   : > { %v4481_v48 = vadd.f32 %v4449_v34, %v8803_v63  ;;  %v4452_v54 = vadd.f32 %v6076_v23, %v8312_v57  ;;  %v4599_v4 = vsel %vm4543_vm5, %v4515_v55, %v4571_v29 }
 0x433   : > { %v6114_v17 = vpack.c.bf16 %v4599_v4, %v4598_v37 }
 0x434   : > { %v4516_v44 = vadd.f32 %v8330_v51, %v4481_v48  ;;  %v4482_v35 = vadd.f32 %v4452_v54, %v8804_v43 }
 0x435   : > { %6115 = vmatpush1.bf16.msra.mxu0 %v6114_v17 }
 0x436   : > { %v4572_v56 = vmul.f32 0.2, %v4516_v44  ;;  %v4517_v61 = vadd.f32 %v8330_v51, %v4482_v35  ;;  %6116 = vmatprep.subr.bf16.mxu0 %v8796_v6  ;;  %vm4544_vm6 = vcmp.gt.f32.partialorder %v4516_v44, 0.0  ;;  %v4703_v51 = vld [vmem:[%s8478_s6] sm:$0x3] }
 0x437   : > { %v4788_v6 = vrot.slane %v4703_v51, %v8805_v30  ;;  %v4792_v39 = vrot.slane %v4703_v51, %v8806_v20 }
 0x438   : > { %v4573_v32 = vmul.f32 0.2, %v4517_v61  ;;  %vm4545_vm7 = vcmp.gt.f32.partialorder %v4517_v61, 0.0  ;;  %v4600_v53 = vsel %vm4544_vm6, %v4516_v44, %v4572_v56 }
 0x43a   : > { %v4601_v2 = vsel %vm4545_vm7, %v4517_v61, %v4573_v32 }
 0x43b   : > { %v6117_v57 = vpack.c.bf16 %v4601_v2, %v4600_v53 }
 0x43d   : > { %6118 = vmatpush1.bf16.msra.mxu0 %v6117_v57 }
 0x440   : > { %4681 = vmatmul.mubr.f32.vlgmr.msra.gmra.mrb[80].mxu0 %v4607_v11 }
 0x513   : > { %v4682_v38 = vpop.f32.mrb[80].mxu0 }
 0x514   : > { %v4686_v22 = vpack.c.bf16 %v4682_v38, %v4682_v38  ;;  %v4684_v15 = vpop.f32.mrb[81].mxu0 }
 0x516   : > { %4828 = vmatmul.mubr.bf16.vlgmr.msra.gmra.mrb[80].mxu1 %v4686_v22 }
 0x5e9   : > { %v4829_v47 = vpop.f32.mrb[80].mxu1 }
 0x5ea   : > { %v4830_v7 = vadd.f32 %v4829_v47, %v4788_v6  ;;  %v4831_v33 = vpop.f32.mrb[81].mxu1 }
 0x5eb   : > { %v4832_v21 = vadd.f32 %v4831_v33, %v4792_v39  ;;  %v4833_v58 = vpop.f32.mrb[82].mxu1 }
 0x5ec   : > { %vm4836_vm8 = vcmp.gt.f32.partialorder %v4830_v7, 0.0  ;;  %v4838_v3 = vmul.f32 0.2, %v4830_v7  ;;  %v4834_v5 = vpop.f32.mrb[83].mxu1 }
 0x5ed   : > { %vm4837_vm9 = vcmp.gt.f32.partialorder %v4832_v21, 0.0  ;;  %v4839_v28 = vmul.f32 0.2, %v4832_v21 }
 0x5ee   : > { %v4840_v52 = vsel %vm4836_vm8, %v4830_v7, %v4838_v3 }
 0x5ef   : > { %v4841_v60 = vsel %vm4837_vm9, %v4832_v21, %v4839_v28 }
 0x5f0   : > { %v4844_v10 = vcombine.low %v4840_v52, %v4841_v60 }
 0x5f2   : > { %v4851_v26 = vrot.slane %v4844_v10, %v4850_v27 }
 0x5f4   : > { %v4858_v9 = vrot.slane %v4851_v26, %v4850_v27 }
 0x5f6   : > { %4864 = vst.msk [vmem:[%s320_s23] sm:$0x3] %vm4862_vm10, %v4858_v9 }
 0x5f7 PF: > { %s19_s27 = sadd.s32 1, %s6391_s27  }
 0x5f8   : > { %p16_p5 = scmp.ge.s32.totalorder %s19_s27, 4  }
 0x5fa   :  { %18 = sbr.rel (!%p16_p5) target bundleno = 1 (0x1), region = 89 }
 0x601   :  { %4884 = vsyncpa [#allocation4], 1 }
 0x602   :  { %4886 = vsyncpa [#allocation4 + $0x1], 1 }

</bundles_post_ra>
